<compile_context>
chip_gen: v7x
topology: tpu7x:2x2x1
jax: 0.10.0
libtpu: 0.0.40
codegen_flags: <defaults>
</compile_context>

<pallas_src>
import functools
import math

import jax
import jax.numpy as jnp
from jax.experimental import pallas as pl
from jax.experimental.pallas import tpu as pltpu


def _round_up(n, m):
    return ((n + m - 1) // m) * m


def _mapping_kernel(z_ref, c_ref, we_ref, w0z_ref, w0y_ref, w1_ref, b_ref,
                    w_out_ref, *, w_dim_true):
    eps = 1e-8
    mm_dtype = we_ref.dtype
    prec = (jax.lax.Precision.HIGHEST if mm_dtype == jnp.float32
            else jax.lax.Precision.DEFAULT)

    # --- normalize z (f32) ---
    z = z_ref[...].astype(jnp.float32)
    x = z * jax.lax.rsqrt(jnp.mean(z * z, axis=1, keepdims=True) + eps)

    # --- embed(c): weight gain pre-folded into we_t; bias row 0 (f32) ---
    y = jnp.dot(c_ref[...].astype(mm_dtype), we_ref[...],
                preferred_element_type=jnp.float32, precision=prec)
    y = y + b_ref[0:1, :]
    # Padded output columns are exactly zero -> normalize by the true w_dim.
    y = y * jax.lax.rsqrt(jnp.sum(y * y, axis=1, keepdims=True)
                          * (1.0 / w_dim_true) + eps)

    # --- fc0: cat([x, y]) realized as two matmuls; gain*sqrt2 folded into the
    #     weights, lr_mult*sqrt2 folded into the bias; sqrt2*lrelu(u)=lrelu(sqrt2*u)
    #     and lrelu(u) == max(u, 0.2*u) ---
    h = (jnp.dot(x.astype(mm_dtype), w0z_ref[...],
                 preferred_element_type=jnp.float32, precision=prec)
         + jnp.dot(y.astype(mm_dtype), w0y_ref[...],
                   preferred_element_type=jnp.float32, precision=prec)
         + b_ref[1:2, :])
    h = jnp.maximum(h, 0.2 * h)

    # --- fc1 ---
    h2 = jnp.dot(h.astype(mm_dtype), w1_ref[...],
                 preferred_element_type=jnp.float32, precision=prec) + b_ref[2:3, :]
    h2 = jnp.maximum(h2, 0.2 * h2)

    # Kernel writes only [TILE_B, w_pad]; num_ws broadcast happens in the wrapper.
    w_out_ref[...] = h2.astype(w_out_ref.dtype)


def prepare_mapping_params(params, *, z_dim, lr_multiplier=0.01,
                           matmul_dtype=jnp.bfloat16):
    """One-time host-side prep: transpose weights to [in, out], fold all gains and
    the sqrt(2) lrelu gain in f32, pad the output dim to a multiple of 128 (lane
    dense stores), then cast to the MXU dtype. Call once and cache the result."""
    sqrt2 = math.sqrt(2.0)
    w_embed = jnp.asarray(params["w_embed"], jnp.float32)   # [w_dim, c_dim]
    b_embed = jnp.asarray(params["b_embed"], jnp.float32)   # [w_dim]
    w_fc0 = jnp.asarray(params["w_fc0"], jnp.float32)       # [w_dim, z_dim + w_dim]
    b_fc0 = jnp.asarray(params["b_fc0"], jnp.float32)
    w_fc1 = jnp.asarray(params["w_fc1"], jnp.float32)       # [w_dim, w_dim]
    b_fc1 = jnp.asarray(params["b_fc1"], jnp.float32)
    w_dim, c_dim = w_embed.shape
    assert w_fc0.shape == (w_dim, z_dim + w_dim)
    w_pad = _round_up(w_dim, 128)

    embed_wgain = 1.0 / math.sqrt(c_dim)                        # embed lr_mult = 1
    fc0_gain = (lr_multiplier / math.sqrt(z_dim + w_dim)) * sqrt2
    fc1_gain = (lr_multiplier / math.sqrt(w_dim)) * sqrt2

    we_t = jnp.transpose(w_embed * embed_wgain)                 # [c_dim, w_dim]
    w0z_t = jnp.transpose(w_fc0[:, :z_dim] * fc0_gain)          # [z_dim, w_dim]
    w0y_t = jnp.transpose(w_fc0[:, z_dim:] * fc0_gain)          # [w_dim, w_dim]
    w1_t = jnp.transpose(w_fc1 * fc1_gain)                      # [w_dim, w_dim]
    biases = jnp.stack([b_embed,                                # embed: gain 1, linear
                        b_fc0 * (lr_multiplier * sqrt2),
                        b_fc1 * (lr_multiplier * sqrt2)], axis=0)   # [3, w_dim]

    pad_n = w_pad - w_dim
    if pad_n:
        we_t = jnp.pad(we_t, ((0, 0), (0, pad_n)))
        w0z_t = jnp.pad(w0z_t, ((0, 0), (0, pad_n)))
        w0y_t = jnp.pad(w0y_t, ((0, pad_n), (0, pad_n)))
        w1_t = jnp.pad(w1_t, ((0, pad_n), (0, pad_n)))
        biases = jnp.pad(biases, ((0, 0), (0, pad_n)))

    return {
        "we_t": we_t.astype(matmul_dtype),
        "w0z_t": w0z_t.astype(matmul_dtype),
        "w0y_t": w0y_t.astype(matmul_dtype),
        "w1_t": w1_t.astype(matmul_dtype),
        "biases": biases.astype(jnp.float32),
        "z_dim": int(z_dim), "c_dim": int(c_dim),
        "w_dim": int(w_dim), "w_pad": int(w_pad),
        "matmul_dtype": jnp.dtype(matmul_dtype),
        "lr_multiplier": lr_multiplier,
    }


def mapping_network_forward(z, c, params, *, num_ws, lr_multiplier=0.01,
                            matmul_dtype=jnp.bfloat16, out_dtype=jnp.float32,
                            tile_b=None):
    """z: [B, z_dim], c: [B, c_dim]. `params` is either the raw PyTorch-layout dict
    (w_embed / b_embed / w_fc0 / ...) or the output of prepare_mapping_params
    (preferred: prepare once, outside the step). Returns [B, num_ws, w_dim]."""
    B, z_dim = z.shape
    if "we_t" not in params:
        params = prepare_mapping_params(params, z_dim=z_dim,
                                        lr_multiplier=lr_multiplier,
                                        matmul_dtype=matmul_dtype)
    p = params
    c_dim, w_dim, w_pad = p["c_dim"], p["w_dim"], p["w_pad"]
    mm_dtype = p["matmul_dtype"]
    assert z_dim == p["z_dim"] and c.shape == (B, c_dim)

    # Batch tile: as big as possible (amortize per-step cost) but guarantee >= 2
    # grid steps when B > 8 so the "parallel" axis can split over v7x's two TCs.
    if B <= 8:
        TILE_B = B
    else:
        want = 1024 if tile_b is None else max(8, _round_up(int(tile_b), 8))
        half = _round_up(pl.cdiv(B, 2), 8)
        TILE_B = max(8, min(want, half, 1024))
    grid = (pl.cdiv(B, TILE_B),)

    # Stream activations at matmul precision (halves activation HBM bytes on the
    # bf16 path); f32 normalization / bias / lrelu happen inside the kernel.
    z_in = z if z.dtype == mm_dtype else z.astype(mm_dtype)
    c_in = c if c.dtype == mm_dtype else c.astype(mm_dtype)

    kernel = functools.partial(_mapping_kernel, w_dim_true=w_dim)

    # Generation-aware VMEM budget (v5e/v6e 128 MiB physical, v7x 64 MiB).
    mm_item = jnp.dtype(mm_dtype).itemsize
    out_item = jnp.dtype(out_dtype).itemsize
    weight_bytes = (p["we_t"].size + p["w0z_t"].size + p["w0y_t"].size
                    + p["w1_t"].size) * mm_item + p["biases"].size * 4
    act_bytes = 2 * TILE_B * (z_dim + c_dim) * mm_item
    out_bytes = 2 * TILE_B * w_pad * out_item
    temp_bytes = 6 * TILE_B * w_pad * 4
    try:
        vmem_cap = int(0.75 * pltpu.get_tpu_info().vmem_capacity_bytes)
    except Exception:
        vmem_cap = 48 << 20
    vmem_limit = int(min(vmem_cap,
                         max(16 << 20,
                             2 * (weight_bytes + act_bytes + out_bytes + temp_bytes))))

    batch_map = lambda i: (i, 0)
    const_map = lambda i: (0, 0)

    def _run(single_buffer_weights):
        def const_spec(shape):
            if single_buffer_weights:
                # Constant index_map -> fetched once; no need for a second buffer.
                return pl.BlockSpec(shape, const_map, pipeline_mode=pl.Buffered(1))
            return pl.BlockSpec(shape, const_map)
        return pl.pallas_call(
            kernel,
            out_shape=jax.ShapeDtypeStruct((B, w_pad), out_dtype),
            grid=grid,
            in_specs=[
                pl.BlockSpec((TILE_B, z_dim), batch_map),   # z (batch tiled)
                pl.BlockSpec((TILE_B, c_dim), batch_map),   # c (batch tiled)
                const_spec((c_dim, w_pad)),                 # embed weight (resident)
                const_spec((z_dim, w_pad)),                 # fc0 weight, z slice
                const_spec((w_pad, w_pad)),                 # fc0 weight, embed slice
                const_spec((w_pad, w_pad)),                 # fc1 weight
                const_spec((3, w_pad)),                     # packed f32 biases
            ],
            out_specs=pl.BlockSpec((TILE_B, w_pad), batch_map),
            compiler_params=pltpu.CompilerParams(
                dimension_semantics=("parallel",),          # megacore split on v7x
                vmem_limit_bytes=vmem_limit),
        )(z_in, c_in, p["we_t"], p["w0z_t"], p["w0y_t"], p["w1_t"], p["biases"])

    use_buffered = hasattr(pl, "Buffered")
    try:
        w_flat = _run(use_buffered)
    except Exception:
        if not use_buffered:
            raise
        w_flat = _run(False)    # fall back to default double-buffered weight specs

    if w_pad != w_dim:
        w_flat = w_flat[:, :w_dim]
    # x.unsqueeze(1).repeat([1, num_ws, 1]) — lazy broadcast outside the kernel so
    # the kernel's HBM writeback is not inflated by num_ws.
    return jnp.broadcast_to(w_flat[:, None, :], (B, num_ws, w_dim))


def _reference_forward(z, c, params, *, num_ws, lr_multiplier=0.01):
    """Pure-JAX f32 reference mirroring the PyTorch module."""
    eps = 1e-8
    x = z * jax.lax.rsqrt(jnp.mean(z * z, axis=1, keepdims=True) + eps)
    c_dim = c.shape[1]
    y = c @ (params["w_embed"] * (1.0 / math.sqrt(c_dim))).T + params["b_embed"]
    y = y * jax.lax.rsqrt(jnp.mean(y * y, axis=1, keepdims=True) + eps)
    h = jnp.concatenate([x, y], axis=1)
    for wk, bk in (("w_fc0", "b_fc0"), ("w_fc1", "b_fc1")):
        w = params[wk]
        gain = lr_multiplier / math.sqrt(w.shape[1])
        h = h @ (w * gain).T + params[bk] * lr_multiplier
        h = jnp.where(h >= 0, h, 0.2 * h) * math.sqrt(2.0)
    return jnp.broadcast_to(h[:, None, :], (z.shape[0], num_ws, h.shape[1]))


if __name__ == "__main__":
    # Small synthetic configuration (batch chosen so the auto tile picks grid=(2,)).
    B, z_dim, c_dim, w_dim, num_ws = 16, 32, 8, 32, 4
    lr_multiplier = 0.01

    key = jax.random.PRNGKey(0)
    ks = jax.random.split(key, 8)

    # Deterministic parameter init, matching the module's __init__ scales:
    #   embed.weight = randn([w_dim, c_dim]) * 1
    #   fc*.weight   = randn([out, in]) * (1 / lr_multiplier)
    #   biases       = 0
    params = {
        "w_embed": jax.random.normal(ks[0], (w_dim, c_dim), jnp.float32),
        "b_embed": jnp.zeros((w_dim,), jnp.float32),
        "w_fc0": jax.random.normal(ks[1], (w_dim, z_dim + w_dim), jnp.float32)
                 * (1.0 / lr_multiplier),
        "b_fc0": jnp.zeros((w_dim,), jnp.float32),
        "w_fc1": jax.random.normal(ks[2], (w_dim, w_dim), jnp.float32)
                 * (1.0 / lr_multiplier),
        "b_fc1": jnp.zeros((w_dim,), jnp.float32),
    }

    z = jax.random.normal(ks[3], (B, z_dim), jnp.float32)
    c = jax.random.normal(ks[4], (B, c_dim), jnp.float32)

    ref = _reference_forward(z, c, params, num_ws=num_ws,
                             lr_multiplier=lr_multiplier)

    # f32 matmul path (tight tolerance). Params prepared once, outside the call.
    prep_f32 = prepare_mapping_params(params, z_dim=z_dim,
                                      lr_multiplier=lr_multiplier,
                                      matmul_dtype=jnp.float32)
    out_f32 = mapping_network_forward(z, c, prep_f32, num_ws=num_ws)
    out_f32 = jax.block_until_ready(out_f32)
    assert out_f32.shape == (B, num_ws, w_dim)
    assert jnp.allclose(out_f32, ref, atol=1e-3, rtol=1e-3), "f32 mismatch vs reference"

    # Default bf16-MXU path (full rate on v6e/v7x), looser tolerance vs f32 reference.
    prep_bf16 = prepare_mapping_params(params, z_dim=z_dim,
                                       lr_multiplier=lr_multiplier,
                                       matmul_dtype=jnp.bfloat16)
    out_bf16 = mapping_network_forward(z, c, prep_bf16, num_ws=num_ws)
    out_bf16 = jax.block_until_ready(out_bf16)
    assert out_bf16.shape == (B, num_ws, w_dim)
    assert jnp.allclose(out_bf16, ref, atol=1e-1, rtol=5e-2), "bf16 mismatch vs reference"

    # TODO(synk): w_avg EMA update (update_emas=True), truncation_psi != 1 lerp, and
    # the c_dim == 0 (no embed) branch are not handled in this forward path.
    print("KERNEL_OK")
</pallas_src>

<mosaic_0001>
module attributes {stable_mosaic.version = 11 : i64} {
  func.func @_mapping_kernel(%arg0: i32, %arg1: memref<8x32xf32, #tpu.memory_space<vmem>>, %arg2: memref<8x8xf32, #tpu.memory_space<vmem>>, %arg3: memref<8x128xf32, #tpu.memory_space<vmem>>, %arg4: memref<32x128xf32, #tpu.memory_space<vmem>>, %arg5: memref<128x128xf32, #tpu.memory_space<vmem>>, %arg6: memref<128x128xf32, #tpu.memory_space<vmem>>, %arg7: memref<3x128xf32, #tpu.memory_space<vmem>>, %arg8: memref<8x128xf32, #tpu.memory_space<vmem>>) attributes {dimension_semantics = [#tpu.dimension_semantics<parallel>], iteration_bounds = array<i64: 2>, scalar_prefetch = 0 : i64, scratch_operands = 0 : i64, tpu.core_type = #tpu.core_type<tc>, window_params = [{transform_indices = @transform_0, window_bounds = array<i64: 8, 32>}, {transform_indices = @transform_1, window_bounds = array<i64: 8, 8>}, {pipeline_mode = #tpu.pipeline_mode<synchronous>, transform_indices = @transform_2, window_bounds = array<i64: 8, 128>}, {pipeline_mode = #tpu.pipeline_mode<synchronous>, transform_indices = @transform_3, window_bounds = array<i64: 32, 128>}, {pipeline_mode = #tpu.pipeline_mode<synchronous>, transform_indices = @transform_4, window_bounds = array<i64: 128, 128>}, {pipeline_mode = #tpu.pipeline_mode<synchronous>, transform_indices = @transform_5, window_bounds = array<i64: 128, 128>}, {pipeline_mode = #tpu.pipeline_mode<synchronous>, transform_indices = @transform_6, window_bounds = array<i64: 3, 128>}, {transform_indices = @transform_7, window_bounds = array<i64: 8, 128>}]} {
    %c0 = arith.constant 0 : index
    %c0_0 = arith.constant 0 : index
    %0 = vector.load %arg1[%c0, %c0_0] : memref<8x32xf32, #tpu.memory_space<vmem>>, vector<8x32xf32>
    %1 = arith.mulf %0, %0 : vector<8x32xf32>
    %cst = arith.constant dense<0.000000e+00> : vector<8xf32>
    %2 = vector.multi_reduction <add>, %1, %cst [1] : vector<8x32xf32> to vector<8xf32>
    %3 = vector.shape_cast %2 : vector<8xf32> to vector<8x1xf32>
    %cst_1 = arith.constant 3.200000e+01 : f32
    %4 = vector.broadcast %cst_1 : f32 to vector<8x1xf32>
    %5 = arith.divf %3, %4 : vector<8x1xf32>
    %cst_2 = arith.constant 9.99999993E-9 : f32
    %6 = vector.broadcast %cst_2 : f32 to vector<8x1xf32>
    %7 = arith.addf %5, %6 : vector<8x1xf32>
    %8 = math.rsqrt %7 : vector<8x1xf32>
    %9 = vector.broadcast %8 : vector<8x1xf32> to vector<8x32xf32>
    %10 = arith.mulf %0, %9 : vector<8x32xf32>
    %c0_3 = arith.constant 0 : index
    %c0_4 = arith.constant 0 : index
    %11 = vector.load %arg2[%c0_3, %c0_4] : memref<8x8xf32, #tpu.memory_space<vmem>>, vector<8x8xf32>
    %c0_5 = arith.constant 0 : index
    %c0_6 = arith.constant 0 : index
    %12 = vector.load %arg3[%c0_5, %c0_6] : memref<8x128xf32, #tpu.memory_space<vmem>>, vector<8x128xf32>
    %cst_7 = arith.constant dense<0.000000e+00> : vector<8x128xf32>
    %13 = tpu.matmul %11, %12, %cst_7 {dimension_numbers = #tpu.dot_dimension_numbers<[1], [0], [0], [1], [0, 0, 1, 1], [], []>, precision = #tpu.contract_precision<fp32>} : vector<8x8xf32>, vector<8x128xf32>, vector<8x128xf32> -> vector<8x128xf32>
    %c0_8 = arith.constant 0 : index
    %c0_9 = arith.constant 0 : index
    %14 = vector.load %arg7[%c0_8, %c0_9] : memref<3x128xf32, #tpu.memory_space<vmem>>, vector<1x128xf32>
    %15 = vector.broadcast %14 : vector<1x128xf32> to vector<8x128xf32>
    %16 = arith.addf %13, %15 : vector<8x128xf32>
    %17 = arith.mulf %16, %16 : vector<8x128xf32>
    %cst_10 = arith.constant dense<0.000000e+00> : vector<8xf32>
    %18 = vector.multi_reduction <add>, %17, %cst_10 [1] : vector<8x128xf32> to vector<8xf32>
    %19 = vector.shape_cast %18 : vector<8xf32> to vector<8x1xf32>
    %cst_11 = arith.constant 3.125000e-02 : f32
    %20 = vector.broadcast %cst_11 : f32 to vector<8x1xf32>
    %21 = arith.mulf %19, %20 : vector<8x1xf32>
    %cst_12 = arith.constant 9.99999993E-9 : f32
    %22 = vector.broadcast %cst_12 : f32 to vector<8x1xf32>
    %23 = arith.addf %21, %22 : vector<8x1xf32>
    %24 = math.rsqrt %23 : vector<8x1xf32>
    %25 = vector.broadcast %24 : vector<8x1xf32> to vector<8x128xf32>
    %26 = arith.mulf %16, %25 : vector<8x128xf32>
    %c0_13 = arith.constant 0 : index
    %c0_14 = arith.constant 0 : index
    %27 = vector.load %arg4[%c0_13, %c0_14] : memref<32x128xf32, #tpu.memory_space<vmem>>, vector<32x128xf32>
    %cst_15 = arith.constant dense<0.000000e+00> : vector<8x128xf32>
    %28 = tpu.matmul %10, %27, %cst_15 {dimension_numbers = #tpu.dot_dimension_numbers<[1], [0], [0], [1], [0, 0, 1, 1], [], []>, precision = #tpu.contract_precision<fp32>} : vector<8x32xf32>, vector<32x128xf32>, vector<8x128xf32> -> vector<8x128xf32>
    %c0_16 = arith.constant 0 : index
    %c0_17 = arith.constant 0 : index
    %29 = vector.load %arg5[%c0_16, %c0_17] : memref<128x128xf32, #tpu.memory_space<vmem>>, vector<128x128xf32>
    %cst_18 = arith.constant dense<0.000000e+00> : vector<8x128xf32>
    %30 = tpu.matmul %26, %29, %cst_18 {dimension_numbers = #tpu.dot_dimension_numbers<[1], [0], [0], [1], [0, 0, 1, 1], [], []>, precision = #tpu.contract_precision<fp32>} : vector<8x128xf32>, vector<128x128xf32>, vector<8x128xf32> -> vector<8x128xf32>
    %31 = arith.addf %28, %30 : vector<8x128xf32>
    %c1 = arith.constant 1 : index
    %c0_19 = arith.constant 0 : index
    %32 = vector.load %arg7[%c1, %c0_19] : memref<3x128xf32, #tpu.memory_space<vmem>>, vector<1x128xf32>
    %33 = vector.broadcast %32 : vector<1x128xf32> to vector<8x128xf32>
    %34 = arith.addf %31, %33 : vector<8x128xf32>
    %cst_20 = arith.constant 2.000000e-01 : f32
    %35 = vector.broadcast %cst_20 : f32 to vector<8x128xf32>
    %36 = arith.mulf %35, %34 : vector<8x128xf32>
    %37 = arith.maximumf %34, %36 : vector<8x128xf32>
    %c0_21 = arith.constant 0 : index
    %c0_22 = arith.constant 0 : index
    %38 = vector.load %arg6[%c0_21, %c0_22] : memref<128x128xf32, #tpu.memory_space<vmem>>, vector<128x128xf32>
    %cst_23 = arith.constant dense<0.000000e+00> : vector<8x128xf32>
    %39 = tpu.matmul %37, %38, %cst_23 {dimension_numbers = #tpu.dot_dimension_numbers<[1], [0], [0], [1], [0, 0, 1, 1], [], []>, precision = #tpu.contract_precision<fp32>} : vector<8x128xf32>, vector<128x128xf32>, vector<8x128xf32> -> vector<8x128xf32>
    %c2 = arith.constant 2 : index
    %c0_24 = arith.constant 0 : index
    %40 = vector.load %arg7[%c2, %c0_24] : memref<3x128xf32, #tpu.memory_space<vmem>>, vector<1x128xf32>
    %41 = vector.broadcast %40 : vector<1x128xf32> to vector<8x128xf32>
    %42 = arith.addf %39, %41 : vector<8x128xf32>
    %cst_25 = arith.constant 2.000000e-01 : f32
    %43 = vector.broadcast %cst_25 : f32 to vector<8x128xf32>
    %44 = arith.mulf %43, %42 : vector<8x128xf32>
    %45 = arith.maximumf %42, %44 : vector<8x128xf32>
    %c0_26 = arith.constant 0 : index
    %c0_27 = arith.constant 0 : index
    %46 = vector.load %arg8[%c0_26, %c0_27] : memref<8x128xf32, #tpu.memory_space<vmem>>, vector<8x128xf32>
    tpu.vector_store %arg8[%c0_26, %c0_27], %45 {strides = array<i32>} : memref<8x128xf32, #tpu.memory_space<vmem>>, vector<8x128xf32>,
    return
  }
  func.func @transform_0(%arg0: i32) -> (i32, i32) {
    %c0_i32 = arith.constant 0 : i32
    %c0_i32_0 = arith.constant 0 : i32
    return %arg0, %c0_i32 : i32, i32
  }
  func.func @transform_1(%arg0: i32) -> (i32, i32) {
    %c0_i32 = arith.constant 0 : i32
    %c0_i32_0 = arith.constant 0 : i32
    return %arg0, %c0_i32 : i32, i32
  }
  func.func @transform_2(%arg0: i32) -> (i32, i32) {
    %c0_i32 = arith.constant 0 : i32
    %c0_i32_0 = arith.constant 0 : i32
    %c0_i32_1 = arith.constant 0 : i32
    return %c0_i32, %c0_i32_0 : i32, i32
  }
  func.func @transform_3(%arg0: i32) -> (i32, i32) {
    %c0_i32 = arith.constant 0 : i32
    %c0_i32_0 = arith.constant 0 : i32
    %c0_i32_1 = arith.constant 0 : i32
    return %c0_i32, %c0_i32_0 : i32, i32
  }
  func.func @transform_4(%arg0: i32) -> (i32, i32) {
    %c0_i32 = arith.constant 0 : i32
    %c0_i32_0 = arith.constant 0 : i32
    %c0_i32_1 = arith.constant 0 : i32
    return %c0_i32, %c0_i32_0 : i32, i32
  }
  func.func @transform_5(%arg0: i32) -> (i32, i32) {
    %c0_i32 = arith.constant 0 : i32
    %c0_i32_0 = arith.constant 0 : i32
    %c0_i32_1 = arith.constant 0 : i32
    return %c0_i32, %c0_i32_0 : i32, i32
  }
  func.func @transform_6(%arg0: i32) -> (i32, i32) {
    %c0_i32 = arith.constant 0 : i32
    %c0_i32_0 = arith.constant 0 : i32
    %c0_i32_1 = arith.constant 0 : i32
    return %c0_i32, %c0_i32_0 : i32, i32
  }
  func.func @transform_7(%arg0: i32) -> (i32, i32) {
    %c0_i32 = arith.constant 0 : i32
    %c0_i32_0 = arith.constant 0 : i32
    return %arg0, %c0_i32 : i32, i32
  }
}

module attributes {stable_mosaic.version = 11 : i64} {
  func.func @_mapping_kernel(%arg0: i32, %arg1: memref<8x32xf32, #tpu.memory_space<vmem>>, %arg2: memref<8x8xf32, #tpu.memory_space<vmem>>, %arg3: memref<8x128xf32, #tpu.memory_space<vmem>>, %arg4: memref<32x128xf32, #tpu.memory_space<vmem>>, %arg5: memref<128x128xf32, #tpu.memory_space<vmem>>, %arg6: memref<128x128xf32, #tpu.memory_space<vmem>>, %arg7: memref<3x128xf32, #tpu.memory_space<vmem>>, %arg8: memref<8x128xf32, #tpu.memory_space<vmem>>) attributes {dimension_semantics = [#tpu.dimension_semantics<parallel>], iteration_bounds = array<i64: 2>, scalar_prefetch = 0 : i64, scratch_operands = 0 : i64, tpu.core_type = #tpu.core_type<tc>, window_params = [{transform_indices = @transform_0, window_bounds = array<i64: 8, 32>}, {transform_indices = @transform_1, window_bounds = array<i64: 8, 8>}, {pipeline_mode = #tpu.pipeline_mode<synchronous>, transform_indices = @transform_2, window_bounds = array<i64: 8, 128>}, {pipeline_mode = #tpu.pipeline_mode<synchronous>, transform_indices = @transform_3, window_bounds = array<i64: 32, 128>}, {pipeline_mode = #tpu.pipeline_mode<synchronous>, transform_indices = @transform_4, window_bounds = array<i64: 128, 128>}, {pipeline_mode = #tpu.pipeline_mode<synchronous>, transform_indices = @transform_5, window_bounds = array<i64: 128, 128>}, {pipeline_mode = #tpu.pipeline_mode<synchronous>, transform_indices = @transform_6, window_bounds = array<i64: 3, 128>}, {transform_indices = @transform_7, window_bounds = array<i64: 8, 128>}]} {
    %c0 = arith.constant 0 : index
    %c0_0 = arith.constant 0 : index
    %0 = vector.load %arg1[%c0, %c0_0] : memref<8x32xf32, #tpu.memory_space<vmem>>, vector<8x32xf32>
    %1 = arith.mulf %0, %0 : vector<8x32xf32>
    %cst = arith.constant dense<0.000000e+00> : vector<8xf32>
    %2 = vector.multi_reduction <add>, %1, %cst [1] : vector<8x32xf32> to vector<8xf32>
    %3 = vector.shape_cast %2 : vector<8xf32> to vector<8x1xf32>
    %cst_1 = arith.constant 3.200000e+01 : f32
    %4 = vector.broadcast %cst_1 : f32 to vector<8x1xf32>
    %5 = arith.divf %3, %4 : vector<8x1xf32>
    %cst_2 = arith.constant 9.99999993E-9 : f32
    %6 = vector.broadcast %cst_2 : f32 to vector<8x1xf32>
    %7 = arith.addf %5, %6 : vector<8x1xf32>
    %8 = math.rsqrt %7 : vector<8x1xf32>
    %9 = vector.broadcast %8 : vector<8x1xf32> to vector<8x32xf32>
    %10 = arith.mulf %0, %9 : vector<8x32xf32>
    %c0_3 = arith.constant 0 : index
    %c0_4 = arith.constant 0 : index
    %11 = vector.load %arg2[%c0_3, %c0_4] : memref<8x8xf32, #tpu.memory_space<vmem>>, vector<8x8xf32>
    %c0_5 = arith.constant 0 : index
    %c0_6 = arith.constant 0 : index
    %12 = vector.load %arg3[%c0_5, %c0_6] : memref<8x128xf32, #tpu.memory_space<vmem>>, vector<8x128xf32>
    %cst_7 = arith.constant dense<0.000000e+00> : vector<8x128xf32>
    %13 = tpu.matmul %11, %12, %cst_7 {dimension_numbers = #tpu.dot_dimension_numbers<[1], [0], [0], [1], [0, 0, 1, 1], [], []>, precision = #tpu.contract_precision<fp32>} : vector<8x8xf32>, vector<8x128xf32>, vector<8x128xf32> -> vector<8x128xf32>
    %c0_8 = arith.constant 0 : index
    %c0_9 = arith.constant 0 : index
    %14 = vector.load %arg7[%c0_8, %c0_9] : memref<3x128xf32, #tpu.memory_space<vmem>>, vector<1x128xf32>
    %15 = vector.broadcast %14 : vector<1x128xf32> to vector<8x128xf32>
    %16 = arith.addf %13, %15 : vector<8x128xf32>
    %17 = arith.mulf %16, %16 : vector<8x128xf32>
    %cst_10 = arith.constant dense<0.000000e+00> : vector<8xf32>
    %18 = vector.multi_reduction <add>, %17, %cst_10 [1] : vector<8x128xf32> to vector<8xf32>
    %19 = vector.shape_cast %18 : vector<8xf32> to vector<8x1xf32>
    %cst_11 = arith.constant 3.125000e-02 : f32
    %20 = vector.broadcast %cst_11 : f32 to vector<8x1xf32>
    %21 = arith.mulf %19, %20 : vector<8x1xf32>
    %cst_12 = arith.constant 9.99999993E-9 : f32
    %22 = vector.broadcast %cst_12 : f32 to vector<8x1xf32>
    %23 = arith.addf %21, %22 : vector<8x1xf32>
    %24 = math.rsqrt %23 : vector<8x1xf32>
    %25 = vector.broadcast %24 : vector<8x1xf32> to vector<8x128xf32>
    %26 = arith.mulf %16, %25 : vector<8x128xf32>
    %c0_13 = arith.constant 0 : index
    %c0_14 = arith.constant 0 : index
    %27 = vector.load %arg4[%c0_13, %c0_14] : memref<32x128xf32, #tpu.memory_space<vmem>>, vector<32x128xf32>
    %cst_15 = arith.constant dense<0.000000e+00> : vector<8x128xf32>
    %28 = tpu.matmul %10, %27, %cst_15 {dimension_numbers = #tpu.dot_dimension_numbers<[1], [0], [0], [1], [0, 0, 1, 1], [], []>, precision = #tpu.contract_precision<fp32>} : vector<8x32xf32>, vector<32x128xf32>, vector<8x128xf32> -> vector<8x128xf32>
    %c0_16 = arith.constant 0 : index
    %c0_17 = arith.constant 0 : index
    %29 = vector.load %arg5[%c0_16, %c0_17] : memref<128x128xf32, #tpu.memory_space<vmem>>, vector<128x128xf32>
    %cst_18 = arith.constant dense<0.000000e+00> : vector<8x128xf32>
    %30 = tpu.matmul %26, %29, %cst_18 {dimension_numbers = #tpu.dot_dimension_numbers<[1], [0], [0], [1], [0, 0, 1, 1], [], []>, precision = #tpu.contract_precision<fp32>} : vector<8x128xf32>, vector<128x128xf32>, vector<8x128xf32> -> vector<8x128xf32>
    %31 = arith.addf %28, %30 : vector<8x128xf32>
    %c1 = arith.constant 1 : index
    %c0_19 = arith.constant 0 : index
    %32 = vector.load %arg7[%c1, %c0_19] : memref<3x128xf32, #tpu.memory_space<vmem>>, vector<1x128xf32>
    %33 = vector.broadcast %32 : vector<1x128xf32> to vector<8x128xf32>
    %34 = arith.addf %31, %33 : vector<8x128xf32>
    %cst_20 = arith.constant 2.000000e-01 : f32
    %35 = vector.broadcast %cst_20 : f32 to vector<8x128xf32>
    %36 = arith.mulf %35, %34 : vector<8x128xf32>
    %37 = arith.maximumf %34, %36 : vector<8x128xf32>
    %c0_21 = arith.constant 0 : index
    %c0_22 = arith.constant 0 : index
    %38 = vector.load %arg6[%c0_21, %c0_22] : memref<128x128xf32, #tpu.memory_space<vmem>>, vector<128x128xf32>
    %cst_23 = arith.constant dense<0.000000e+00> : vector<8x128xf32>
    %39 = tpu.matmul %37, %38, %cst_23 {dimension_numbers = #tpu.dot_dimension_numbers<[1], [0], [0], [1], [0, 0, 1, 1], [], []>, precision = #tpu.contract_precision<fp32>} : vector<8x128xf32>, vector<128x128xf32>, vector<8x128xf32> -> vector<8x128xf32>
    %c2 = arith.constant 2 : index
    %c0_24 = arith.constant 0 : index
    %40 = vector.load %arg7[%c2, %c0_24] : memref<3x128xf32, #tpu.memory_space<vmem>>, vector<1x128xf32>
    %41 = vector.broadcast %40 : vector<1x128xf32> to vector<8x128xf32>
    %42 = arith.addf %39, %41 : vector<8x128xf32>
    %cst_25 = arith.constant 2.000000e-01 : f32
    %43 = vector.broadcast %cst_25 : f32 to vector<8x128xf32>
    %44 = arith.mulf %43, %42 : vector<8x128xf32>
    %45 = arith.maximumf %42, %44 : vector<8x128xf32>
    %c0_26 = arith.constant 0 : index
    %c0_27 = arith.constant 0 : index
    %46 = vector.load %arg8[%c0_26, %c0_27] : memref<8x128xf32, #tpu.memory_space<vmem>>, vector<8x128xf32>
    tpu.vector_store %arg8[%c0_26, %c0_27], %45 {strides = array<i32>} : memref<8x128xf32, #tpu.memory_space<vmem>>, vector<8x128xf32>,
    return
  }
  func.func @transform_0(%arg0: i32) -> (i32, i32) {
    %c0_i32 = arith.constant 0 : i32
    %c0_i32_0 = arith.constant 0 : i32
    return %arg0, %c0_i32 : i32, i32
  }
  func.func @transform_1(%arg0: i32) -> (i32, i32) {
    %c0_i32 = arith.constant 0 : i32
    %c0_i32_0 = arith.constant 0 : i32
    return %arg0, %c0_i32 : i32, i32
  }
  func.func @transform_2(%arg0: i32) -> (i32, i32) {
    %c0_i32 = arith.constant 0 : i32
    %c0_i32_0 = arith.constant 0 : i32
    %c0_i32_1 = arith.constant 0 : i32
    return %c0_i32, %c0_i32_0 : i32, i32
  }
  func.func @transform_3(%arg0: i32) -> (i32, i32) {
    %c0_i32 = arith.constant 0 : i32
    %c0_i32_0 = arith.constant 0 : i32
    %c0_i32_1 = arith.constant 0 : i32
    return %c0_i32, %c0_i32_0 : i32, i32
  }
  func.func @transform_4(%arg0: i32) -> (i32, i32) {
    %c0_i32 = arith.constant 0 : i32
    %c0_i32_0 = arith.constant 0 : i32
    %c0_i32_1 = arith.constant 0 : i32
    return %c0_i32, %c0_i32_0 : i32, i32
  }
  func.func @transform_5(%arg0: i32) -> (i32, i32) {
    %c0_i32 = arith.constant 0 : i32
    %c0_i32_0 = arith.constant 0 : i32
    %c0_i32_1 = arith.constant 0 : i32
    return %c0_i32, %c0_i32_0 : i32, i32
  }
  func.func @transform_6(%arg0: i32) -> (i32, i32) {
    %c0_i32 = arith.constant 0 : i32
    %c0_i32_0 = arith.constant 0 : i32
    %c0_i32_1 = arith.constant 0 : i32
    return %c0_i32, %c0_i32_0 : i32, i32
  }
  func.func @transform_7(%arg0: i32) -> (i32, i32) {
    %c0_i32 = arith.constant 0 : i32
    %c0_i32_0 = arith.constant 0 : i32
    return %arg0, %c0_i32 : i32, i32
  }
}

</mosaic_0001>

<bundles_post_ra>
// kernel: tpu_custom_call.1
= control target key start
LH: loop header
LB: loop body
LE: loop exit
PB: predicated region body
PF: predicated region fallthrough
CT: control target
= control target key end

     0   :  { %12 = vsyncpa [#allocation3], 0  ;;  %s5176_s0 = inlined_call_operand.hbm [shape: f32[16,32], index: 0, kind: input, shape index: {}]   ;;  %s5177_s1 = inlined_call_operand.vmem [shape: f32[16,8], index: 1, kind: input, shape index: {}]   ;;  %s5178_s2 = inlined_call_operand.hbm [shape: f32[8,128], index: 2, kind: input, shape index: {}]   ;;  %s5179_s3 = inlined_call_operand.vmem [shape: f32[32,128], index: 3, kind: input, shape index: {}]   ;;  %s5180_s4 = inlined_call_operand.hbm [shape: f32[128,128], index: 4, kind: input, shape index: {}]   ;;  %s5181_s5 = inlined_call_operand.hbm [shape: f32[128,128], index: 5, kind: input, shape index: {}]   ;;  %s5182_s6 = inlined_call_operand.vmem [shape: f32[3,128], index: 6, kind: input, shape index: {}]   ;;  %s5183_s7 = inlined_call_operand.hbm [shape: f32[16,128], index: 7, kind: output, shape index: {}]  }
   0x1   :  { %14 = vsyncpa [#allocation3 + $0x1], 0 }
   0x2   :  { %15 = vsyncpa [#allocation6], 0 }
   0x3   :  { %16 = vsyncpa [#allocation9], 0 }
   0x4   :  { %17 = vsyncpa [#allocation4], 0 }
   0x5   :  { %19 = vsyncpa [#allocation4 + $0x1], 0  ;;  %s4230_s24 = smov 0   ;;  %s4232_s25 = smov 0  }
   0x6   :  { %s4234_s26 = smov 0   ;;  %s4236_s27 = smov 0  }
   0x7 LB: > { %s4251_s28 = sadd.s32 4294967295, %s4178_s27   ;;  %s2775_s29 = sadd.s32 4294967294, %s4178_s27   ;;  %s4178_s27 = sphi %s4236_s27, %s5268_s27   ;;  %s4174_s26 = sphi %s4234_s26, %s5267_s26   ;;  %s4170_s25 = sphi %s4232_s25, %s5266_s25   ;;  %s4166_s24 = sphi %s4230_s24, %s5265_s24  }
   0x8   : > { %p45_p0 = scmp.ne.s32.totalorder %s4170_s25, %s4166_s24  ;;  %p5184_p1 = scmp.eq.s32.totalorder %s4251_s28, 0 }
   0x9   : > { %p206_p3 = scmp.eq.s32.totalorder %s2775_s29, 1  ;;  %p2776_p5 = scmp.ge.s32.totalorder %s4178_s27, 1 }
   0xa   : > { %p4260_p4 = por %p5184_p1, %p45_p0  ;;  %p213_p7 = scmp.lt.s32.totalorder %s4178_s27, 3 }
   0xb   : > { %p4265_p6 = por %p206_p3, %p45_p0  ;;  %s4180_s10 = smov [#allocation5]  }
   0xc   : > { %s5216_s30 = scalar_select %p4260_p4, 1, 0 }
   0xd   : > { %s5217_s8 = scalar_select %p4265_p6, 1, 0 }
   0xe   : > { %p4270_p8 = pnand %p2776_p5, %p213_p7  ;;  %s226_s11 = sshll.u32 %s4180_s10, 4  ;;  %s227_s11 = int_to_ptr.vmem [resolvable:$true] %s226_s11 }
   0xf   : > { %s4181_s12 = smov [#allocation7]   ;;  %s4182_s15 = smov [#allocation8]  }
  0x10   : > { %s5218_s9 = scalar_select %p4270_p8, 1, 0 }
  0x11   : > { %p3920_p10 = pneg %p4270_p8  ;;  %s239_s13 = sshll.u32 %s4181_s12, 4  ;;  %s4283_s13 = int_to_ptr.vmem [resolvable:$true] %s239_s13 }
  0x12   : > { %s4285_s16 = sshll.u32 %s4182_s15, 4  ;;  %s3990_s19 = scalar_lea.hbm %s5178_s2, 128  ;;  %s253_s16 = int_to_ptr.vmem [resolvable:$true] %s4285_s16 }
  0x13   : > { %p4279_p11 = pnand %p3920_p10, %p5184_p1  ;;  %p3991_p12 = scmp.ne.s32.totalorder %s5178_s2, %s3990_s19 }
  0x14   : > { %p3997_p5 = scmp.lt.u32.totalorder %s3990_s19, %s5178_s2 }
  0x15   : > { %p4295_p13 = pneg %p4279_p11 }
  0x17   : > { %p3993_p0 = pnand %p4295_p13, %p3991_p12 }
  0x19   : > { %p3994_p3 = pneg %p3993_p0 }
  0x1b   : > { %p3999_p7 = pnand %p3997_p5, %p3994_p3 }
  0x1d   : > { %4002 = shalt.err (!%p3999_p7)
}
  0x1e   : > { %s4003_s10 = scalar_lea.vmem %s227_s11, 128  ;;  %p4011_p2 = scmp.lt.s32.totalorder %s227_s11, %s227_s11 }
  0x1f   : > { %p4004_p10 = scmp.ne.s32.totalorder %s227_s11, %s4003_s10  ;;  %p4012_p6 = scmp.lt.s32.totalorder %s4003_s10, %s4003_s10 }
  0x21   : > { %p4006_p9 = pnand %p4004_p10, %p4295_p13  ;;  %p4013_p4 = por %p4012_p6, %p4011_p2 }
  0x23   : > { %p4007_p1 = pneg %p4006_p9 }
  0x25   : > { %p4014_p8 = pnand %p4013_p4, %p4007_p1 }
  0x27   : > { %4017 = shalt.err (!%p4014_p8)
}
  0x28   : > { %3923 = dma.hbm_to_vmem [thread:$0]  (!%p4279_p11), %s5178_s2, 128, %s227_s11, [#allocation6]  }
  0x29   : > { %s4018_s19 = scalar_lea.hbm %s5180_s4, 2048 }
  0x2a   : > { %p4019_p9 = scmp.ne.s32.totalorder %s5180_s4, %s4018_s19  ;;  %p4025_p1 = scmp.lt.u32.totalorder %s4018_s19, %s5180_s4 }
  0x2c   : > { %p4021_p12 = pnand %p4019_p9, %p4295_p13 }
  0x2e   : > { %p4022_p2 = pneg %p4021_p12 }
  0x30   : > { %p4027_p4 = pnand %p4025_p1, %p4022_p2 }
  0x32   : > { %4030 = shalt.err (!%p4027_p4)
}
  0x33   : > { %s4031_s11 = scalar_lea.vmem %s4283_s13, 2048  ;;  %p4039_p3 = scmp.lt.s32.totalorder %s4283_s13, %s4283_s13 }
  0x34   : > { %p4032_p6 = scmp.ne.s32.totalorder %s4283_s13, %s4031_s11  ;;  %p4040_p5 = scmp.lt.s32.totalorder %s4031_s11, %s4031_s11 }
  0x36   : > { %p4034_p8 = pnand %p4032_p6, %p4295_p13  ;;  %p4041_p7 = por %p4040_p5, %p4039_p3 }
  0x38   : > { %p4035_p0 = pneg %p4034_p8 }
  0x3a   : > { %p4042_p10 = pnand %p4041_p7, %p4035_p0 }
  0x3c   : > { %4045 = shalt.err (!%p4042_p10)
}
  0x3d   : > { %s4183_s10 = smov 128   ;;  %s4184_s12 = smov 8  }
  0x3e   : > { %3926 = dma.hbm_to_vmem [thread:$0]  (!%p4279_p11), %s5180_s4, 2048, %s4283_s13, [#allocation6], %s4183_s10, %s4183_s10, %s4184_s12  }
  0x3f   : > { %s4046_s20 = scalar_lea.hbm %s5181_s5, 2048 }
  0x40   : > { %p4047_p9 = scmp.ne.s32.totalorder %s5181_s5, %s4046_s20  ;;  %p4053_p1 = scmp.lt.u32.totalorder %s4046_s20, %s5181_s5 }
  0x42   : > { %p4049_p12 = pnand %p4047_p9, %p4295_p13 }
  0x44   : > { %p4050_p2 = pneg %p4049_p12 }
  0x46   : > { %p4055_p4 = pnand %p4053_p1, %p4050_p2 }
  0x48   : > { %4058 = shalt.err (!%p4055_p4)
}
  0x49   : > { %s4059_s15 = scalar_lea.vmem %s253_s16, 2048  ;;  %p4067_p3 = scmp.lt.s32.totalorder %s253_s16, %s253_s16 }
  0x4a   : > { %p4060_p6 = scmp.ne.s32.totalorder %s253_s16, %s4059_s15  ;;  %p4068_p5 = scmp.lt.s32.totalorder %s4059_s15, %s4059_s15 }
  0x4c   : > { %p4062_p8 = pnand %p4060_p6, %p4295_p13  ;;  %p4069_p7 = por %p4068_p5, %p4067_p3 }
  0x4e   : > { %p4063_p0 = pneg %p4062_p8 }
  0x50   : > { %p4070_p10 = pnand %p4069_p7, %p4063_p0 }
  0x52   : > { %4073 = shalt.err (!%p4070_p10)
}
  0x53   : > { %3929 = dma.hbm_to_vmem [thread:$0]  (!%p4279_p11), %s5181_s5, 2048, %s253_s16, [#allocation9], %s4183_s10, %s4183_s10, %s4184_s12  }
  0x54   : > { %s4354_s22 = sadd.s32 1, %s4178_s27   ;;  %s32_s14 = sadd.s32 1, %s4174_s26 }
  0x55   : > { %s29_s18 = ssub.s32 %s4178_s27, %s4354_s22  ;;  %p39_p9 = scmp.ne.s32.totalorder %s4174_s26, %s4170_s25 }
  0x56   : > { %p30_p13 = scmp.eq.s32.totalorder %s29_s18, 0  ;;  %p40_p12 = scmp.eq.s32.totalorder %s4178_s27, 0 }
  0x57   : > { %p3941_p2 = scmp.lt.s32.totalorder %s4178_s27, 2  ;;  %p5221_p4 = scmp.eq.s32.totalorder %s4251_s28, 1 }
  0x58   : > { %s4364_s19 = scalar_select %p30_p13, %s4174_s26, %s32_s14  }
  0x59   : > { %p41_p1 = por %p40_p12, %p39_p9  ;;  %p4368_p6 = por %p5221_p4, %p39_p9 }
  0x5a   : > { %s269_s21 = sand.u32 1, %s4174_s26   ;;  %s2782_s23 = sshll.u32 %s4178_s27, 7 }
  0x5b   : > { %s2781_s16 = sshll.u32 %s269_s21, 3  ;;  %s4377_s29 = scalar_lea.hbm %s5176_s0, %s2782_s23 }
  0x5c   : > { %s273_s11 = scalar_lea.vmem [#allocation2], %s2781_s16  ;;  %p4379_p11 = pnand %p3941_p2, %p41_p1 }
  0x5d   : > { %s280_s15 = sshll.u32 %s273_s11, 4  ;;  %s270_s17 = scalar_lea.sflag [#allocation3], %s269_s21  ;;  %s4383_s15 = int_to_ptr.vmem [resolvable:$true] %s280_s15 }
  0x5e   : > { %s4074_s18 = scalar_lea.hbm %s4377_s29, 128  ;;  %p4076_p0 = pneg %p4379_p11 }
  0x5f   : > { %p4075_p8 = scmp.ne.s32.totalorder %s4377_s29, %s4074_s18  ;;  %s4079_s16 = scalar_lea.hbm %s5176_s0, 256 }
  0x60   : > { %p4080_p7 = scmp.lt.u32.totalorder %s4377_s29, %s5176_s0  ;;  %p4081_p10 = scmp.lt.u32.totalorder %s4079_s16, %s4074_s18 }
  0x61   : > { %p4077_p3 = pnand %p4076_p0, %p4075_p8  ;;  %p4083_p9 = scmp.lt.u32.totalorder %s4074_s18, %s4377_s29 }
  0x62   : > { %p4082_p13 = por %p4081_p10, %p4080_p7 }
  0x63   : > { %p4078_p5 = pneg %p4077_p3 }
  0x64   : > { %p4084_p12 = por %p4083_p9, %p4082_p13 }
  0x66   : > { %p4085_p2 = pnand %p4084_p12, %p4078_p5 }
  0x68   : > { %4088 = shalt.err (!%p4085_p2)
}
  0x69   : > { %s4089_s21 = scalar_lea.vmem %s4383_s15, 128  ;;  %s4185_s11 = smov [#allocation2]  }
  0x6a   : > { %p4090_p1 = scmp.ne.s32.totalorder %s4383_s15, %s4089_s21  ;;  %s4094_s14 = sshll.u32 %s4185_s11, 4  ;;  %s4095_s14 = int_to_ptr.vmem [resolvable:$false] %s4094_s14 }
  0x6b   : > { %s4096_s23 = scalar_lea.vmem %s4095_s14, 256  ;;  %p4097_p3 = scmp.lt.s32.totalorder %s4383_s15, %s4095_s14 }
  0x6c   : > { %p4092_p4 = pnand %p4090_p1, %p4076_p0  ;;  %p4098_p7 = scmp.lt.s32.totalorder %s4096_s23, %s4089_s21 }
  0x6e   : > { %p4093_p8 = pneg %p4092_p4  ;;  %p4099_p10 = por %p4098_p7, %p4097_p3 }
  0x70   : > { %p4100_p13 = pnand %p4099_p10, %p4093_p8 }
  0x72   : > { %4103 = shalt.err (!%p4100_p13)
}
  0x73   : > { %3933 = dma.hbm_to_vmem [thread:$0]  (!%p4379_p11), %s4377_s29, 128, %s4383_s15, %s270_s17  }
  0x74   : > { %p5224_p5 = scmp.ne.s32.totalorder %s5218_s9, 0 }
  0x75   : > { %s4413_s18 = sand.u32 (!%p5224_p5), 1, %s4170_s25   ;;  %p5225_p0 = scmp.ne.s32.totalorder (!%p5224_p5), %s5216_s30, 0 }
  0x76   : > { %296 = sbr.rel (%p5224_p5) target bundleno = 1361 (0x551), region = 48  ;;  %s2784_s16 = sshll.u32 (!%p5224_p5), %s4413_s18, 3 }
  0x77   : > { %s299_s10 = scalar_lea.sflag (!%p5224_p5), [#allocation3], %s4413_s18  ;;  %s4419_s12 = scalar_lea.vmem (!%p5224_p5), [#allocation2], %s2784_s16 }
  0x7d   : > { %4149 = dma.done.wait (%p5225_p0), %s299_s10, 128  }
  0x7e   : > { %4151 = vsyncadd (%p5225_p0), %s299_s10, 4294967168  ;;  %p5226_p11 = scmp.eq.s32.totalorder %s4251_s28, 0 }
  0x80   : > { %4153 = dma.done.wait (%p5226_p11), [#allocation6], 2176   ;;  %p5227_p9 = pmov %p5226_p11 }
  0x82   : > { %4155 = vsyncadd (%p5227_p9), [#allocation6], 4294965120  ;;  %p5228_p12 = pmov %p5227_p9 }
  0x83   : > { %p5229_p2 = pmov %p5227_p9 }
  0x84   : > { %4157 = dma.done.wait (%p5228_p12), [#allocation9], 2048  }
  0x85   : > { %4159 = vsyncadd (%p5229_p2), [#allocation9], 4294965248  ;;  %p349_p1 = scmp.lt.s32.totalorder %s4251_s28, 1  ;;  %v4186_v0 = vmov 0.0   ;;  %vm4187_vm0 = vmmov 0   ;;  %vm371_vm1 = vcmask 64512  }
  0x86   : > { %3048 = vmatprep.subr.mxu0 %v4186_v0  ;;  %3050 = vmatprep.mubr.msk.f32.mxu0 %vm4187_vm0, %v4186_v0  ;;  %v365_v1 = vld [vmem:[#allocation5] sm:$0xff]  ;;  %v832_v14 = vld [vmem:[#allocation7] sm:$0xff]  ;;  %v833_v15 = vld [vmem:[#allocation7 + $0x8] sm:$0xff]  ;;  %v4188_v17 = vmov 0.0|0.0   ;;  %vm355_vm2 = vcmask 261120   ;;  %s2794_s11 = sshll.u32 %s4251_s28, 7 }
  0x87   : > { %s350_s30 = scalar_select %p349_p1, %s4251_s28, 1  ;;  %3043 = vmatprep.subr.mxu1 %v4186_v0  ;;  %3045 = vmatprep.mubr.msk.f32.mxu1 %vm4187_vm0, %v4186_v0  ;;  %v376_v3 = vand.u32 4294901760, %v365_v1  ;;  %v834_v16 = vld [vmem:[#allocation7 + $0x10] sm:$0xff]  ;;  %v849_v18 = vand.u32 4294901760, %v832_v14  ;;  %v852_v19 = vand.u32 4294901760, %v833_v15  ;;  %v835_v20 = vld [vmem:[#allocation7 + $0x18] sm:$0xff] }
  0x88   : > { %v855_v21 = vand.u32 4294901760, %v834_v16  ;;  %v858_v22 = vand.u32 4294901760, %v835_v20  ;;  %v2790_v31 = vld [vmem:[%s5182_s6] ss:$0 sm:$0xff]  ;;  %v836_v40 = vld [vmem:[#allocation7 + $0x20] sm:$0xff]  ;;  %v838_v45 = vld [vmem:[#allocation7 + $0x30] sm:$0xff] }
  0x89   : > { %s2789_s9 = sshll.u32 %s350_s30, 3  ;;  %v453_v6 = vsub.f32 %v365_v1, %v376_v3  ;;  %3044 = vmatpush3.msra.mxu1 %v376_v3  ;;  %v4462_v23 = vpack.c.bf16 %v852_v19, %v849_v18  ;;  %v4464_v24 = vsub.f32 %v832_v14, %v849_v18  ;;  %v4466_v25 = vsub.f32 %v833_v15, %v852_v19  ;;  %v4482_v33 = vld [vmem:[%s4419_s12] sm:$0xff]  ;;  %v839_v46 = vld [vmem:[#allocation7 + $0x38] sm:$0xff]  ;;  %v840_v50 = vld [vmem:[#allocation7 + $0x40] sm:$0xff]  ;;  %s348_s14 = scalar_lea.vmem [#allocation10], %s2784_s16 }
  0x8a   : > { %s352_s13 = scalar_lea.vmem %s5177_s1, %s2789_s9  ;;  %3703 = vmatprep.subr.bf16.mxu1 %v4188_v17  ;;  %v4468_v26 = vsub.f32 %v834_v16, %v855_v21  ;;  %v4470_v27 = vsub.f32 %v835_v20, %v858_v22  ;;  %v4473_v28 = vpack.c.bf16 %v858_v22, %v855_v21  ;;  %v354_v37 = vmul.f32 %v4482_v33, %v4482_v33  ;;  %v837_v41 = vld [vmem:[#allocation7 + $0x28] sm:$0xff]  ;;  %v842_v55 = vld [vmem:[#allocation7 + $0x50] sm:$0xff]  ;;  %v843_v56 = vld [vmem:[#allocation7 + $0x58] sm:$0xff]  ;;  %s2664_s23 = sshll.u32 %s348_s14, 4  ;;  %s5134_s23 = int_to_ptr.vmem [resolvable:$true] %s2664_s23 }
  0x8b   : > { %v364_v2 = vld [vmem:[%s352_s13] sm:$0xff]  ;;  %v454_v8 = vand.u32 4294901760, %v453_v6  ;;  %v861_v42 = vand.u32 4294901760, %v836_v40  ;;  %v864_v43 = vand.u32 4294901760, %v837_v41  ;;  %v867_v47 = vand.u32 4294901760, %v838_v45  ;;  %v844_v60 = vld [vmem:[#allocation7 + $0x60] sm:$0xff]  ;;  %s5132_s30 = scalar_lea.hbm %s5183_s7, %s2794_s11 }
  0x8c   : > { %v373_v4 = vsel %vm371_vm1, %v364_v2, 0  ;;  %v356_v39 = vsel %vm355_vm2, %v354_v37, 0.0  ;;  %v870_v48 = vand.u32 4294901760, %v839_v46  ;;  %v841_v51 = vld [vmem:[#allocation7 + $0x48] sm:$0xff]  ;;  %v873_v52 = vand.u32 4294901760, %v840_v50  ;;  %s2651_s9 = scalar_lea.sflag [#allocation4], %s4413_s18 }
  0x8d   : > { %v441_v5 = vand.u32 4294901760, %v373_v4  ;;  %v455_v10 = vsub.f32 %v453_v6, %v454_v8  ;;  %v4491_v44 = vpack.c.bf16 %v864_v43, %v861_v42  ;;  %v876_v53 = vand.u32 4294901760, %v841_v51  ;;  %v845_v61 = vld [vmem:[#allocation7 + $0x68] sm:$0xff]  ;;  %s4104_s29 = scalar_lea.vmem %s5134_s23, 128  ;;  %s4189_s28 = smov [#allocation10]  }
  0x8e   : > { %v4495_v49 = vpack.c.bf16 %v870_v48, %v867_v47  ;;  %v879_v57 = vand.u32 4294901760, %v842_v55  ;;  %v882_v58 = vand.u32 4294901760, %v843_v56  ;;  %v885_v62 = vand.u32 4294901760, %v844_v60  ;;  %p4105_p4 = scmp.ne.s32.totalorder %s5134_s23, %s4104_s29  ;;  %s4108_s16 = sshll.u32 %s4189_s28, 4  ;;  %s4109_s16 = int_to_ptr.vmem [resolvable:$false] %s4108_s16 }
  0x8f   : > { %v442_v7 = vsub.f32 %v373_v4, %v441_v5  ;;  %v456_v12 = vand.u32 4294901760, %v455_v10  ;;  %v4499_v54 = vpack.c.bf16 %v876_v53, %v873_v52  ;;  %v888_v63 = vand.u32 4294901760, %v845_v61  ;;  %s4110_s15 = scalar_lea.vmem %s4109_s16, 256  ;;  %p4111_p7 = scmp.lt.s32.totalorder %s5134_s23, %s4109_s16 }
  0x90   : > { %v4503_v59 = vpack.c.bf16 %v882_v58, %v879_v57  ;;  %v4507_v1 = vsub.f32 %v836_v40, %v861_v42  ;;  %v4509_v2 = vsub.f32 %v837_v41, %v864_v43  ;;  %v4513_v4 = vsub.f32 %v839_v46, %v870_v48  ;;  %p4106_p8 = pnand %p4105_p4, %p4368_p6  ;;  %p4112_p10 = scmp.lt.s32.totalorder %s4110_s15, %s4104_s29 }
  0x91   : > { %v443_v9 = vand.u32 4294901760, %v442_v7  ;;  %3049 = vmatpush3.msra.mxu0 %v456_v12  ;;  %v4521_v10 = vsub.f32 %v843_v56, %v882_v58  ;;  %v4525_v12 = vsub.f32 %v844_v60, %v885_v62  ;;  %v5202_v16 = vand.u32 4294901760, %v4464_v24 }
  0x92   : > { %3051 = vmatmul.mubr.f32.vlgmr.msra.gmra.mrb[0].mxu0 %v441_v5  ;;  %3053 = vmatprep.subr.mxu0 %v4186_v0  ;;  %v5201_v18 = vand.u32 4294901760, %v4466_v25  ;;  %v5198_v41 = vand.u32 4294901760, %v4507_v1  ;;  %v5197_v42 = vand.u32 4294901760, %v4509_v2  ;;  %p4107_p3 = pneg %p4106_p8  ;;  %p4113_p13 = por %p4112_p10, %p4111_p7 }
  0x93   : > { %v444_v11 = vsub.f32 %v442_v7, %v443_v9  ;;  %3054 = vmatpush3.msra.mxu0 %v453_v6  ;;  %3055 = vmatprep.mubr.msk.f32.mxu0 %vm4187_vm0, %v4186_v0  ;;  %v847_v6 = vld [vmem:[#allocation7 + $0x78] sm:$0xff]  ;;  %v943_v22 = vsub.f32 %v4464_v24, %v5202_v16 }
  0x94   : > { %3058 = vmatprep.subr.mxu0 %v4186_v0  ;;  %v894_v15 = vand.u32 4294901760, %v847_v6  ;;  %v978_v46 = vsub.f32 %v4509_v2, %v5197_v42  ;;  %p4114_p5 = pnand %p4113_p13, %p4107_p3 }
  0x95   : > { %v445_v13 = vand.u32 4294901760, %v444_v11  ;;  %v4523_v11 = vpack.c.bf16 %v888_v63, %v885_v62 }
  0x96   : > { %v4537_v21 = vsub.f32 %v847_v6, %v894_v15  ;;  %v979_v48 = vand.u32 4294901760, %v978_v46 }
  0x97   : > { %3046 = vmatmul.mubr.f32.vlgmr.msra.gmra.mrb[0].mxu1 %v445_v13  ;;  %v4527_v13 = vsub.f32 %v845_v61, %v888_v63 }
  0x98   : > { %3291 = vmatprep.mubr.msk.f32.mxu1 %vm4187_vm0, %v4186_v0 }
  0x9a   : > { %3056 = vmatmul.mubr.f32.vlgmr.msra.gmra.mrb[0].mxu0 %v442_v7  ;;  %v4515_v7 = vsub.f32 %v840_v50, %v873_v52 }
  0x9b   : > { %3059 = vmatpush3.msra.mxu0 %v376_v3  ;;  %3060 = vmatprep.mubr.msk.f32.mxu0 %vm4187_vm0, %v4186_v0 }
  0x9c   : > { %3063 = vmatprep.subr.mxu0 %v4186_v0  ;;  %v5194_v58 = vand.u32 4294901760, %v4515_v7 }
  0x9e   : > { %v999_v62 = vsub.f32 %v4515_v7, %v5194_v58 }
  0xa2   : > { %3061 = vmatmul.mubr.f32.vlgmr.msra.gmra.mrb[0].mxu0 %v443_v9  ;;  %v4519_v9 = vsub.f32 %v842_v55, %v879_v57 }
  0xa3   : > { %3064 = vmatpush3.msra.mxu0 %v454_v8  ;;  %3065 = vmatprep.mubr.msk.f32.mxu0 %vm4187_vm0, %v4186_v0  ;;  %v4517_v8 = vsub.f32 %v841_v51, %v876_v53  ;;  %v5195_v51 = vand.u32 4294901760, %v4513_v4 }
  0xa4   : > { %3068 = vmatprep.subr.mxu0 %v4186_v0 }
  0xa5   : > { %v992_v55 = vsub.f32 %v4513_v4, %v5195_v51  ;;  %v5193_v60 = vand.u32 4294901760, %v4517_v8 }
  0xa7   : > { %v993_v57 = vand.u32 4294901760, %v992_v55  ;;  %v1006_v63 = vsub.f32 %v4517_v8, %v5193_v60  ;;  %v5187_v55 = vand.u32 4294901760, %v4537_v21 }
  0xa9   : > { %v1007_v6 = vand.u32 4294901760, %v1006_v63 }
  0xaa   : > { %3066 = vmatmul.mubr.f32.vlgmr.msra.gmra.mrb[0].mxu0 %v441_v5 }
  0xab   : > { %3069 = vmatpush3.msra.mxu0 %v376_v3  ;;  %3070 = vmatprep.mubr.msk.f32.mxu0 %vm4187_vm0, %v4186_v0  ;;  %v4511_v3 = vsub.f32 %v838_v45, %v867_v47  ;;  %v971_v45 = vsub.f32 %v4507_v1, %v5198_v41 }
  0xac   : > { %3559 = vmatprep.subr.bf16.mxu0 %v4188_v17 }
  0xad   : > { %v972_v47 = vand.u32 4294901760, %v971_v45  ;;  %v5196_v50 = vand.u32 4294901760, %v4511_v3 }
  0xaf   : > { %v4569_v52 = vpack.c.bf16 %v979_v48, %v972_v47  ;;  %v985_v53 = vsub.f32 %v4511_v3, %v5196_v50 }
  0xb1   : > { %v986_v56 = vand.u32 4294901760, %v985_v53 }
  0xb2   : > { %3071 = vmatmul.mubr.f32.vlgmr.msra.gmra.mrb[0].mxu0 %v441_v5  ;;  %v846_v5 = vld [vmem:[#allocation7 + $0x70] sm:$0xff] }
  0xb3   : > { %3105 = vmatprep.mubr.msk.f32.mxu0 %vm4187_vm0, %v4186_v0  ;;  %3561 = vmatpush3.bf16.msra.mxu0 %v4462_v23  ;;  %v891_v14 = vand.u32 4294901760, %v846_v5  ;;  %v4579_v61 = vpack.c.bf16 %v993_v57, %v986_v56 }
  0xb4   : > { %3562 = vmatprep.subr.bf16.mxu0 %v4188_v17 }
  0xb5   : > { %v4532_v19 = vsub.f32 %v846_v5, %v891_v14  ;;  %v4535_v20 = vpack.c.bf16 %v894_v15, %v891_v14  ;;  %v1000_v5 = vand.u32 4294901760, %v999_v62  ;;  %v5192_v14 = vand.u32 4294901760, %v4519_v9 }
  0xb6   : > { %v5191_v15 = vand.u32 4294901760, %v4521_v10  ;;  %v1048_v62 = vsub.f32 %v4537_v21, %v5187_v55 }
  0xb7   : > { %3564 = vmatpush3.bf16.msra.mxu0 %v4473_v28  ;;  %v5188_v53 = vand.u32 4294901760, %v4532_v19 }
  0xb8   : > { %3565 = vmatprep.subr.bf16.mxu0 %v4188_v17 }
  0xb9   : > { %v1041_v57 = vsub.f32 %v4532_v19, %v5188_v53  ;;  %v828_v53 = vld [vmem:[%s5179_s3] sm:$0xff] }
  0xbb   : > { %3567 = vmatpush3.bf16.msra.mxu0 %v4491_v44  ;;  %v1042_v63 = vand.u32 4294901760, %v1041_v57 }
  0xbc   : > { %3568 = vmatprep.subr.bf16.mxu0 %v4188_v17 }
  0xbf   : > { %3570 = vmatpush3.bf16.msra.mxu0 %v4495_v49 }
  0xc0   : > { %3571 = vmatprep.subr.bf16.mxu0 %v4188_v17 }
  0xc3   : > { %3573 = vmatpush3.bf16.msra.mxu0 %v4499_v54 }
  0xc4   : > { %3574 = vmatprep.subr.bf16.mxu0 %v4188_v17 }
  0xc7   : > { %3576 = vmatpush3.bf16.msra.mxu0 %v4503_v59 }
  0xc8   : > { %3577 = vmatprep.subr.bf16.mxu0 %v4188_v17 }
  0xcb   : > { %3579 = vmatpush3.bf16.msra.mxu0 %v4523_v11 }
  0xcc   : > { %3580 = vmatprep.subr.bf16.mxu0 %v4188_v17 }
  0xcf   : > { %3582 = vmatpush3.bf16.msra.mxu0 %v4535_v20 }
  0xd0   : > { %3583 = vmatprep.subr.bf16.mxu0 %v4188_v17 }
 0x16a   : > { %v447_v29 = vpop.f32.mrb[0].mxu1 }
 0x16b   : > { %v3047_v30 = vpop.f32.mrb[1].mxu1  ;;  %v448_v32 = vadd.f32 %v2790_v31, %v447_v29  ;;  %v950_v29 = vsub.f32 %v4466_v25, %v5201_v18 }
 0x16c   : > { %v944_v30 = vand.u32 4294901760, %v943_v22  ;;  %v4589_v22 = vpack.c.bf16 %v1007_v6, %v1000_v5  ;;  %v1049_v5 = vand.u32 4294901760, %v1048_v62 }
 0x16d   : > { %v951_v31 = vand.u32 4294901760, %v950_v29  ;;  %v1013_v29 = vsub.f32 %v4519_v9, %v5192_v14 }
 0x16e   : > { %v4617_v6 = vpack.c.bf16 %v1049_v5, %v1042_v63 }
 0x185   : > { %v817_v34 = vpop.f32.mrb[0].mxu0 }
 0x186   : > { %v4484_v35 = vadd.f32 %v817_v34, %v448_v32  ;;  %v3072_v36 = vpop.f32.mrb[1].mxu0  ;;  %v5200_v32 = vand.u32 4294901760, %v4468_v26  ;;  %v5199_v34 = vand.u32 4294901760, %v4470_v27 }
 0x187   : > { %v4549_v36 = vpack.c.bf16 %v951_v31, %v944_v30  ;;  %v1020_v30 = vsub.f32 %v4521_v10, %v5191_v15  ;;  %v1014_v31 = vand.u32 4294901760, %v1013_v29  ;;  %v3608_v29 = vpack.c.bf16 %v4466_v25, %v4464_v24 }
 0x188   : > { %v821_v38 = vmul.f32 %v4484_v35, %v4484_v35  ;;  %v957_v37 = vsub.f32 %v4468_v26, %v5200_v32  ;;  %v1493_v15 = vand.u32 4294901760, %v828_v53 }
 0x18a   : > { %822 = vadd.xlane.f32.xlu0 %v821_v38  ;;  %v964_v38 = vsub.f32 %v4470_v27, %v5199_v34 }
 0x18c   : > { %v965_v40 = vand.u32 4294901760, %v964_v38  ;;  %v5190_v38 = vand.u32 4294901760, %v4525_v12 }
 0x18e   : > { %357 = vadd.xlane.f32.xlu0 %v356_v39  ;;  %v958_v39 = vand.u32 4294901760, %v957_v37  ;;  %v1021_v37 = vand.u32 4294901760, %v1020_v30  ;;  %v1027_v45 = vsub.f32 %v4525_v12, %v5190_v38  ;;  %v3611_v30 = vpack.c.bf16 %v4470_v27, %v4468_v26 }
 0x190   : > { %v4559_v43 = vpack.c.bf16 %v965_v40, %v958_v39  ;;  %v5189_v39 = vand.u32 4294901760, %v4527_v13  ;;  %v4599_v40 = vpack.c.bf16 %v1021_v37, %v1014_v31  ;;  %v1028_v47 = vand.u32 4294901760, %v1027_v45 }
 0x191   : > { %v3614_v31 = vpack.c.bf16 %v4509_v2, %v4507_v1  ;;  %v3617_v37 = vpack.c.bf16 %v4513_v4, %v4511_v3 }
 0x192   : > { %v1034_v46 = vsub.f32 %v4527_v13, %v5189_v39  ;;  %v829_v39 = vld [vmem:[%s5179_s3 + $0x8] sm:$0xff] }
 0x193   : > { %v1496_v14 = vand.u32 4294901760, %v829_v39 }
 0x194   : > { %v1035_v48 = vand.u32 4294901760, %v1034_v46 }
 0x195   : > { %v4641_v60 = vpack.c.bf16 %v1496_v14, %v1493_v15  ;;  %v1580_v58 = vsub.f32 %v829_v39, %v1496_v14 }
 0x196   : > { %v4609_v56 = vpack.c.bf16 %v1035_v48, %v1028_v47 }
 0x197   : > { %3705 = vmatpush3.bf16.msra.mxu1 %v4641_v60  ;;  %v1581_v41 = vand.u32 4294901760, %v1580_v58 }
 0x198   : > { %3706 = vmatprep.subr.bf16.mxu1 %v4188_v17 }
 0x199   : > { %v1582_v39 = vsub.f32 %v1580_v58, %v1581_v41 }
 0x217   : > { %v823_v57 = vpop.xlane.xlu0 %822 }
 0x218   : > { %v824_v62 = vmul.f32 0.03125, %v823_v57  ;;  %v830_v57 = vld [vmem:[%s5179_s3 + $0x10] sm:$0xff] }
 0x21a   : > { %v825_v63 = vadd.f32 1e-08, %v824_v62  ;;  %v831_v62 = vld [vmem:[%s5179_s3 + $0x18] sm:$0xff] }
 0x21b   : > { %v358_v5 = vpop.xlane.xlu0 %357 }
 0x21c   : > { %3986 = vrsqrt.f32 %v825_v63  ;;  %v360_v55 = vmul.f32 0.03125, %v358_v5  ;;  %v1499_v63 = vand.u32 4294901760, %v830_v57  ;;  %v1502_v5 = vand.u32 4294901760, %v831_v62 }
 0x21e   : > { %v361_v38 = vadd.f32 1e-08, %v360_v55  ;;  %v1573_v55 = vsub.f32 %v828_v53, %v1493_v15  ;;  %v4651_v51 = vpack.c.bf16 %v1502_v5, %v1499_v63  ;;  %v1587_v32 = vsub.f32 %v830_v57, %v1499_v63 }
 0x21f   : > { %v1594_v18 = vsub.f32 %v831_v62, %v1502_v5 }
 0x220   : > { %3988 = vrsqrt.f32 %v361_v38  ;;  %3708 = vmatpush3.bf16.msra.mxu1 %v4651_v51  ;;  %v1574_v42 = vand.u32 4294901760, %v1573_v55 }
 0x221   : > { %3709 = vmatprep.subr.bf16.mxu1 %v4188_v17  ;;  %v1595_v47 = vand.u32 4294901760, %v1594_v18 }
 0x222   : > { %v1575_v15 = vsub.f32 %v1573_v55, %v1574_v42 }
 0x223   : > { %v1596_v5 = vsub.f32 %v1594_v18, %v1595_v47 }
 0x226   : > { %v3987_v38 = vpop.eup %3986 }
 0x227   : > { %v827_v50 = vmul.f32 %v3987_v38, %v4484_v35  ;;  %v1588_v38 = vand.u32 4294901760, %v1587_v32 }
 0x229   : > { %v4656_v34 = vand.u32 4294901760, %v827_v50 }
 0x22a   : > { %v3989_v16 = vpop.eup %3988 }
 0x22b   : > { %v4659_v48 = vsub.f32 %v827_v50, %v4656_v34  ;;  %v363_v14 = vmul.f32 %v3989_v16, %v4482_v33  ;;  %v1576_v50 = vand.u32 4294901760, %v1575_v15  ;;  %v1583_v33 = vand.u32 4294901760, %v1582_v39 }
 0x22c   : > { %v1589_v16 = vsub.f32 %v1587_v32, %v1588_v38 }
 0x22d   : > { %v931_v53 = vand.u32 4294901760, %v4659_v48  ;;  %v1490_v35 = vsel %vm355_vm2, %v363_v14, 0 }
 0x22e   : > { %v4664_v46 = vand.u32 4294901760, %v1490_v35  ;;  %v1590_v15 = vand.u32 4294901760, %v1589_v16 }
 0x22f   : > { %v932_v57 = vsub.f32 %v4659_v48, %v931_v53 }
 0x230   : > { %v4670_v62 = vsub.f32 %v1490_v35, %v4664_v46  ;;  %v3710_v35 = vpack.c.bf16 %v1583_v33, %v1576_v50  ;;  %v3716_v50 = vpack.c.bf16 %v1580_v58, %v1573_v55  ;;  %v5233_v58 = vpack.c.bf16 %v4537_v21, %v4532_v19 }
 0x231   : > { %v933_v63 = vand.u32 4294901760, %v932_v57  ;;  %v1597_v57 = vand.u32 4294901760, %v1596_v5 }
 0x232   : > { %v1563_v45 = vand.u32 4294901760, %v4670_v62 }
 0x233   : > { %3106 = vmatmul.mubr.f32.vlgmr.msra.gmra.mrb[2].mxu0 %v933_v63 }
 0x234   : > { %3585 = vmatpush3.bf16.msra.mxu0 %v4549_v36  ;;  %3140 = vmatprep.mubr.msk.f32.mxu0 %vm4187_vm0, %v4186_v0  ;;  %v1564_v14 = vsub.f32 %v4670_v62, %v1563_v45  ;;  %v3713_v36 = vpack.c.bf16 %v1597_v57, %v1590_v15  ;;  %v1989_v57 = vld [vmem:[#allocation8 + $0x20] sm:$0xff] }
 0x235   : > { %3586 = vmatprep.subr.bf16.mxu0 %v4188_v17 }
 0x236   : > { %v1565_v39 = vand.u32 4294901760, %v1564_v14 }
 0x238   : > { %3588 = vmatpush3.bf16.msra.mxu0 %v4559_v43  ;;  %3292 = vmatmul.mubr.f32.vlgmr.msra.gmra.mrb[2].mxu1 %v1565_v39  ;;  %v3719_v43 = vpack.c.bf16 %v1594_v18, %v1587_v32  ;;  %v3731_v18 = vpack.c.bf16 %v1595_v47, %v1588_v38  ;;  %v5230_v32 = vpack.c.bf16 %v4517_v8, %v4515_v7  ;;  %v5243_v47 = vand.u32 4294901760, %v4517_v8  ;;  %v1990_v39 = vld [vmem:[#allocation8 + $0x28] sm:$0xff] }
 0x239   : > { %3589 = vmatprep.subr.bf16.mxu0 %v4188_v17  ;;  %3711 = vmatpush3.bf16.msra.mxu1 %v3710_v35  ;;  %v5249_v8 = vand.u32 4294901760, %v4537_v21 }
 0x23a   : > { %3712 = vmatprep.subr.bf16.mxu1 %v4188_v17  ;;  %3302 = vmatprep.mubr.msk.f32.mxu1 %vm4187_vm0, %v4186_v0 }
 0x23c   : > { %3591 = vmatpush3.bf16.msra.mxu0 %v4569_v52  ;;  %v3728_v52 = vpack.c.bf16 %v1581_v41, %v1574_v42  ;;  %v5231_v41 = vpack.c.bf16 %v4521_v10, %v4519_v9  ;;  %v5232_v42 = vpack.c.bf16 %v4527_v13, %v4525_v12 }
 0x23d   : > { %3592 = vmatprep.subr.bf16.mxu0 %v4188_v17  ;;  %3714 = vmatpush3.bf16.msra.mxu1 %v3713_v36  ;;  %v2019_v36 = vand.u32 4294901760, %v1989_v57 }
 0x23e   : > { %3715 = vmatprep.subr.bf16.mxu1 %v4188_v17 }
 0x240   : > { %3594 = vmatpush3.bf16.msra.mxu0 %v4579_v61  ;;  %3303 = vmatmul.mubr.f32.vlgmr.msra.gmra.mrb[4].mxu1 %v4664_v46  ;;  %v5234_v61 = vand.u32 4294901760, %v4464_v24  ;;  %v5238_v24 = vand.u32 4294901760, %v4507_v1  ;;  %v5244_v1 = vand.u32 4294901760, %v4519_v9 }
 0x241   : > { %3595 = vmatprep.subr.bf16.mxu0 %v4188_v17  ;;  %3717 = vmatpush3.bf16.msra.mxu1 %v3716_v50  ;;  %v2022_v50 = vand.u32 4294901760, %v1990_v39 }
 0x242   : > { %3718 = vmatprep.subr.bf16.mxu1 %v4188_v17  ;;  %3313 = vmatprep.mubr.msk.f32.mxu1 %vm4187_vm0, %v4186_v0 }
 0x244   : > { %3597 = vmatpush3.bf16.msra.mxu0 %v4589_v22  ;;  %v5235_v22 = vand.u32 4294901760, %v4466_v25  ;;  %v5239_v25 = vand.u32 4294901760, %v4509_v2  ;;  %v5245_v2 = vand.u32 4294901760, %v4521_v10 }
 0x245   : > { %3598 = vmatprep.subr.bf16.mxu0 %v4188_v17  ;;  %3720 = vmatpush3.bf16.msra.mxu1 %v3719_v43  ;;  %v4869_v43 = vpack.c.bf16 %v2022_v50, %v2019_v36 }
 0x246   : > { %3727 = vmatprep.subr.bf16.mxu1 %v4188_v17  ;;  %v3671_v55 = vpack.c.bf16 %v5245_v2, %v5244_v1 }
 0x248   : > { %3600 = vmatpush3.bf16.msra.mxu0 %v4599_v40  ;;  %3314 = vmatmul.mubr.f32.vlgmr.msra.gmra.mrb[6].mxu1 %v4670_v62  ;;  %v3656_v40 = vpack.c.bf16 %v5235_v22, %v5234_v61  ;;  %v1988_v62 = vld [vmem:[#allocation8 + $0x18] sm:$0xff] }
 0x249   : > { %3601 = vmatprep.subr.bf16.mxu0 %v4188_v17  ;;  %3729 = vmatpush3.bf16.msra.mxu1 %v3728_v52  ;;  %v2016_v5 = vand.u32 4294901760, %v1988_v62  ;;  %v4871_v52 = vsub.f32 %v1989_v57, %v2019_v36 }
 0x24a   : > { %3730 = vmatprep.subr.bf16.mxu1 %v4188_v17  ;;  %3335 = vmatprep.mubr.msk.f32.mxu1 %vm4187_vm0, %v4186_v0 }
 0x24b   : > { %v4865_v15 = vsub.f32 %v1988_v62, %v2016_v5 }
 0x24c   : > { %3603 = vmatpush3.bf16.msra.mxu0 %v4609_v56  ;;  %v5236_v56 = vand.u32 4294901760, %v4468_v26  ;;  %v5241_v26 = vand.u32 4294901760, %v4513_v4  ;;  %v5247_v4 = vand.u32 4294901760, %v4527_v13  ;;  %v1985_v13 = vld [vmem:[#allocation8] sm:$0xff] }
 0x24d   : > { %3604 = vmatprep.subr.bf16.mxu0 %v4188_v17  ;;  %3732 = vmatpush3.bf16.msra.mxu1 %v3731_v18  ;;  %v4873_v18 = vsub.f32 %v1990_v39, %v2022_v50  ;;  %v5215_v62 = vand.u32 4294901760, %v4865_v15 }
 0x24e   : > { %3739 = vmatprep.subr.bf16.mxu1 %v4188_v17 }
 0x24f   : > { %v2122_v50 = vsub.f32 %v4865_v15, %v5215_v62 }
 0x250   : > { %3606 = vmatpush3.bf16.msra.mxu0 %v4617_v6  ;;  %3336 = vmatmul.mubr.f32.vlgmr.msra.gmra.mrb[8].mxu1 %v4664_v46  ;;  %v5237_v6 = vand.u32 4294901760, %v4470_v27 }
 0x251   : > { %3607 = vmatprep.subr.bf16.mxu0 %v4188_v17  ;;  %3381 = vmatprep.mubr.msk.f32.mxu1 %vm4187_vm0, %v4186_v0 }
 0x253   : > { %3141 = vmatmul.mubr.f32.vlgmr.msra.gmra.mrb[4].mxu0 %v4656_v34 }
 0x254   : > { %3609 = vmatpush3.bf16.msra.mxu0 %v3608_v29  ;;  %3175 = vmatprep.mubr.msk.f32.mxu0 %vm4187_vm0, %v4186_v0  ;;  %v3659_v29 = vpack.c.bf16 %v5237_v6, %v5236_v56  ;;  %v1993_v56 = vld [vmem:[#allocation8 + $0x40] sm:$0xff]  ;;  %v1994_v6 = vld [vmem:[#allocation8 + $0x48] sm:$0xff] }
 0x255   : > { %3610 = vmatprep.subr.bf16.mxu0 %v4188_v17 }
 0x258   : > { %3612 = vmatpush3.bf16.msra.mxu0 %v3611_v30  ;;  %v3662_v30 = vpack.c.bf16 %v5239_v25, %v5238_v24  ;;  %v2034_v24 = vand.u32 4294901760, %v1994_v6 }
 0x259   : > { %3613 = vmatprep.subr.bf16.mxu0 %v4188_v17 }
 0x25c   : > { %3615 = vmatpush3.bf16.msra.mxu0 %v3614_v31  ;;  %v5240_v31 = vand.u32 4294901760, %v4511_v3  ;;  %v5246_v3 = vand.u32 4294901760, %v4525_v12 }
 0x25d   : > { %3616 = vmatprep.subr.bf16.mxu0 %v4188_v17 }
 0x25e   : > { %v3665_v27 = vpack.c.bf16 %v5241_v26, %v5240_v31  ;;  %v1996_v31 = vld [vmem:[#allocation8 + $0x58] sm:$0xff] }
 0x260   : > { %3618 = vmatpush3.bf16.msra.mxu0 %v3617_v37  ;;  %v5242_v37 = vand.u32 4294901760, %v4515_v7  ;;  %v5248_v7 = vand.u32 4294901760, %v4532_v19  ;;  %v1986_v19 = vld [vmem:[#allocation8 + $0x8] sm:$0xff] }
 0x261   : > { %3619 = vmatprep.subr.bf16.mxu0 %v4188_v17  ;;  %v2010_v21 = vand.u32 4294901760, %v1986_v19 }
 0x262   : > { %v3677_v38 = vpack.c.bf16 %v5249_v8, %v5248_v7  ;;  %v4897_v7 = vsub.f32 %v1994_v6, %v2034_v24 }
 0x263   : > { %v4858_v33 = vsub.f32 %v1986_v19, %v2010_v21 }
 0x264   : > { %3621 = vmatpush3.bf16.msra.mxu0 %v5230_v32  ;;  %v1991_v32 = vld [vmem:[#allocation8 + $0x30] sm:$0xff] }
 0x265   : > { %3622 = vmatprep.subr.bf16.mxu0 %v4188_v17 }
 0x268   : > { %3624 = vmatpush3.bf16.msra.mxu0 %v5231_v41  ;;  %v1992_v41 = vld [vmem:[#allocation8 + $0x38] sm:$0xff] }
 0x269   : > { %3625 = vmatprep.subr.bf16.mxu0 %v4188_v17 }
 0x26c   : > { %3627 = vmatpush3.bf16.msra.mxu0 %v5232_v42  ;;  %v2025_v42 = vand.u32 4294901760, %v1991_v32 }
 0x26d   : > { %3628 = vmatprep.subr.bf16.mxu0 %v4188_v17 }
 0x26e   : > { %v4879_v22 = vsub.f32 %v1991_v32, %v2025_v42 }
 0x270   : > { %3630 = vmatpush3.bf16.msra.mxu0 %v5233_v58  ;;  %v2028_v58 = vand.u32 4294901760, %v1992_v41 }
 0x271   : > { %3631 = vmatprep.subr.bf16.mxu0 %v4188_v17 }
 0x272   : > { %v4877_v61 = vpack.c.bf16 %v2028_v58, %v2025_v42  ;;  %v2123_v42 = vand.u32 4294901760, %v2122_v50 }
 0x273   : > { %3176 = vmatmul.mubr.f32.vlgmr.msra.gmra.mrb[6].mxu0 %v4659_v48  ;;  %v3668_v48 = vpack.c.bf16 %v5243_v47, %v5242_v37  ;;  %v1997_v47 = vld [vmem:[#allocation8 + $0x60] sm:$0xff] }
 0x274   : > { %3633 = vmatpush3.bf16.msra.mxu0 %v4462_v23  ;;  %3210 = vmatprep.mubr.msk.f32.mxu0 %vm4187_vm0, %v4186_v0  ;;  %v2043_v1 = vand.u32 4294901760, %v1997_v47 }
 0x275   : > { %3634 = vmatprep.subr.bf16.mxu0 %v4188_v17 }
 0x278   : > { %3636 = vmatpush3.bf16.msra.mxu0 %v4473_v28 }
 0x279   : > { %3637 = vmatprep.subr.bf16.mxu0 %v4188_v17 }
 0x27c   : > { %3639 = vmatpush3.bf16.msra.mxu0 %v4491_v44 }
 0x27d   : > { %3640 = vmatprep.subr.bf16.mxu0 %v4188_v17 }
 0x280   : > { %3642 = vmatpush3.bf16.msra.mxu0 %v4495_v49 }
 0x281   : > { %3643 = vmatprep.subr.bf16.mxu0 %v4188_v17 }
 0x284   : > { %3645 = vmatpush3.bf16.msra.mxu0 %v4499_v54 }
 0x285   : > { %3646 = vmatprep.subr.bf16.mxu0 %v4188_v17 }
 0x288   : > { %3648 = vmatpush3.bf16.msra.mxu0 %v4503_v59 }
 0x289   : > { %3649 = vmatprep.subr.bf16.mxu0 %v4188_v17 }
 0x28c   : > { %3651 = vmatpush3.bf16.msra.mxu0 %v4523_v11 }
 0x28d   : > { %3652 = vmatprep.subr.bf16.mxu0 %v4188_v17 }
 0x290   : > { %3654 = vmatpush3.bf16.msra.mxu0 %v4535_v20 }
 0x291   : > { %3655 = vmatprep.subr.bf16.mxu0 %v4188_v17 }
 0x293   : > { %3211 = vmatmul.mubr.f32.vlgmr.msra.gmra.mrb[8].mxu0 %v931_v53  ;;  %v3674_v53 = vpack.c.bf16 %v5247_v4, %v5246_v3  ;;  %v1999_v3 = vld [vmem:[#allocation8 + $0x70] sm:$0xff]  ;;  %v2000_v4 = vld [vmem:[#allocation8 + $0x78] sm:$0xff] }
 0x294   : > { %3657 = vmatpush3.bf16.msra.mxu0 %v3656_v40  ;;  %3245 = vmatprep.mubr.msk.f32.mxu0 %vm4187_vm0, %v4186_v0  ;;  %v4881_v40 = vsub.f32 %v1992_v41, %v2028_v58  ;;  %v5214_v58 = vand.u32 4294901760, %v4871_v52 }
 0x295   : > { %3658 = vmatprep.subr.bf16.mxu0 %v4188_v17 }
 0x296   : > { %v2129_v6 = vsub.f32 %v4871_v52, %v5214_v58 }
 0x298   : > { %3660 = vmatpush3.bf16.msra.mxu0 %v3659_v29  ;;  %v2031_v29 = vand.u32 4294901760, %v1993_v56 }
 0x299   : > { %3661 = vmatprep.subr.bf16.mxu0 %v4188_v17 }
 0x29a   : > { %v4885_v25 = vpack.c.bf16 %v2034_v24, %v2031_v29  ;;  %v2130_v24 = vand.u32 4294901760, %v2129_v6 }
 0x29c   : > { %3663 = vmatpush3.bf16.msra.mxu0 %v3662_v30  ;;  %v1995_v30 = vld [vmem:[#allocation8 + $0x50] sm:$0xff] }
 0x29d   : > { %3664 = vmatprep.subr.bf16.mxu0 %v4188_v17  ;;  %v2037_v26 = vand.u32 4294901760, %v1995_v30 }
 0x29f   : > { %v4899_v8 = vsub.f32 %v1995_v30, %v2037_v26 }
 0x2a0   : > { %3666 = vmatpush3.bf16.msra.mxu0 %v3665_v27  ;;  %v2040_v27 = vand.u32 4294901760, %v1996_v31 }
 0x2a1   : > { %3667 = vmatprep.subr.bf16.mxu0 %v4188_v17 }
 0x2a2   : > { %v4889_v37 = vpack.c.bf16 %v2040_v27, %v2037_v26  ;;  %v5211_v26 = vand.u32 4294901760, %v4881_v40 }
 0x2a4   : > { %3669 = vmatpush3.bf16.msra.mxu0 %v3668_v48  ;;  %v1998_v48 = vld [vmem:[#allocation8 + $0x68] sm:$0xff] }
 0x2a5   : > { %3670 = vmatprep.subr.bf16.mxu0 %v4188_v17  ;;  %v2046_v2 = vand.u32 4294901760, %v1998_v48 }
 0x2a8   : > { %3672 = vmatpush3.bf16.msra.mxu0 %v3671_v55  ;;  %v4893_v55 = vpack.c.bf16 %v2046_v2, %v2043_v1 }
 0x2a9   : > { %3673 = vmatprep.subr.bf16.mxu0 %v4188_v17 }
 0x2ac   : > { %3675 = vmatpush3.bf16.msra.mxu0 %v3674_v53  ;;  %v4895_v53 = vsub.f32 %v1993_v56, %v2031_v29 }
 0x2ad   : > { %3676 = vmatprep.subr.bf16.mxu0 %v4188_v17 }
 0x2b0   : > { %3678 = vmatpush3.bf16.msra.mxu0 %v3677_v38  ;;  %v4901_v38 = vsub.f32 %v1996_v31, %v2040_v27  ;;  %v5212_v31 = vand.u32 4294901760, %v4879_v22 }
 0x2b1   : > { %3679 = vmatprep.subr.bf16.mxu0 %v4188_v17 }
 0x2b3   : > { %3246 = vmatmul.mubr.f32.vlgmr.msra.gmra.mrb[10].mxu0 %v4656_v34 }
 0x2b4   : > { %3681 = vmatpush3.bf16.msra.mxu0 %v4462_v23  ;;  %3280 = vmatprep.mubr.msk.f32.mxu0 %vm4187_vm0, %v4186_v0 }
 0x2b5   : > { %3682 = vmatprep.subr.bf16.mxu0 %v4188_v17 }
 0x2b8   : > { %3684 = vmatpush3.bf16.msra.mxu0 %v4473_v28 }
 0x2b9   : > { %3685 = vmatprep.subr.bf16.mxu0 %v4188_v17 }
 0x2bc   : > { %3687 = vmatpush3.bf16.msra.mxu0 %v4491_v44 }
 0x2bd   : > { %3688 = vmatprep.subr.bf16.mxu0 %v4188_v17 }
 0x2c0   : > { %3690 = vmatpush3.bf16.msra.mxu0 %v4495_v49 }
 0x2c1   : > { %3691 = vmatprep.subr.bf16.mxu0 %v4188_v17 }
 0x2c4   : > { %3693 = vmatpush3.bf16.msra.mxu0 %v4499_v54 }
 0x2c5   : > { %3694 = vmatprep.subr.bf16.mxu0 %v4188_v17 }
 0x2c8   : > { %3696 = vmatpush3.bf16.msra.mxu0 %v4503_v59 }
 0x2c9   : > { %3697 = vmatprep.subr.bf16.mxu0 %v4188_v17 }
 0x2cc   : > { %3699 = vmatpush3.bf16.msra.mxu0 %v4523_v11 }
 0x2cd   : > { %3700 = vmatprep.subr.bf16.mxu0 %v4188_v17 }
 0x2d0   : > { %3702 = vmatpush3.bf16.msra.mxu0 %v4535_v20  ;;  %v2007_v20 = vand.u32 4294901760, %v1985_v13 }
 0x2d1   : > { %3721 = vmatprep.subr.bf16.mxu0 %v4188_v17 }
 0x2d2   : > { %v4856_v63 = vsub.f32 %v1985_v13, %v2007_v20 }
 0x2d3   : > { %3281 = vmatmul.mubr.f32.vlgmr.msra.gmra.mrb[12].mxu0 %v4656_v34 }
 0x2d4   : > { %3723 = vmatpush3.bf16.msra.mxu0 %v4641_v60  ;;  %3324 = vmatprep.mubr.msk.f32.mxu0 %vm4187_vm0, %v4186_v0 }
 0x2d5   : > { %3724 = vmatprep.subr.bf16.mxu0 %v4188_v17 }
 0x2d8   : > { %3726 = vmatpush3.bf16.msra.mxu0 %v4651_v51 }
 0x2d9   : > { %3733 = vmatprep.subr.bf16.mxu0 %v4188_v17 }
 0x2db   : > { %3325 = vmatmul.mubr.f32.vlgmr.msra.gmra.mrb[14].mxu0 %v1563_v45  ;;  %v4853_v45 = vpack.c.bf16 %v2010_v21, %v2007_v20 }
 0x2dc   : > { %3735 = vmatpush3.bf16.msra.mxu0 %v4641_v60  ;;  %3346 = vmatprep.mubr.msk.f32.mxu0 %vm4187_vm0, %v4186_v0 }
 0x2dd   : > { %3736 = vmatprep.subr.bf16.mxu0 %v4188_v17  ;;  %3741 = vmatpush3.bf16.msra.mxu1 %v4853_v45 }
 0x2de   : > { %3742 = vmatprep.subr.bf16.mxu1 %v4188_v17 }
 0x2e0   : > { %3738 = vmatpush3.bf16.msra.mxu0 %v4651_v51 }
 0x2e3   : > { %3347 = vmatmul.mubr.f32.vlgmr.msra.gmra.mrb[16].mxu0 %v4664_v46  ;;  %v1987_v46 = vld [vmem:[#allocation8 + $0x10] sm:$0xff] }
 0x2e4   : > { %v2013_v16 = vand.u32 4294901760, %v1987_v46 }
 0x2e6   : > { %v4861_v14 = vpack.c.bf16 %v2016_v5, %v2013_v16  ;;  %v4863_v35 = vsub.f32 %v1987_v46, %v2013_v16 }
 0x2e8   : > { %3744 = vmatpush3.bf16.msra.mxu1 %v4861_v14  ;;  %v2114_v46 = vand.u32 4294901760, %v4863_v35 }
 0x2e9   : > { %3745 = vmatprep.subr.bf16.mxu1 %v4188_v17 }
 0x2ea   : > { %v2115_v36 = vsub.f32 %v4863_v35, %v2114_v46 }
 0x2ec   : > { %3747 = vmatpush3.bf16.msra.mxu1 %v4869_v43  ;;  %v2116_v41 = vand.u32 4294901760, %v2115_v36 }
 0x2ed   : > { %3748 = vmatprep.subr.bf16.mxu1 %v4188_v17 }
 0x2ee   : > { %v4938_v56 = vpack.c.bf16 %v2123_v42, %v2116_v41 }
 0x2f0   : > { %3750 = vmatpush3.bf16.msra.mxu1 %v4877_v61 }
 0x2f1   : > { %3751 = vmatprep.subr.bf16.mxu1 %v4188_v17 }
 0x2f4   : > { %3753 = vmatpush3.bf16.msra.mxu1 %v4885_v25 }
 0x2f5   : > { %3754 = vmatprep.subr.bf16.mxu1 %v4188_v17 }
 0x2f8   : > { %3756 = vmatpush3.bf16.msra.mxu1 %v4889_v37 }
 0x2f9   : > { %3757 = vmatprep.subr.bf16.mxu1 %v4188_v17 }
 0x2fc   : > { %3759 = vmatpush3.bf16.msra.mxu1 %v4893_v55 }
 0x2fd   : > { %3760 = vmatprep.subr.bf16.mxu1 %v4188_v17 }
 0x306   : > { %v935_v23 = vpop.f32.mrb[2].mxu0 }
 0x307   : > { %v3107_v28 = vpop.f32.mrb[3].mxu0 }
 0x308   : > { %v4906_v28 = vsub.f32 %v1998_v48, %v2046_v2  ;;  %v2150_v48 = vsub.f32 %v4881_v40, %v5211_v26 }
 0x30a   : > { %v2151_v2 = vand.u32 4294901760, %v2150_v48 }
 0x30b   : > { %v4843_v44 = vpop.f32.mrb[2].mxu1 }
 0x30c   : > { %v3293_v49 = vpop.f32.mrb[3].mxu1 }
 0x30d   : > { %v2049_v49 = vand.u32 4294901760, %v1999_v3 }
 0x30f   : > { %v4913_v19 = vsub.f32 %v1999_v3, %v2049_v49  ;;  %v5210_v3 = vand.u32 4294901760, %v4895_v53 }
 0x313   : > { %v4845_v54 = vpop.f32.mrb[4].mxu1 }
 0x314   : > { %v3304_v59 = vpop.f32.mrb[5].mxu1 }
 0x315   : > { %v2052_v59 = vand.u32 4294901760, %v2000_v4 }
 0x317   : > { %v4911_v13 = vpack.c.bf16 %v2052_v59, %v2049_v49  ;;  %v4915_v20 = vsub.f32 %v2000_v4, %v2052_v59  ;;  %v5209_v4 = vand.u32 4294901760, %v4897_v7  ;;  %v2157_v59 = vsub.f32 %v4895_v53, %v5210_v3 }
 0x319   : > { %3762 = vmatpush3.bf16.msra.mxu1 %v4911_v13 }
 0x31a   : > { %3763 = vmatprep.subr.bf16.mxu1 %v4188_v17 }
 0x31b   : > { %v4847_v9 = vpop.f32.mrb[6].mxu1 }
 0x31c   : > { %v3315_v10 = vpop.f32.mrb[7].mxu1 }
 0x31d   : > { %v2100_v10 = vand.u32 4294901760, %v4856_v63 }
 0x31f   : > { %v2101_v21 = vsub.f32 %v4856_v63, %v2100_v10 }
 0x321   : > { %v2102_v57 = vand.u32 4294901760, %v2101_v21  ;;  %v2164_v21 = vsub.f32 %v4897_v7, %v5209_v4 }
 0x323   : > { %v4849_v11 = vpop.f32.mrb[8].mxu1 }
 0x324   : > { %v3337_v12 = vpop.f32.mrb[9].mxu1 }
 0x325   : > { %v2107_v12 = vand.u32 4294901760, %v4858_v33 }
 0x326   : > { %v1086_v34 = vpop.f32.mrb[4].mxu0 }
 0x327   : > { %v4851_v51 = vadd.f32 %v1086_v34, %v935_v23  ;;  %v3142_v60 = vpop.f32.mrb[5].mxu0  ;;  %v4904_v23 = vsub.f32 %v1997_v47, %v2043_v1  ;;  %v2108_v34 = vsub.f32 %v4858_v33, %v2107_v12  ;;  %v2143_v47 = vsub.f32 %v4879_v22, %v5212_v31 }
 0x329   : > { %v2109_v39 = vand.u32 4294901760, %v2108_v34  ;;  %v2144_v1 = vand.u32 4294901760, %v2143_v47  ;;  %v2158_v34 = vand.u32 4294901760, %v2157_v59  ;;  %v5206_v6 = vand.u32 4294901760, %v4904_v23 }
 0x32a   : > { %v5205_v59 = vand.u32 4294901760, %v4915_v20 }
 0x32b   : > { %v4934_v32 = vpack.c.bf16 %v2109_v39, %v2102_v57  ;;  %v4958_v49 = vpack.c.bf16 %v2151_v2, %v2144_v1  ;;  %v5207_v57 = vand.u32 4294901760, %v4901_v38  ;;  %v5204_v2 = vand.u32 4294901760, %v4913_v19 }
 0x32d   : > { %v2178_v50 = vsub.f32 %v4901_v38, %v5207_v57 }
 0x32f   : > { %v2179_v42 = vand.u32 4294901760, %v2178_v50 }
 0x346   : > { %v1190_v60 = vpop.f32.mrb[6].mxu0 }
 0x347   : > { %v1191_v16 = vadd.f32 %v1190_v60, %v4851_v51  ;;  %v3177_v5 = vpop.f32.mrb[7].mxu0  ;;  %v5213_v51 = vand.u32 4294901760, %v4873_v18  ;;  %v2165_v60 = vand.u32 4294901760, %v2164_v21 }
 0x348   : > { %v5208_v5 = vand.u32 4294901760, %v4899_v8 }
 0x349   : > { %v2136_v29 = vsub.f32 %v4873_v18, %v5213_v51  ;;  %v4968_v39 = vpack.c.bf16 %v2165_v60, %v2158_v34  ;;  %v2199_v34 = vsub.f32 %v4913_v19, %v5204_v2  ;;  %v2206_v60 = vsub.f32 %v4915_v20, %v5205_v59 }
 0x34a   : > { %v2171_v36 = vsub.f32 %v4899_v8, %v5208_v5  ;;  %v3797_v2 = vpack.c.bf16 %v4881_v40, %v4879_v22 }
 0x34b   : > { %v2137_v30 = vand.u32 4294901760, %v2136_v29  ;;  %v5203_v29 = vand.u32 4294901760, %v4906_v28  ;;  %v2207_v50 = vand.u32 4294901760, %v2206_v60  ;;  %v3803_v60 = vpack.c.bf16 %v4901_v38, %v4899_v8 }
 0x34c   : > { %v2172_v41 = vand.u32 4294901760, %v2171_v36  ;;  %v2200_v36 = vand.u32 4294901760, %v2199_v34  ;;  %v3800_v34 = vpack.c.bf16 %v4897_v7, %v4895_v53 }
 0x34d   : > { %v4948_v27 = vpack.c.bf16 %v2137_v30, %v2130_v24  ;;  %v2185_v30 = vsub.f32 %v4904_v23, %v5206_v6  ;;  %v2192_v47 = vsub.f32 %v4906_v28, %v5203_v29 }
 0x34e   : > { %v3779_v24 = vpack.c.bf16 %v2179_v42, %v2172_v41  ;;  %v3785_v41 = vpack.c.bf16 %v2207_v50, %v2200_v36  ;;  %v3809_v36 = vpack.c.bf16 %v4915_v20, %v4913_v19 }
 0x34f   : > { %v2186_v48 = vand.u32 4294901760, %v2185_v30  ;;  %v2193_v1 = vand.u32 4294901760, %v2192_v47  ;;  %v3788_v47 = vpack.c.bf16 %v4858_v33, %v4856_v63  ;;  %v5251_v63 = vand.u32 4294901760, %v4871_v52 }
 0x350   : > { %v5252_v33 = vand.u32 4294901760, %v4873_v18 }
 0x351   : > { %v3782_v21 = vpack.c.bf16 %v2193_v1, %v2186_v48  ;;  %v3791_v48 = vpack.c.bf16 %v4865_v15, %v4863_v35  ;;  %v3794_v1 = vpack.c.bf16 %v4873_v18, %v4871_v52  ;;  %v5254_v35 = vand.u32 4294901760, %v4881_v40 }
 0x352   : > { %v5257_v52 = vand.u32 4294901760, %v4899_v8  ;;  %v5258_v18 = vand.u32 4294901760, %v4901_v38  ;;  %v5260_v40 = vand.u32 4294901760, %v4906_v28 }
 0x366   : > { %v1279_v42 = vpop.f32.mrb[8].mxu0 }
 0x367   : > { %v1280_v29 = vadd.f32 %v1279_v42, %v1191_v16  ;;  %v3212_v30 = vpop.f32.mrb[9].mxu0  ;;  %v3806_v16 = vpack.c.bf16 %v4906_v28, %v4904_v23 }
 0x386   : > { %v1398_v50 = vpop.f32.mrb[10].mxu0 }
 0x387   : > { %v1399_v42 = vadd.f32 %v1398_v50, %v1280_v29  ;;  %v3247_v30 = vpop.f32.mrb[11].mxu0  ;;  %v2791_v29 = vld [vmem:[%s5182_s6 + $0x1] ss:$0 sm:$0xff] }
 0x3a6   : > { %v1485_v59 = vpop.f32.mrb[12].mxu0 }
 0x3a7   : > { %v1486_v6 = vadd.f32 %v1485_v59, %v1399_v42  ;;  %v3282_v57 = vpop.f32.mrb[13].mxu0 }
 0x3a9   : > { %v1568_v5 = vadd.f32 %v4843_v44, %v1486_v6 }
 0x3ab   : > { %v1659_v4 = vadd.f32 %v4845_v54, %v1568_v5 }
 0x3ad   : > { %v1739_v3 = vadd.f32 %v4847_v9, %v1659_v4 }
 0x3ae   : > { %v1815_v26 = vpop.f32.mrb[14].mxu0 }
 0x3af   : > { %v1816_v31 = vadd.f32 %v1815_v26, %v1739_v3  ;;  %v3326_v51 = vpop.f32.mrb[15].mxu0 }
 0x3b1   : > { %v1899_v58 = vadd.f32 %v4849_v11, %v1816_v31  ;;  %v3836_v11 = vpack.c.bf16 %v2107_v12, %v2100_v10  ;;  %v3842_v10 = vpack.c.bf16 %v5252_v33, %v5251_v63  ;;  %v5253_v12 = vand.u32 4294901760, %v4879_v22 }
 0x3b2   : > { %v5259_v22 = vand.u32 4294901760, %v4904_v23 }
 0x3b4   : > { %v3854_v31 = vpack.c.bf16 %v5260_v40, %v5259_v22 }
 0x3b6   : > { %v1973_v62 = vpop.f32.mrb[16].mxu0 }
 0x3b7   : > { %v1974_v50 = vadd.f32 %v1973_v62, %v1899_v58  ;;  %v3348_v30 = vpop.f32.mrb[17].mxu0  ;;  %v5250_v62 = vand.u32 4294901760, %v4865_v15  ;;  %v3845_v15 = vpack.c.bf16 %v5254_v35, %v5253_v12  ;;  %v5256_v58 = vand.u32 4294901760, %v4897_v7 }
 0x3b8   : > { %v5262_v7 = vand.u32 4294901760, %v4915_v20 }
 0x3b9   : > { %v1982_v59 = vadd.f32 %v2791_v29, %v1974_v50 }
 0x3bb   : > { %v1983_v57 = vmul.f32 0.2, %v1982_v59 }
 0x3bd   : > { %v1984_v42 = vmax.f32 %v1982_v59, %v1983_v57 }
 0x3bf   : > { %v5015_v44 = vand.u32 4294901760, %v1984_v42 }
 0x3c1   : > { %v2088_v54 = vsub.f32 %v1984_v42, %v5015_v44 }
 0x3c3   : > { %v2089_v9 = vand.u32 4294901760, %v2088_v54 }
 0x3c5   : > { %v2090_v4 = vsub.f32 %v2088_v54, %v2089_v9 }
 0x3c7   : > { %v2091_v26 = vand.u32 4294901760, %v2090_v4 }
 0x3c9   : > { %3382 = vmatmul.mubr.f32.vlgmr.msra.gmra.mrb[10].mxu1 %v2091_v26 }
 0x3ca   : > { %3765 = vmatpush3.bf16.msra.mxu1 %v4934_v32  ;;  %3416 = vmatprep.mubr.msk.f32.mxu1 %vm4187_vm0, %v4186_v0  ;;  %v3839_v32 = vpack.c.bf16 %v5250_v62, %v2114_v46  ;;  %v5255_v46 = vand.u32 4294901760, %v4895_v53  ;;  %v5261_v53 = vand.u32 4294901760, %v4913_v19 }
 0x3cb   : > { %3766 = vmatprep.subr.bf16.mxu1 %v4188_v17 }
 0x3cc   : > { %v3848_v51 = vpack.c.bf16 %v5256_v58, %v5255_v46 }
 0x3ce   : > { %3768 = vmatpush3.bf16.msra.mxu1 %v4938_v56  ;;  %v3851_v56 = vpack.c.bf16 %v5258_v18, %v5257_v52 }
 0x3cf   : > { %3769 = vmatprep.subr.bf16.mxu1 %v4188_v17 }
 0x3d2   : > { %3771 = vmatpush3.bf16.msra.mxu1 %v4948_v27  ;;  %v3857_v27 = vpack.c.bf16 %v5262_v7, %v5261_v53 }
 0x3d3   : > { %3772 = vmatprep.subr.bf16.mxu1 %v4188_v17 }
 0x3d6   : > { %3774 = vmatpush3.bf16.msra.mxu1 %v4958_v49 }
 0x3d7   : > { %3775 = vmatprep.subr.bf16.mxu1 %v4188_v17 }
 0x3da   : > { %3777 = vmatpush3.bf16.msra.mxu1 %v4968_v39 }
 0x3db   : > { %3778 = vmatprep.subr.bf16.mxu1 %v4188_v17 }
 0x3de   : > { %3780 = vmatpush3.bf16.msra.mxu1 %v3779_v24 }
 0x3df   : > { %3781 = vmatprep.subr.bf16.mxu1 %v4188_v17 }
 0x3e2   : > { %3783 = vmatpush3.bf16.msra.mxu1 %v3782_v21 }
 0x3e3   : > { %3784 = vmatprep.subr.bf16.mxu1 %v4188_v17 }
 0x3e6   : > { %3786 = vmatpush3.bf16.msra.mxu1 %v3785_v41 }
 0x3e7   : > { %3787 = vmatprep.subr.bf16.mxu1 %v4188_v17 }
 0x3e9   : > { %3417 = vmatmul.mubr.f32.vlgmr.msra.gmra.mrb[10].mxu1 %v5015_v44 }
 0x3ea   : > { %3789 = vmatpush3.bf16.msra.mxu1 %v3788_v47  ;;  %3451 = vmatprep.mubr.msk.f32.mxu1 %vm4187_vm0, %v4186_v0 }
 0x3eb   : > { %3790 = vmatprep.subr.bf16.mxu1 %v4188_v17 }
 0x3ee   : > { %3792 = vmatpush3.bf16.msra.mxu1 %v3791_v48 }
 0x3ef   : > { %3793 = vmatprep.subr.bf16.mxu1 %v4188_v17 }
 0x3f2   : > { %3795 = vmatpush3.bf16.msra.mxu1 %v3794_v1 }
 0x3f3   : > { %3796 = vmatprep.subr.bf16.mxu1 %v4188_v17 }
 0x3f6   : > { %3798 = vmatpush3.bf16.msra.mxu1 %v3797_v2 }
 0x3f7   : > { %3799 = vmatprep.subr.bf16.mxu1 %v4188_v17 }
 0x3fa   : > { %3801 = vmatpush3.bf16.msra.mxu1 %v3800_v34 }
 0x3fb   : > { %3802 = vmatprep.subr.bf16.mxu1 %v4188_v17 }
 0x3fe   : > { %3804 = vmatpush3.bf16.msra.mxu1 %v3803_v60 }
 0x3ff   : > { %3805 = vmatprep.subr.bf16.mxu1 %v4188_v17 }
 0x402   : > { %3807 = vmatpush3.bf16.msra.mxu1 %v3806_v16 }
 0x403   : > { %3808 = vmatprep.subr.bf16.mxu1 %v4188_v17 }
 0x406   : > { %3810 = vmatpush3.bf16.msra.mxu1 %v3809_v36 }
 0x407   : > { %3811 = vmatprep.subr.bf16.mxu1 %v4188_v17 }
 0x409   : > { %3452 = vmatmul.mubr.f32.vlgmr.msra.gmra.mrb[10].mxu1 %v2088_v54 }
 0x40a   : > { %3813 = vmatpush3.bf16.msra.mxu1 %v4853_v45  ;;  %3486 = vmatprep.mubr.msk.f32.mxu1 %vm4187_vm0, %v4186_v0 }
 0x40b   : > { %3814 = vmatprep.subr.bf16.mxu1 %v4188_v17 }
 0x40e   : > { %3816 = vmatpush3.bf16.msra.mxu1 %v4861_v14 }
 0x40f   : > { %3817 = vmatprep.subr.bf16.mxu1 %v4188_v17 }
 0x412   : > { %3819 = vmatpush3.bf16.msra.mxu1 %v4869_v43 }
 0x413   : > { %3820 = vmatprep.subr.bf16.mxu1 %v4188_v17 }
 0x416   : > { %3822 = vmatpush3.bf16.msra.mxu1 %v4877_v61 }
 0x417   : > { %3823 = vmatprep.subr.bf16.mxu1 %v4188_v17 }
 0x41a   : > { %3825 = vmatpush3.bf16.msra.mxu1 %v4885_v25 }
 0x41b   : > { %3826 = vmatprep.subr.bf16.mxu1 %v4188_v17 }
 0x41e   : > { %3828 = vmatpush3.bf16.msra.mxu1 %v4889_v37 }
 0x41f   : > { %3829 = vmatprep.subr.bf16.mxu1 %v4188_v17 }
 0x422   : > { %3831 = vmatpush3.bf16.msra.mxu1 %v4893_v55 }
 0x423   : > { %3832 = vmatprep.subr.bf16.mxu1 %v4188_v17 }
 0x426   : > { %3834 = vmatpush3.bf16.msra.mxu1 %v4911_v13 }
 0x427   : > { %3835 = vmatprep.subr.bf16.mxu1 %v4188_v17 }
 0x429   : > { %3487 = vmatmul.mubr.f32.vlgmr.msra.gmra.mrb[10].mxu1 %v2089_v9 }
 0x42a   : > { %3837 = vmatpush3.bf16.msra.mxu1 %v3836_v11  ;;  %3521 = vmatprep.mubr.msk.f32.mxu1 %vm4187_vm0, %v4186_v0 }
 0x42b   : > { %3838 = vmatprep.subr.bf16.mxu1 %v4188_v17 }
 0x42e   : > { %3840 = vmatpush3.bf16.msra.mxu1 %v3839_v32 }
 0x42f   : > { %3841 = vmatprep.subr.bf16.mxu1 %v4188_v17 }
 0x432   : > { %3843 = vmatpush3.bf16.msra.mxu1 %v3842_v10 }
 0x433   : > { %3844 = vmatprep.subr.bf16.mxu1 %v4188_v17 }
 0x436   : > { %3846 = vmatpush3.bf16.msra.mxu1 %v3845_v15 }
 0x437   : > { %3847 = vmatprep.subr.bf16.mxu1 %v4188_v17 }
 0x43a   : > { %3849 = vmatpush3.bf16.msra.mxu1 %v3848_v51 }
 0x43b   : > { %3850 = vmatprep.subr.bf16.mxu1 %v4188_v17 }
 0x43e   : > { %3852 = vmatpush3.bf16.msra.mxu1 %v3851_v56 }
 0x43f   : > { %3853 = vmatprep.subr.bf16.mxu1 %v4188_v17 }
 0x442   : > { %3855 = vmatpush3.bf16.msra.mxu1 %v3854_v31 }
 0x443   : > { %3856 = vmatprep.subr.bf16.mxu1 %v4188_v17 }
 0x446   : > { %3858 = vmatpush3.bf16.msra.mxu1 %v3857_v27 }
 0x447   : > { %3859 = vmatprep.subr.bf16.mxu1 %v4188_v17 }
 0x449   : > { %3522 = vmatmul.mubr.f32.vlgmr.msra.gmra.mrb[10].mxu1 %v5015_v44 }
 0x44a   : > { %3861 = vmatpush3.bf16.msra.mxu1 %v4853_v45  ;;  %3556 = vmatprep.mubr.msk.f32.mxu1 %vm4187_vm0, %v4186_v0  ;;  %v2792_v0 = vld [vmem:[%s5182_s6 + $0x2] ss:$0 sm:$0xff] }
 0x44b   : > { %3862 = vmatprep.subr.bf16.mxu1 %v4188_v17 }
 0x44e   : > { %3864 = vmatpush3.bf16.msra.mxu1 %v4861_v14 }
 0x44f   : > { %3865 = vmatprep.subr.bf16.mxu1 %v4188_v17 }
 0x452   : > { %3867 = vmatpush3.bf16.msra.mxu1 %v4869_v43 }
 0x453   : > { %3868 = vmatprep.subr.bf16.mxu1 %v4188_v17 }
 0x456   : > { %3870 = vmatpush3.bf16.msra.mxu1 %v4877_v61 }
 0x457   : > { %3871 = vmatprep.subr.bf16.mxu1 %v4188_v17 }
 0x45a   : > { %3873 = vmatpush3.bf16.msra.mxu1 %v4885_v25 }
 0x45b   : > { %3874 = vmatprep.subr.bf16.mxu1 %v4188_v17 }
 0x45e   : > { %3876 = vmatpush3.bf16.msra.mxu1 %v4889_v37 }
 0x45f   : > { %3877 = vmatprep.subr.bf16.mxu1 %v4188_v17 }
 0x462   : > { %3879 = vmatpush3.bf16.msra.mxu1 %v4893_v55 }
 0x463   : > { %3880 = vmatprep.subr.bf16.mxu1 %v4188_v17 }
 0x466   : > { %3882 = vmatpush3.bf16.msra.mxu1 %v4911_v13 }
 0x469   : > { %3557 = vmatmul.mubr.f32.vlgmr.msra.gmra.mrb[10].mxu1 %v5015_v44 }
 0x53c   : > { %v2643_v45 = vpop.f32.mrb[10].mxu1 }
 0x53d   : > { %v3885_v14 = vadd.f32 %v2792_v0, %v2643_v45  ;;  %v3558_v43 = vpop.f32.mrb[11].mxu1 }
 0x53f   : > { %v2647_v61 = vmul.f32 0.2, %v3885_v14 }
 0x541   : > { %v2648_v25 = vmax.f32 %v3885_v14, %v2647_v61 }
 0x543   : > { %2649 = vst [vmem:[%s348_s14] sm:$0xff] %v2648_v25 }
 0x544   : > { %4117 = shalt.err (!%p4114_p5)
}
 0x545   : > { %s4118_s18 = scalar_lea.hbm %s5132_s30, 128  ;;  %s4122_s21 = scalar_lea.hbm %s5183_s7, 256 }
 0x546   : > { %p4119_p0 = scmp.ne.s32.totalorder %s5132_s30, %s4118_s18  ;;  %p4123_p12 = scmp.lt.u32.totalorder %s5132_s30, %s5183_s7 }
 0x547   : > { %p4124_p2 = scmp.lt.u32.totalorder %s4122_s21, %s4118_s18  ;;  %p4126_p4 = scmp.lt.u32.totalorder %s4118_s18, %s5132_s30 }
 0x548   : > { %p4120_p11 = pnand %p4119_p0, %p4368_p6 }
 0x549   : > { %p4125_p1 = por %p4124_p2, %p4123_p12 }
 0x54a   : > { %p4121_p9 = pneg %p4120_p11 }
 0x54b   : > { %p4127_p8 = por %p4126_p4, %p4125_p1 }
 0x54d   : > { %p4128_p3 = pnand %p4127_p8, %p4121_p9 }
 0x54f   : > { %4131 = shalt.err (!%p4128_p3)
}
 0x550   : > { %3918 = dma.vmem_to_hbm [thread:$0]  (%p4368_p6), %s5134_s23, 128, %s5132_s30, %s2651_s9  }
 0x551 PF: > { %s2676_s10 = sand.u32 1, %s4166_s24   ;;  %p5263_p7 = scmp.ne.s32.totalorder %s5217_s8, 0 }
 0x552   : > { %p5264_p10 = scmp.ge.s32.totalorder %s4178_s27, 2  ;;  %s2677_s12 = scalar_lea.sflag [#allocation4], %s2676_s10 }
 0x554   : > { %p3935_p13 = pnand %p5264_p10, %p5263_p7 }
 0x556   : > { %4161 = dma.done.wait (!%p3935_p13), %s2677_s12, 128  }
 0x557   : > { %4163 = vsyncadd (!%p3935_p13), %s2677_s12, 4294967168  ;;  %p22_p5 = scmp.ge.s32.totalorder %s4354_s22, 4   ;;  %s5265_s24 = smov %s4170_s25 }
 0x558   : > { %s5266_s25 = smov %s4174_s26  ;;  %s5267_s26 = smov %s4364_s19 }
 0x559   : > { %s5268_s27 = smov %s4354_s22  ;;  %24 = sbr.rel (!%p22_p5) target bundleno = 7 (0x7), region = 108 }
 0x560   :  { %2682 = vsyncpa [#allocation3], 1 }
 0x561   :  { %2684 = vsyncpa [#allocation3 + $0x1], 1 }
 0x562   :  { %2685 = vsyncpa [#allocation6], 1 }
 0x563   :  { %2686 = vsyncpa [#allocation9], 1 }
 0x564   :  { %2687 = vsyncpa [#allocation4], 1 }
 0x565   :  { %2689 = vsyncpa [#allocation4 + $0x1], 1 }

// kernel: tpu_custom_call.1
= control target key start
LH: loop header
LB: loop body
LE: loop exit
PB: predicated region body
PF: predicated region fallthrough
CT: control target
= control target key end

     0   :  { %12 = vsyncpa [#allocation3], 0  ;;  %s5176_s0 = inlined_call_operand.hbm [shape: f32[16,32], index: 0, kind: input, shape index: {}]   ;;  %s5177_s1 = inlined_call_operand.vmem [shape: f32[16,8], index: 1, kind: input, shape index: {}]   ;;  %s5178_s2 = inlined_call_operand.hbm [shape: f32[8,128], index: 2, kind: input, shape index: {}]   ;;  %s5179_s3 = inlined_call_operand.vmem [shape: f32[32,128], index: 3, kind: input, shape index: {}]   ;;  %s5180_s4 = inlined_call_operand.hbm [shape: f32[128,128], index: 4, kind: input, shape index: {}]   ;;  %s5181_s5 = inlined_call_operand.hbm [shape: f32[128,128], index: 5, kind: input, shape index: {}]   ;;  %s5182_s6 = inlined_call_operand.vmem [shape: f32[3,128], index: 6, kind: input, shape index: {}]   ;;  %s5183_s7 = inlined_call_operand.hbm [shape: f32[16,128], index: 7, kind: output, shape index: {}]  }
   0x1   :  { %14 = vsyncpa [#allocation3 + $0x1], 0 }
   0x2   :  { %15 = vsyncpa [#allocation6], 0 }
   0x3   :  { %16 = vsyncpa [#allocation9], 0 }
   0x4   :  { %17 = vsyncpa [#allocation4], 0 }
   0x5   :  { %19 = vsyncpa [#allocation4 + $0x1], 0  ;;  %s4230_s24 = smov 0   ;;  %s4232_s25 = smov 0  }
   0x6   :  { %s4234_s26 = smov 0   ;;  %s4236_s27 = smov 0  }
   0x7 LB: > { %s4251_s28 = sadd.s32 4294967295, %s4178_s27   ;;  %s2775_s29 = sadd.s32 4294967294, %s4178_s27   ;;  %s4178_s27 = sphi %s4236_s27, %s5268_s27   ;;  %s4174_s26 = sphi %s4234_s26, %s5267_s26   ;;  %s4170_s25 = sphi %s4232_s25, %s5266_s25   ;;  %s4166_s24 = sphi %s4230_s24, %s5265_s24  }
   0x8   : > { %p45_p0 = scmp.ne.s32.totalorder %s4170_s25, %s4166_s24  ;;  %p5184_p1 = scmp.eq.s32.totalorder %s4251_s28, 0 }
   0x9   : > { %p206_p3 = scmp.eq.s32.totalorder %s2775_s29, 1  ;;  %p2776_p5 = scmp.ge.s32.totalorder %s4178_s27, 1 }
   0xa   : > { %p4260_p4 = por %p5184_p1, %p45_p0  ;;  %p213_p7 = scmp.lt.s32.totalorder %s4178_s27, 3 }
   0xb   : > { %p4265_p6 = por %p206_p3, %p45_p0  ;;  %s4180_s10 = smov [#allocation5]  }
   0xc   : > { %s5216_s30 = scalar_select %p4260_p4, 1, 0 }
   0xd   : > { %s5217_s8 = scalar_select %p4265_p6, 1, 0 }
   0xe   : > { %p4270_p8 = pnand %p2776_p5, %p213_p7  ;;  %s226_s11 = sshll.u32 %s4180_s10, 4  ;;  %s227_s11 = int_to_ptr.vmem [resolvable:$true] %s226_s11 }
   0xf   : > { %s4181_s12 = smov [#allocation7]   ;;  %s4182_s15 = smov [#allocation8]  }
  0x10   : > { %s5218_s9 = scalar_select %p4270_p8, 1, 0 }
  0x11   : > { %p3920_p10 = pneg %p4270_p8  ;;  %s239_s13 = sshll.u32 %s4181_s12, 4  ;;  %s4283_s13 = int_to_ptr.vmem [resolvable:$true] %s239_s13 }
  0x12   : > { %s4285_s16 = sshll.u32 %s4182_s15, 4  ;;  %s3990_s19 = scalar_lea.hbm %s5178_s2, 128  ;;  %s253_s16 = int_to_ptr.vmem [resolvable:$true] %s4285_s16 }
  0x13   : > { %p4279_p11 = pnand %p3920_p10, %p5184_p1  ;;  %p3991_p12 = scmp.ne.s32.totalorder %s5178_s2, %s3990_s19 }
  0x14   : > { %p3997_p5 = scmp.lt.u32.totalorder %s3990_s19, %s5178_s2 }
  0x15   : > { %p4295_p13 = pneg %p4279_p11 }
  0x17   : > { %p3993_p0 = pnand %p4295_p13, %p3991_p12 }
  0x19   : > { %p3994_p3 = pneg %p3993_p0 }
  0x1b   : > { %p3999_p7 = pnand %p3997_p5, %p3994_p3 }
  0x1d   : > { %4002 = shalt.err (!%p3999_p7)
}
  0x1e   : > { %s4003_s10 = scalar_lea.vmem %s227_s11, 128  ;;  %p4011_p2 = scmp.lt.s32.totalorder %s227_s11, %s227_s11 }
  0x1f   : > { %p4004_p10 = scmp.ne.s32.totalorder %s227_s11, %s4003_s10  ;;  %p4012_p6 = scmp.lt.s32.totalorder %s4003_s10, %s4003_s10 }
  0x21   : > { %p4006_p9 = pnand %p4004_p10, %p4295_p13  ;;  %p4013_p4 = por %p4012_p6, %p4011_p2 }
  0x23   : > { %p4007_p1 = pneg %p4006_p9 }
  0x25   : > { %p4014_p8 = pnand %p4013_p4, %p4007_p1 }
  0x27   : > { %4017 = shalt.err (!%p4014_p8)
}
  0x28   : > { %3923 = dma.hbm_to_vmem [thread:$0]  (!%p4279_p11), %s5178_s2, 128, %s227_s11, [#allocation6]  }
  0x29   : > { %s4018_s19 = scalar_lea.hbm %s5180_s4, 2048 }
  0x2a   : > { %p4019_p9 = scmp.ne.s32.totalorder %s5180_s4, %s4018_s19  ;;  %p4025_p1 = scmp.lt.u32.totalorder %s4018_s19, %s5180_s4 }
  0x2c   : > { %p4021_p12 = pnand %p4019_p9, %p4295_p13 }
  0x2e   : > { %p4022_p2 = pneg %p4021_p12 }
  0x30   : > { %p4027_p4 = pnand %p4025_p1, %p4022_p2 }
  0x32   : > { %4030 = shalt.err (!%p4027_p4)
}
  0x33   : > { %s4031_s11 = scalar_lea.vmem %s4283_s13, 2048  ;;  %p4039_p3 = scmp.lt.s32.totalorder %s4283_s13, %s4283_s13 }
  0x34   : > { %p4032_p6 = scmp.ne.s32.totalorder %s4283_s13, %s4031_s11  ;;  %p4040_p5 = scmp.lt.s32.totalorder %s4031_s11, %s4031_s11 }
  0x36   : > { %p4034_p8 = pnand %p4032_p6, %p4295_p13  ;;  %p4041_p7 = por %p4040_p5, %p4039_p3 }
  0x38   : > { %p4035_p0 = pneg %p4034_p8 }
  0x3a   : > { %p4042_p10 = pnand %p4041_p7, %p4035_p0 }
  0x3c   : > { %4045 = shalt.err (!%p4042_p10)
}
  0x3d   : > { %s4183_s10 = smov 128   ;;  %s4184_s12 = smov 8  }
  0x3e   : > { %3926 = dma.hbm_to_vmem [thread:$0]  (!%p4279_p11), %s5180_s4, 2048, %s4283_s13, [#allocation6], %s4183_s10, %s4183_s10, %s4184_s12  }
  0x3f   : > { %s4046_s20 = scalar_lea.hbm %s5181_s5, 2048 }
  0x40   : > { %p4047_p9 = scmp.ne.s32.totalorder %s5181_s5, %s4046_s20  ;;  %p4053_p1 = scmp.lt.u32.totalorder %s4046_s20, %s5181_s5 }
  0x42   : > { %p4049_p12 = pnand %p4047_p9, %p4295_p13 }
  0x44   : > { %p4050_p2 = pneg %p4049_p12 }
  0x46   : > { %p4055_p4 = pnand %p4053_p1, %p4050_p2 }
  0x48   : > { %4058 = shalt.err (!%p4055_p4)
}
  0x49   : > { %s4059_s15 = scalar_lea.vmem %s253_s16, 2048  ;;  %p4067_p3 = scmp.lt.s32.totalorder %s253_s16, %s253_s16 }
  0x4a   : > { %p4060_p6 = scmp.ne.s32.totalorder %s253_s16, %s4059_s15  ;;  %p4068_p5 = scmp.lt.s32.totalorder %s4059_s15, %s4059_s15 }
  0x4c   : > { %p4062_p8 = pnand %p4060_p6, %p4295_p13  ;;  %p4069_p7 = por %p4068_p5, %p4067_p3 }
  0x4e   : > { %p4063_p0 = pneg %p4062_p8 }
  0x50   : > { %p4070_p10 = pnand %p4069_p7, %p4063_p0 }
  0x52   : > { %4073 = shalt.err (!%p4070_p10)
}
  0x53   : > { %3929 = dma.hbm_to_vmem [thread:$0]  (!%p4279_p11), %s5181_s5, 2048, %s253_s16, [#allocation9], %s4183_s10, %s4183_s10, %s4184_s12  }
  0x54   : > { %s4354_s22 = sadd.s32 1, %s4178_s27   ;;  %s32_s14 = sadd.s32 1, %s4174_s26 }
  0x55   : > { %s29_s18 = ssub.s32 %s4178_s27, %s4354_s22  ;;  %p39_p9 = scmp.ne.s32.totalorder %s4174_s26, %s4170_s25 }
  0x56   : > { %p30_p13 = scmp.eq.s32.totalorder %s29_s18, 0  ;;  %p40_p12 = scmp.eq.s32.totalorder %s4178_s27, 0 }
  0x57   : > { %p3941_p2 = scmp.lt.s32.totalorder %s4178_s27, 2  ;;  %p5221_p4 = scmp.eq.s32.totalorder %s4251_s28, 1 }
  0x58   : > { %s4364_s19 = scalar_select %p30_p13, %s4174_s26, %s32_s14  }
  0x59   : > { %p41_p1 = por %p40_p12, %p39_p9  ;;  %p4368_p6 = por %p5221_p4, %p39_p9 }
  0x5a   : > { %s269_s21 = sand.u32 1, %s4174_s26   ;;  %s2782_s23 = sshll.u32 %s4178_s27, 7 }
  0x5b   : > { %s2781_s16 = sshll.u32 %s269_s21, 3  ;;  %s4377_s29 = scalar_lea.hbm %s5176_s0, %s2782_s23 }
  0x5c   : > { %s273_s11 = scalar_lea.vmem [#allocation2], %s2781_s16  ;;  %p4379_p11 = pnand %p3941_p2, %p41_p1 }
  0x5d   : > { %s280_s15 = sshll.u32 %s273_s11, 4  ;;  %s270_s17 = scalar_lea.sflag [#allocation3], %s269_s21  ;;  %s4383_s15 = int_to_ptr.vmem [resolvable:$true] %s280_s15 }
  0x5e   : > { %s4074_s18 = scalar_lea.hbm %s4377_s29, 128  ;;  %p4076_p0 = pneg %p4379_p11 }
  0x5f   : > { %p4075_p8 = scmp.ne.s32.totalorder %s4377_s29, %s4074_s18  ;;  %s4079_s16 = scalar_lea.hbm %s5176_s0, 256 }
  0x60   : > { %p4080_p7 = scmp.lt.u32.totalorder %s4377_s29, %s5176_s0  ;;  %p4081_p10 = scmp.lt.u32.totalorder %s4079_s16, %s4074_s18 }
  0x61   : > { %p4077_p3 = pnand %p4076_p0, %p4075_p8  ;;  %p4083_p9 = scmp.lt.u32.totalorder %s4074_s18, %s4377_s29 }
  0x62   : > { %p4082_p13 = por %p4081_p10, %p4080_p7 }
  0x63   : > { %p4078_p5 = pneg %p4077_p3 }
  0x64   : > { %p4084_p12 = por %p4083_p9, %p4082_p13 }
  0x66   : > { %p4085_p2 = pnand %p4084_p12, %p4078_p5 }
  0x68   : > { %4088 = shalt.err (!%p4085_p2)
}
  0x69   : > { %s4089_s21 = scalar_lea.vmem %s4383_s15, 128  ;;  %s4185_s11 = smov [#allocation2]  }
  0x6a   : > { %p4090_p1 = scmp.ne.s32.totalorder %s4383_s15, %s4089_s21  ;;  %s4094_s14 = sshll.u32 %s4185_s11, 4  ;;  %s4095_s14 = int_to_ptr.vmem [resolvable:$false] %s4094_s14 }
  0x6b   : > { %s4096_s23 = scalar_lea.vmem %s4095_s14, 256  ;;  %p4097_p3 = scmp.lt.s32.totalorder %s4383_s15, %s4095_s14 }
  0x6c   : > { %p4092_p4 = pnand %p4090_p1, %p4076_p0  ;;  %p4098_p7 = scmp.lt.s32.totalorder %s4096_s23, %s4089_s21 }
  0x6e   : > { %p4093_p8 = pneg %p4092_p4  ;;  %p4099_p10 = por %p4098_p7, %p4097_p3 }
  0x70   : > { %p4100_p13 = pnand %p4099_p10, %p4093_p8 }
  0x72   : > { %4103 = shalt.err (!%p4100_p13)
}
  0x73   : > { %3933 = dma.hbm_to_vmem [thread:$0]  (!%p4379_p11), %s4377_s29, 128, %s4383_s15, %s270_s17  }
  0x74   : > { %p5224_p5 = scmp.ne.s32.totalorder %s5218_s9, 0 }
  0x75   : > { %s4413_s18 = sand.u32 (!%p5224_p5), 1, %s4170_s25   ;;  %p5225_p0 = scmp.ne.s32.totalorder (!%p5224_p5), %s5216_s30, 0 }
  0x76   : > { %296 = sbr.rel (%p5224_p5) target bundleno = 1361 (0x551), region = 48  ;;  %s2784_s16 = sshll.u32 (!%p5224_p5), %s4413_s18, 3 }
  0x77   : > { %s299_s10 = scalar_lea.sflag (!%p5224_p5), [#allocation3], %s4413_s18  ;;  %s4419_s12 = scalar_lea.vmem (!%p5224_p5), [#allocation2], %s2784_s16 }
  0x7d   : > { %4149 = dma.done.wait (%p5225_p0), %s299_s10, 128  }
  0x7e   : > { %4151 = vsyncadd (%p5225_p0), %s299_s10, 4294967168  ;;  %p5226_p11 = scmp.eq.s32.totalorder %s4251_s28, 0 }
  0x80   : > { %4153 = dma.done.wait (%p5226_p11), [#allocation6], 2176   ;;  %p5227_p9 = pmov %p5226_p11 }
  0x82   : > { %4155 = vsyncadd (%p5227_p9), [#allocation6], 4294965120  ;;  %p5228_p12 = pmov %p5227_p9 }
  0x83   : > { %p5229_p2 = pmov %p5227_p9 }
  0x84   : > { %4157 = dma.done.wait (%p5228_p12), [#allocation9], 2048  }
  0x85   : > { %4159 = vsyncadd (%p5229_p2), [#allocation9], 4294965248  ;;  %p349_p1 = scmp.lt.s32.totalorder %s4251_s28, 1  ;;  %v4186_v0 = vmov 0.0   ;;  %vm4187_vm0 = vmmov 0   ;;  %vm371_vm1 = vcmask 64512  }
  0x86   : > { %3048 = vmatprep.subr.mxu0 %v4186_v0  ;;  %3050 = vmatprep.mubr.msk.f32.mxu0 %vm4187_vm0, %v4186_v0  ;;  %v365_v1 = vld [vmem:[#allocation5] sm:$0xff]  ;;  %v832_v14 = vld [vmem:[#allocation7] sm:$0xff]  ;;  %v833_v15 = vld [vmem:[#allocation7 + $0x8] sm:$0xff]  ;;  %v4188_v17 = vmov 0.0|0.0   ;;  %vm355_vm2 = vcmask 261120   ;;  %s2794_s11 = sshll.u32 %s4251_s28, 7 }
  0x87   : > { %s350_s30 = scalar_select %p349_p1, %s4251_s28, 1  ;;  %3043 = vmatprep.subr.mxu1 %v4186_v0  ;;  %3045 = vmatprep.mubr.msk.f32.mxu1 %vm4187_vm0, %v4186_v0  ;;  %v376_v3 = vand.u32 4294901760, %v365_v1  ;;  %v834_v16 = vld [vmem:[#allocation7 + $0x10] sm:$0xff]  ;;  %v849_v18 = vand.u32 4294901760, %v832_v14  ;;  %v852_v19 = vand.u32 4294901760, %v833_v15  ;;  %v835_v20 = vld [vmem:[#allocation7 + $0x18] sm:$0xff] }
  0x88   : > { %v855_v21 = vand.u32 4294901760, %v834_v16  ;;  %v858_v22 = vand.u32 4294901760, %v835_v20  ;;  %v2790_v31 = vld [vmem:[%s5182_s6] ss:$0 sm:$0xff]  ;;  %v836_v40 = vld [vmem:[#allocation7 + $0x20] sm:$0xff]  ;;  %v838_v45 = vld [vmem:[#allocation7 + $0x30] sm:$0xff] }
  0x89   : > { %s2789_s9 = sshll.u32 %s350_s30, 3  ;;  %v453_v6 = vsub.f32 %v365_v1, %v376_v3  ;;  %3044 = vmatpush3.msra.mxu1 %v376_v3  ;;  %v4462_v23 = vpack.c.bf16 %v852_v19, %v849_v18  ;;  %v4464_v24 = vsub.f32 %v832_v14, %v849_v18  ;;  %v4466_v25 = vsub.f32 %v833_v15, %v852_v19  ;;  %v4482_v33 = vld [vmem:[%s4419_s12] sm:$0xff]  ;;  %v839_v46 = vld [vmem:[#allocation7 + $0x38] sm:$0xff]  ;;  %v840_v50 = vld [vmem:[#allocation7 + $0x40] sm:$0xff]  ;;  %s348_s14 = scalar_lea.vmem [#allocation10], %s2784_s16 }
  0x8a   : > { %s352_s13 = scalar_lea.vmem %s5177_s1, %s2789_s9  ;;  %3703 = vmatprep.subr.bf16.mxu1 %v4188_v17  ;;  %v4468_v26 = vsub.f32 %v834_v16, %v855_v21  ;;  %v4470_v27 = vsub.f32 %v835_v20, %v858_v22  ;;  %v4473_v28 = vpack.c.bf16 %v858_v22, %v855_v21  ;;  %v354_v37 = vmul.f32 %v4482_v33, %v4482_v33  ;;  %v837_v41 = vld [vmem:[#allocation7 + $0x28] sm:$0xff]  ;;  %v842_v55 = vld [vmem:[#allocation7 + $0x50] sm:$0xff]  ;;  %v843_v56 = vld [vmem:[#allocation7 + $0x58] sm:$0xff]  ;;  %s2664_s23 = sshll.u32 %s348_s14, 4  ;;  %s5134_s23 = int_to_ptr.vmem [resolvable:$true] %s2664_s23 }
  0x8b   : > { %v364_v2 = vld [vmem:[%s352_s13] sm:$0xff]  ;;  %v454_v8 = vand.u32 4294901760, %v453_v6  ;;  %v861_v42 = vand.u32 4294901760, %v836_v40  ;;  %v864_v43 = vand.u32 4294901760, %v837_v41  ;;  %v867_v47 = vand.u32 4294901760, %v838_v45  ;;  %v844_v60 = vld [vmem:[#allocation7 + $0x60] sm:$0xff]  ;;  %s5132_s30 = scalar_lea.hbm %s5183_s7, %s2794_s11 }
  0x8c   : > { %v373_v4 = vsel %vm371_vm1, %v364_v2, 0  ;;  %v356_v39 = vsel %vm355_vm2, %v354_v37, 0.0  ;;  %v870_v48 = vand.u32 4294901760, %v839_v46  ;;  %v841_v51 = vld [vmem:[#allocation7 + $0x48] sm:$0xff]  ;;  %v873_v52 = vand.u32 4294901760, %v840_v50  ;;  %s2651_s9 = scalar_lea.sflag [#allocation4], %s4413_s18 }
  0x8d   : > { %v441_v5 = vand.u32 4294901760, %v373_v4  ;;  %v455_v10 = vsub.f32 %v453_v6, %v454_v8  ;;  %v4491_v44 = vpack.c.bf16 %v864_v43, %v861_v42  ;;  %v876_v53 = vand.u32 4294901760, %v841_v51  ;;  %v845_v61 = vld [vmem:[#allocation7 + $0x68] sm:$0xff]  ;;  %s4104_s29 = scalar_lea.vmem %s5134_s23, 128  ;;  %s4189_s28 = smov [#allocation10]  }
  0x8e   : > { %v4495_v49 = vpack.c.bf16 %v870_v48, %v867_v47  ;;  %v879_v57 = vand.u32 4294901760, %v842_v55  ;;  %v882_v58 = vand.u32 4294901760, %v843_v56  ;;  %v885_v62 = vand.u32 4294901760, %v844_v60  ;;  %p4105_p4 = scmp.ne.s32.totalorder %s5134_s23, %s4104_s29  ;;  %s4108_s16 = sshll.u32 %s4189_s28, 4  ;;  %s4109_s16 = int_to_ptr.vmem [resolvable:$false] %s4108_s16 }
  0x8f   : > { %v442_v7 = vsub.f32 %v373_v4, %v441_v5  ;;  %v456_v12 = vand.u32 4294901760, %v455_v10  ;;  %v4499_v54 = vpack.c.bf16 %v876_v53, %v873_v52  ;;  %v888_v63 = vand.u32 4294901760, %v845_v61  ;;  %s4110_s15 = scalar_lea.vmem %s4109_s16, 256  ;;  %p4111_p7 = scmp.lt.s32.totalorder %s5134_s23, %s4109_s16 }
  0x90   : > { %v4503_v59 = vpack.c.bf16 %v882_v58, %v879_v57  ;;  %v4507_v1 = vsub.f32 %v836_v40, %v861_v42  ;;  %v4509_v2 = vsub.f32 %v837_v41, %v864_v43  ;;  %v4513_v4 = vsub.f32 %v839_v46, %v870_v48  ;;  %p4106_p8 = pnand %p4105_p4, %p4368_p6  ;;  %p4112_p10 = scmp.lt.s32.totalorder %s4110_s15, %s4104_s29 }
  0x91   : > { %v443_v9 = vand.u32 4294901760, %v442_v7  ;;  %3049 = vmatpush3.msra.mxu0 %v456_v12  ;;  %v4521_v10 = vsub.f32 %v843_v56, %v882_v58  ;;  %v4525_v12 = vsub.f32 %v844_v60, %v885_v62  ;;  %v5202_v16 = vand.u32 4294901760, %v4464_v24 }
  0x92   : > { %3051 = vmatmul.mubr.f32.vlgmr.msra.gmra.mrb[0].mxu0 %v441_v5  ;;  %3053 = vmatprep.subr.mxu0 %v4186_v0  ;;  %v5201_v18 = vand.u32 4294901760, %v4466_v25  ;;  %v5198_v41 = vand.u32 4294901760, %v4507_v1  ;;  %v5197_v42 = vand.u32 4294901760, %v4509_v2  ;;  %p4107_p3 = pneg %p4106_p8  ;;  %p4113_p13 = por %p4112_p10, %p4111_p7 }
  0x93   : > { %v444_v11 = vsub.f32 %v442_v7, %v443_v9  ;;  %3054 = vmatpush3.msra.mxu0 %v453_v6  ;;  %3055 = vmatprep.mubr.msk.f32.mxu0 %vm4187_vm0, %v4186_v0  ;;  %v847_v6 = vld [vmem:[#allocation7 + $0x78] sm:$0xff]  ;;  %v943_v22 = vsub.f32 %v4464_v24, %v5202_v16 }
  0x94   : > { %3058 = vmatprep.subr.mxu0 %v4186_v0  ;;  %v894_v15 = vand.u32 4294901760, %v847_v6  ;;  %v978_v46 = vsub.f32 %v4509_v2, %v5197_v42  ;;  %p4114_p5 = pnand %p4113_p13, %p4107_p3 }
  0x95   : > { %v445_v13 = vand.u32 4294901760, %v444_v11  ;;  %v4523_v11 = vpack.c.bf16 %v888_v63, %v885_v62 }
  0x96   : > { %v4537_v21 = vsub.f32 %v847_v6, %v894_v15  ;;  %v979_v48 = vand.u32 4294901760, %v978_v46 }
  0x97   : > { %3046 = vmatmul.mubr.f32.vlgmr.msra.gmra.mrb[0].mxu1 %v445_v13  ;;  %v4527_v13 = vsub.f32 %v845_v61, %v888_v63 }
  0x98   : > { %3291 = vmatprep.mubr.msk.f32.mxu1 %vm4187_vm0, %v4186_v0 }
  0x9a   : > { %3056 = vmatmul.mubr.f32.vlgmr.msra.gmra.mrb[0].mxu0 %v442_v7  ;;  %v4515_v7 = vsub.f32 %v840_v50, %v873_v52 }
  0x9b   : > { %3059 = vmatpush3.msra.mxu0 %v376_v3  ;;  %3060 = vmatprep.mubr.msk.f32.mxu0 %vm4187_vm0, %v4186_v0 }
  0x9c   : > { %3063 = vmatprep.subr.mxu0 %v4186_v0  ;;  %v5194_v58 = vand.u32 4294901760, %v4515_v7 }
  0x9e   : > { %v999_v62 = vsub.f32 %v4515_v7, %v5194_v58 }
  0xa2   : > { %3061 = vmatmul.mubr.f32.vlgmr.msra.gmra.mrb[0].mxu0 %v443_v9  ;;  %v4519_v9 = vsub.f32 %v842_v55, %v879_v57 }
  0xa3   : > { %3064 = vmatpush3.msra.mxu0 %v454_v8  ;;  %3065 = vmatprep.mubr.msk.f32.mxu0 %vm4187_vm0, %v4186_v0  ;;  %v4517_v8 = vsub.f32 %v841_v51, %v876_v53  ;;  %v5195_v51 = vand.u32 4294901760, %v4513_v4 }
  0xa4   : > { %3068 = vmatprep.subr.mxu0 %v4186_v0 }
  0xa5   : > { %v992_v55 = vsub.f32 %v4513_v4, %v5195_v51  ;;  %v5193_v60 = vand.u32 4294901760, %v4517_v8 }
  0xa7   : > { %v993_v57 = vand.u32 4294901760, %v992_v55  ;;  %v1006_v63 = vsub.f32 %v4517_v8, %v5193_v60  ;;  %v5187_v55 = vand.u32 4294901760, %v4537_v21 }
  0xa9   : > { %v1007_v6 = vand.u32 4294901760, %v1006_v63 }
  0xaa   : > { %3066 = vmatmul.mubr.f32.vlgmr.msra.gmra.mrb[0].mxu0 %v441_v5 }
  0xab   : > { %3069 = vmatpush3.msra.mxu0 %v376_v3  ;;  %3070 = vmatprep.mubr.msk.f32.mxu0 %vm4187_vm0, %v4186_v0  ;;  %v4511_v3 = vsub.f32 %v838_v45, %v867_v47  ;;  %v971_v45 = vsub.f32 %v4507_v1, %v5198_v41 }
  0xac   : > { %3559 = vmatprep.subr.bf16.mxu0 %v4188_v17 }
  0xad   : > { %v972_v47 = vand.u32 4294901760, %v971_v45  ;;  %v5196_v50 = vand.u32 4294901760, %v4511_v3 }
  0xaf   : > { %v4569_v52 = vpack.c.bf16 %v979_v48, %v972_v47  ;;  %v985_v53 = vsub.f32 %v4511_v3, %v5196_v50 }
  0xb1   : > { %v986_v56 = vand.u32 4294901760, %v985_v53 }
  0xb2   : > { %3071 = vmatmul.mubr.f32.vlgmr.msra.gmra.mrb[0].mxu0 %v441_v5  ;;  %v846_v5 = vld [vmem:[#allocation7 + $0x70] sm:$0xff] }
  0xb3   : > { %3105 = vmatprep.mubr.msk.f32.mxu0 %vm4187_vm0, %v4186_v0  ;;  %3561 = vmatpush3.bf16.msra.mxu0 %v4462_v23  ;;  %v891_v14 = vand.u32 4294901760, %v846_v5  ;;  %v4579_v61 = vpack.c.bf16 %v993_v57, %v986_v56 }
  0xb4   : > { %3562 = vmatprep.subr.bf16.mxu0 %v4188_v17 }
  0xb5   : > { %v4532_v19 = vsub.f32 %v846_v5, %v891_v14  ;;  %v4535_v20 = vpack.c.bf16 %v894_v15, %v891_v14  ;;  %v1000_v5 = vand.u32 4294901760, %v999_v62  ;;  %v5192_v14 = vand.u32 4294901760, %v4519_v9 }
  0xb6   : > { %v5191_v15 = vand.u32 4294901760, %v4521_v10  ;;  %v1048_v62 = vsub.f32 %v4537_v21, %v5187_v55 }
  0xb7   : > { %3564 = vmatpush3.bf16.msra.mxu0 %v4473_v28  ;;  %v5188_v53 = vand.u32 4294901760, %v4532_v19 }
  0xb8   : > { %3565 = vmatprep.subr.bf16.mxu0 %v4188_v17 }
  0xb9   : > { %v1041_v57 = vsub.f32 %v4532_v19, %v5188_v53  ;;  %v828_v53 = vld [vmem:[%s5179_s3] sm:$0xff] }
  0xbb   : > { %3567 = vmatpush3.bf16.msra.mxu0 %v4491_v44  ;;  %v1042_v63 = vand.u32 4294901760, %v1041_v57 }
  0xbc   : > { %3568 = vmatprep.subr.bf16.mxu0 %v4188_v17 }
  0xbf   : > { %3570 = vmatpush3.bf16.msra.mxu0 %v4495_v49 }
  0xc0   : > { %3571 = vmatprep.subr.bf16.mxu0 %v4188_v17 }
  0xc3   : > { %3573 = vmatpush3.bf16.msra.mxu0 %v4499_v54 }
  0xc4   : > { %3574 = vmatprep.subr.bf16.mxu0 %v4188_v17 }
  0xc7   : > { %3576 = vmatpush3.bf16.msra.mxu0 %v4503_v59 }
  0xc8   : > { %3577 = vmatprep.subr.bf16.mxu0 %v4188_v17 }
  0xcb   : > { %3579 = vmatpush3.bf16.msra.mxu0 %v4523_v11 }
  0xcc   : > { %3580 = vmatprep.subr.bf16.mxu0 %v4188_v17 }
  0xcf   : > { %3582 = vmatpush3.bf16.msra.mxu0 %v4535_v20 }
  0xd0   : > { %3583 = vmatprep.subr.bf16.mxu0 %v4188_v17 }
 0x16a   : > { %v447_v29 = vpop.f32.mrb[0].mxu1 }
 0x16b   : > { %v3047_v30 = vpop.f32.mrb[1].mxu1  ;;  %v448_v32 = vadd.f32 %v2790_v31, %v447_v29  ;;  %v950_v29 = vsub.f32 %v4466_v25, %v5201_v18 }
 0x16c   : > { %v944_v30 = vand.u32 4294901760, %v943_v22  ;;  %v4589_v22 = vpack.c.bf16 %v1007_v6, %v1000_v5  ;;  %v1049_v5 = vand.u32 4294901760, %v1048_v62 }
 0x16d   : > { %v951_v31 = vand.u32 4294901760, %v950_v29  ;;  %v1013_v29 = vsub.f32 %v4519_v9, %v5192_v14 }
 0x16e   : > { %v4617_v6 = vpack.c.bf16 %v1049_v5, %v1042_v63 }
 0x185   : > { %v817_v34 = vpop.f32.mrb[0].mxu0 }
 0x186   : > { %v4484_v35 = vadd.f32 %v817_v34, %v448_v32  ;;  %v3072_v36 = vpop.f32.mrb[1].mxu0  ;;  %v5200_v32 = vand.u32 4294901760, %v4468_v26  ;;  %v5199_v34 = vand.u32 4294901760, %v4470_v27 }
 0x187   : > { %v4549_v36 = vpack.c.bf16 %v951_v31, %v944_v30  ;;  %v1020_v30 = vsub.f32 %v4521_v10, %v5191_v15  ;;  %v1014_v31 = vand.u32 4294901760, %v1013_v29  ;;  %v3608_v29 = vpack.c.bf16 %v4466_v25, %v4464_v24 }
 0x188   : > { %v821_v38 = vmul.f32 %v4484_v35, %v4484_v35  ;;  %v957_v37 = vsub.f32 %v4468_v26, %v5200_v32  ;;  %v1493_v15 = vand.u32 4294901760, %v828_v53 }
 0x18a   : > { %822 = vadd.xlane.f32.xlu0 %v821_v38  ;;  %v964_v38 = vsub.f32 %v4470_v27, %v5199_v34 }
 0x18c   : > { %v965_v40 = vand.u32 4294901760, %v964_v38  ;;  %v5190_v38 = vand.u32 4294901760, %v4525_v12 }
 0x18e   : > { %357 = vadd.xlane.f32.xlu0 %v356_v39  ;;  %v958_v39 = vand.u32 4294901760, %v957_v37  ;;  %v1021_v37 = vand.u32 4294901760, %v1020_v30  ;;  %v1027_v45 = vsub.f32 %v4525_v12, %v5190_v38  ;;  %v3611_v30 = vpack.c.bf16 %v4470_v27, %v4468_v26 }
 0x190   : > { %v4559_v43 = vpack.c.bf16 %v965_v40, %v958_v39  ;;  %v5189_v39 = vand.u32 4294901760, %v4527_v13  ;;  %v4599_v40 = vpack.c.bf16 %v1021_v37, %v1014_v31  ;;  %v1028_v47 = vand.u32 4294901760, %v1027_v45 }
 0x191   : > { %v3614_v31 = vpack.c.bf16 %v4509_v2, %v4507_v1  ;;  %v3617_v37 = vpack.c.bf16 %v4513_v4, %v4511_v3 }
 0x192   : > { %v1034_v46 = vsub.f32 %v4527_v13, %v5189_v39  ;;  %v829_v39 = vld [vmem:[%s5179_s3 + $0x8] sm:$0xff] }
 0x193   : > { %v1496_v14 = vand.u32 4294901760, %v829_v39 }
 0x194   : > { %v1035_v48 = vand.u32 4294901760, %v1034_v46 }
 0x195   : > { %v4641_v60 = vpack.c.bf16 %v1496_v14, %v1493_v15  ;;  %v1580_v58 = vsub.f32 %v829_v39, %v1496_v14 }
 0x196   : > { %v4609_v56 = vpack.c.bf16 %v1035_v48, %v1028_v47 }
 0x197   : > { %3705 = vmatpush3.bf16.msra.mxu1 %v4641_v60  ;;  %v1581_v41 = vand.u32 4294901760, %v1580_v58 }
 0x198   : > { %3706 = vmatprep.subr.bf16.mxu1 %v4188_v17 }
 0x199   : > { %v1582_v39 = vsub.f32 %v1580_v58, %v1581_v41 }
 0x217   : > { %v823_v57 = vpop.xlane.xlu0 %822 }
 0x218   : > { %v824_v62 = vmul.f32 0.03125, %v823_v57  ;;  %v830_v57 = vld [vmem:[%s5179_s3 + $0x10] sm:$0xff] }
 0x21a   : > { %v825_v63 = vadd.f32 1e-08, %v824_v62  ;;  %v831_v62 = vld [vmem:[%s5179_s3 + $0x18] sm:$0xff] }
 0x21b   : > { %v358_v5 = vpop.xlane.xlu0 %357 }
 0x21c   : > { %3986 = vrsqrt.f32 %v825_v63  ;;  %v360_v55 = vmul.f32 0.03125, %v358_v5  ;;  %v1499_v63 = vand.u32 4294901760, %v830_v57  ;;  %v1502_v5 = vand.u32 4294901760, %v831_v62 }
 0x21e   : > { %v361_v38 = vadd.f32 1e-08, %v360_v55  ;;  %v1573_v55 = vsub.f32 %v828_v53, %v1493_v15  ;;  %v4651_v51 = vpack.c.bf16 %v1502_v5, %v1499_v63  ;;  %v1587_v32 = vsub.f32 %v830_v57, %v1499_v63 }
 0x21f   : > { %v1594_v18 = vsub.f32 %v831_v62, %v1502_v5 }
 0x220   : > { %3988 = vrsqrt.f32 %v361_v38  ;;  %3708 = vmatpush3.bf16.msra.mxu1 %v4651_v51  ;;  %v1574_v42 = vand.u32 4294901760, %v1573_v55 }
 0x221   : > { %3709 = vmatprep.subr.bf16.mxu1 %v4188_v17  ;;  %v1595_v47 = vand.u32 4294901760, %v1594_v18 }
 0x222   : > { %v1575_v15 = vsub.f32 %v1573_v55, %v1574_v42 }
 0x223   : > { %v1596_v5 = vsub.f32 %v1594_v18, %v1595_v47 }
 0x226   : > { %v3987_v38 = vpop.eup %3986 }
 0x227   : > { %v827_v50 = vmul.f32 %v3987_v38, %v4484_v35  ;;  %v1588_v38 = vand.u32 4294901760, %v1587_v32 }
 0x229   : > { %v4656_v34 = vand.u32 4294901760, %v827_v50 }
 0x22a   : > { %v3989_v16 = vpop.eup %3988 }
 0x22b   : > { %v4659_v48 = vsub.f32 %v827_v50, %v4656_v34  ;;  %v363_v14 = vmul.f32 %v3989_v16, %v4482_v33  ;;  %v1576_v50 = vand.u32 4294901760, %v1575_v15  ;;  %v1583_v33 = vand.u32 4294901760, %v1582_v39 }
 0x22c   : > { %v1589_v16 = vsub.f32 %v1587_v32, %v1588_v38 }
 0x22d   : > { %v931_v53 = vand.u32 4294901760, %v4659_v48  ;;  %v1490_v35 = vsel %vm355_vm2, %v363_v14, 0 }
 0x22e   : > { %v4664_v46 = vand.u32 4294901760, %v1490_v35  ;;  %v1590_v15 = vand.u32 4294901760, %v1589_v16 }
 0x22f   : > { %v932_v57 = vsub.f32 %v4659_v48, %v931_v53 }
 0x230   : > { %v4670_v62 = vsub.f32 %v1490_v35, %v4664_v46  ;;  %v3710_v35 = vpack.c.bf16 %v1583_v33, %v1576_v50  ;;  %v3716_v50 = vpack.c.bf16 %v1580_v58, %v1573_v55  ;;  %v5233_v58 = vpack.c.bf16 %v4537_v21, %v4532_v19 }
 0x231   : > { %v933_v63 = vand.u32 4294901760, %v932_v57  ;;  %v1597_v57 = vand.u32 4294901760, %v1596_v5 }
 0x232   : > { %v1563_v45 = vand.u32 4294901760, %v4670_v62 }
 0x233   : > { %3106 = vmatmul.mubr.f32.vlgmr.msra.gmra.mrb[2].mxu0 %v933_v63 }
 0x234   : > { %3585 = vmatpush3.bf16.msra.mxu0 %v4549_v36  ;;  %3140 = vmatprep.mubr.msk.f32.mxu0 %vm4187_vm0, %v4186_v0  ;;  %v1564_v14 = vsub.f32 %v4670_v62, %v1563_v45  ;;  %v3713_v36 = vpack.c.bf16 %v1597_v57, %v1590_v15  ;;  %v1989_v57 = vld [vmem:[#allocation8 + $0x20] sm:$0xff] }
 0x235   : > { %3586 = vmatprep.subr.bf16.mxu0 %v4188_v17 }
 0x236   : > { %v1565_v39 = vand.u32 4294901760, %v1564_v14 }
 0x238   : > { %3588 = vmatpush3.bf16.msra.mxu0 %v4559_v43  ;;  %3292 = vmatmul.mubr.f32.vlgmr.msra.gmra.mrb[2].mxu1 %v1565_v39  ;;  %v3719_v43 = vpack.c.bf16 %v1594_v18, %v1587_v32  ;;  %v3731_v18 = vpack.c.bf16 %v1595_v47, %v1588_v38  ;;  %v5230_v32 = vpack.c.bf16 %v4517_v8, %v4515_v7  ;;  %v5243_v47 = vand.u32 4294901760, %v4517_v8  ;;  %v1990_v39 = vld [vmem:[#allocation8 + $0x28] sm:$0xff] }
 0x239   : > { %3589 = vmatprep.subr.bf16.mxu0 %v4188_v17  ;;  %3711 = vmatpush3.bf16.msra.mxu1 %v3710_v35  ;;  %v5249_v8 = vand.u32 4294901760, %v4537_v21 }
 0x23a   : > { %3712 = vmatprep.subr.bf16.mxu1 %v4188_v17  ;;  %3302 = vmatprep.mubr.msk.f32.mxu1 %vm4187_vm0, %v4186_v0 }
 0x23c   : > { %3591 = vmatpush3.bf16.msra.mxu0 %v4569_v52  ;;  %v3728_v52 = vpack.c.bf16 %v1581_v41, %v1574_v42  ;;  %v5231_v41 = vpack.c.bf16 %v4521_v10, %v4519_v9  ;;  %v5232_v42 = vpack.c.bf16 %v4527_v13, %v4525_v12 }
 0x23d   : > { %3592 = vmatprep.subr.bf16.mxu0 %v4188_v17  ;;  %3714 = vmatpush3.bf16.msra.mxu1 %v3713_v36  ;;  %v2019_v36 = vand.u32 4294901760, %v1989_v57 }
 0x23e   : > { %3715 = vmatprep.subr.bf16.mxu1 %v4188_v17 }
 0x240   : > { %3594 = vmatpush3.bf16.msra.mxu0 %v4579_v61  ;;  %3303 = vmatmul.mubr.f32.vlgmr.msra.gmra.mrb[4].mxu1 %v4664_v46  ;;  %v5234_v61 = vand.u32 4294901760, %v4464_v24  ;;  %v5238_v24 = vand.u32 4294901760, %v4507_v1  ;;  %v5244_v1 = vand.u32 4294901760, %v4519_v9 }
 0x241   : > { %3595 = vmatprep.subr.bf16.mxu0 %v4188_v17  ;;  %3717 = vmatpush3.bf16.msra.mxu1 %v3716_v50  ;;  %v2022_v50 = vand.u32 4294901760, %v1990_v39 }
 0x242   : > { %3718 = vmatprep.subr.bf16.mxu1 %v4188_v17  ;;  %3313 = vmatprep.mubr.msk.f32.mxu1 %vm4187_vm0, %v4186_v0 }
 0x244   : > { %3597 = vmatpush3.bf16.msra.mxu0 %v4589_v22  ;;  %v5235_v22 = vand.u32 4294901760, %v4466_v25  ;;  %v5239_v25 = vand.u32 4294901760, %v4509_v2  ;;  %v5245_v2 = vand.u32 4294901760, %v4521_v10 }
 0x245   : > { %3598 = vmatprep.subr.bf16.mxu0 %v4188_v17  ;;  %3720 = vmatpush3.bf16.msra.mxu1 %v3719_v43  ;;  %v4869_v43 = vpack.c.bf16 %v2022_v50, %v2019_v36 }
 0x246   : > { %3727 = vmatprep.subr.bf16.mxu1 %v4188_v17  ;;  %v3671_v55 = vpack.c.bf16 %v5245_v2, %v5244_v1 }
 0x248   : > { %3600 = vmatpush3.bf16.msra.mxu0 %v4599_v40  ;;  %3314 = vmatmul.mubr.f32.vlgmr.msra.gmra.mrb[6].mxu1 %v4670_v62  ;;  %v3656_v40 = vpack.c.bf16 %v5235_v22, %v5234_v61  ;;  %v1988_v62 = vld [vmem:[#allocation8 + $0x18] sm:$0xff] }
 0x249   : > { %3601 = vmatprep.subr.bf16.mxu0 %v4188_v17  ;;  %3729 = vmatpush3.bf16.msra.mxu1 %v3728_v52  ;;  %v2016_v5 = vand.u32 4294901760, %v1988_v62  ;;  %v4871_v52 = vsub.f32 %v1989_v57, %v2019_v36 }
 0x24a   : > { %3730 = vmatprep.subr.bf16.mxu1 %v4188_v17  ;;  %3335 = vmatprep.mubr.msk.f32.mxu1 %vm4187_vm0, %v4186_v0 }
 0x24b   : > { %v4865_v15 = vsub.f32 %v1988_v62, %v2016_v5 }
 0x24c   : > { %3603 = vmatpush3.bf16.msra.mxu0 %v4609_v56  ;;  %v5236_v56 = vand.u32 4294901760, %v4468_v26  ;;  %v5241_v26 = vand.u32 4294901760, %v4513_v4  ;;  %v5247_v4 = vand.u32 4294901760, %v4527_v13  ;;  %v1985_v13 = vld [vmem:[#allocation8] sm:$0xff] }
 0x24d   : > { %3604 = vmatprep.subr.bf16.mxu0 %v4188_v17  ;;  %3732 = vmatpush3.bf16.msra.mxu1 %v3731_v18  ;;  %v4873_v18 = vsub.f32 %v1990_v39, %v2022_v50  ;;  %v5215_v62 = vand.u32 4294901760, %v4865_v15 }
 0x24e   : > { %3739 = vmatprep.subr.bf16.mxu1 %v4188_v17 }
 0x24f   : > { %v2122_v50 = vsub.f32 %v4865_v15, %v5215_v62 }
 0x250   : > { %3606 = vmatpush3.bf16.msra.mxu0 %v4617_v6  ;;  %3336 = vmatmul.mubr.f32.vlgmr.msra.gmra.mrb[8].mxu1 %v4664_v46  ;;  %v5237_v6 = vand.u32 4294901760, %v4470_v27 }
 0x251   : > { %3607 = vmatprep.subr.bf16.mxu0 %v4188_v17  ;;  %3381 = vmatprep.mubr.msk.f32.mxu1 %vm4187_vm0, %v4186_v0 }
 0x253   : > { %3141 = vmatmul.mubr.f32.vlgmr.msra.gmra.mrb[4].mxu0 %v4656_v34 }
 0x254   : > { %3609 = vmatpush3.bf16.msra.mxu0 %v3608_v29  ;;  %3175 = vmatprep.mubr.msk.f32.mxu0 %vm4187_vm0, %v4186_v0  ;;  %v3659_v29 = vpack.c.bf16 %v5237_v6, %v5236_v56  ;;  %v1993_v56 = vld [vmem:[#allocation8 + $0x40] sm:$0xff]  ;;  %v1994_v6 = vld [vmem:[#allocation8 + $0x48] sm:$0xff] }
 0x255   : > { %3610 = vmatprep.subr.bf16.mxu0 %v4188_v17 }
 0x258   : > { %3612 = vmatpush3.bf16.msra.mxu0 %v3611_v30  ;;  %v3662_v30 = vpack.c.bf16 %v5239_v25, %v5238_v24  ;;  %v2034_v24 = vand.u32 4294901760, %v1994_v6 }
 0x259   : > { %3613 = vmatprep.subr.bf16.mxu0 %v4188_v17 }
 0x25c   : > { %3615 = vmatpush3.bf16.msra.mxu0 %v3614_v31  ;;  %v5240_v31 = vand.u32 4294901760, %v4511_v3  ;;  %v5246_v3 = vand.u32 4294901760, %v4525_v12 }
 0x25d   : > { %3616 = vmatprep.subr.bf16.mxu0 %v4188_v17 }
 0x25e   : > { %v3665_v27 = vpack.c.bf16 %v5241_v26, %v5240_v31  ;;  %v1996_v31 = vld [vmem:[#allocation8 + $0x58] sm:$0xff] }
 0x260   : > { %3618 = vmatpush3.bf16.msra.mxu0 %v3617_v37  ;;  %v5242_v37 = vand.u32 4294901760, %v4515_v7  ;;  %v5248_v7 = vand.u32 4294901760, %v4532_v19  ;;  %v1986_v19 = vld [vmem:[#allocation8 + $0x8] sm:$0xff] }
 0x261   : > { %3619 = vmatprep.subr.bf16.mxu0 %v4188_v17  ;;  %v2010_v21 = vand.u32 4294901760, %v1986_v19 }
 0x262   : > { %v3677_v38 = vpack.c.bf16 %v5249_v8, %v5248_v7  ;;  %v4897_v7 = vsub.f32 %v1994_v6, %v2034_v24 }
 0x263   : > { %v4858_v33 = vsub.f32 %v1986_v19, %v2010_v21 }
 0x264   : > { %3621 = vmatpush3.bf16.msra.mxu0 %v5230_v32  ;;  %v1991_v32 = vld [vmem:[#allocation8 + $0x30] sm:$0xff] }
 0x265   : > { %3622 = vmatprep.subr.bf16.mxu0 %v4188_v17 }
 0x268   : > { %3624 = vmatpush3.bf16.msra.mxu0 %v5231_v41  ;;  %v1992_v41 = vld [vmem:[#allocation8 + $0x38] sm:$0xff] }
 0x269   : > { %3625 = vmatprep.subr.bf16.mxu0 %v4188_v17 }
 0x26c   : > { %3627 = vmatpush3.bf16.msra.mxu0 %v5232_v42  ;;  %v2025_v42 = vand.u32 4294901760, %v1991_v32 }
 0x26d   : > { %3628 = vmatprep.subr.bf16.mxu0 %v4188_v17 }
 0x26e   : > { %v4879_v22 = vsub.f32 %v1991_v32, %v2025_v42 }
 0x270   : > { %3630 = vmatpush3.bf16.msra.mxu0 %v5233_v58  ;;  %v2028_v58 = vand.u32 4294901760, %v1992_v41 }
 0x271   : > { %3631 = vmatprep.subr.bf16.mxu0 %v4188_v17 }
 0x272   : > { %v4877_v61 = vpack.c.bf16 %v2028_v58, %v2025_v42  ;;  %v2123_v42 = vand.u32 4294901760, %v2122_v50 }
 0x273   : > { %3176 = vmatmul.mubr.f32.vlgmr.msra.gmra.mrb[6].mxu0 %v4659_v48  ;;  %v3668_v48 = vpack.c.bf16 %v5243_v47, %v5242_v37  ;;  %v1997_v47 = vld [vmem:[#allocation8 + $0x60] sm:$0xff] }
 0x274   : > { %3633 = vmatpush3.bf16.msra.mxu0 %v4462_v23  ;;  %3210 = vmatprep.mubr.msk.f32.mxu0 %vm4187_vm0, %v4186_v0  ;;  %v2043_v1 = vand.u32 4294901760, %v1997_v47 }
 0x275   : > { %3634 = vmatprep.subr.bf16.mxu0 %v4188_v17 }
 0x278   : > { %3636 = vmatpush3.bf16.msra.mxu0 %v4473_v28 }
 0x279   : > { %3637 = vmatprep.subr.bf16.mxu0 %v4188_v17 }
 0x27c   : > { %3639 = vmatpush3.bf16.msra.mxu0 %v4491_v44 }
 0x27d   : > { %3640 = vmatprep.subr.bf16.mxu0 %v4188_v17 }
 0x280   : > { %3642 = vmatpush3.bf16.msra.mxu0 %v4495_v49 }
 0x281   : > { %3643 = vmatprep.subr.bf16.mxu0 %v4188_v17 }
 0x284   : > { %3645 = vmatpush3.bf16.msra.mxu0 %v4499_v54 }
 0x285   : > { %3646 = vmatprep.subr.bf16.mxu0 %v4188_v17 }
 0x288   : > { %3648 = vmatpush3.bf16.msra.mxu0 %v4503_v59 }
 0x289   : > { %3649 = vmatprep.subr.bf16.mxu0 %v4188_v17 }
 0x28c   : > { %3651 = vmatpush3.bf16.msra.mxu0 %v4523_v11 }
 0x28d   : > { %3652 = vmatprep.subr.bf16.mxu0 %v4188_v17 }
 0x290   : > { %3654 = vmatpush3.bf16.msra.mxu0 %v4535_v20 }
 0x291   : > { %3655 = vmatprep.subr.bf16.mxu0 %v4188_v17 }
 0x293   : > { %3211 = vmatmul.mubr.f32.vlgmr.msra.gmra.mrb[8].mxu0 %v931_v53  ;;  %v3674_v53 = vpack.c.bf16 %v5247_v4, %v5246_v3  ;;  %v1999_v3 = vld [vmem:[#allocation8 + $0x70] sm:$0xff]  ;;  %v2000_v4 = vld [vmem:[#allocation8 + $0x78] sm:$0xff] }
 0x294   : > { %3657 = vmatpush3.bf16.msra.mxu0 %v3656_v40  ;;  %3245 = vmatprep.mubr.msk.f32.mxu0 %vm4187_vm0, %v4186_v0  ;;  %v4881_v40 = vsub.f32 %v1992_v41, %v2028_v58  ;;  %v5214_v58 = vand.u32 4294901760, %v4871_v52 }
 0x295   : > { %3658 = vmatprep.subr.bf16.mxu0 %v4188_v17 }
 0x296   : > { %v2129_v6 = vsub.f32 %v4871_v52, %v5214_v58 }
 0x298   : > { %3660 = vmatpush3.bf16.msra.mxu0 %v3659_v29  ;;  %v2031_v29 = vand.u32 4294901760, %v1993_v56 }
 0x299   : > { %3661 = vmatprep.subr.bf16.mxu0 %v4188_v17 }
 0x29a   : > { %v4885_v25 = vpack.c.bf16 %v2034_v24, %v2031_v29  ;;  %v2130_v24 = vand.u32 4294901760, %v2129_v6 }
 0x29c   : > { %3663 = vmatpush3.bf16.msra.mxu0 %v3662_v30  ;;  %v1995_v30 = vld [vmem:[#allocation8 + $0x50] sm:$0xff] }
 0x29d   : > { %3664 = vmatprep.subr.bf16.mxu0 %v4188_v17  ;;  %v2037_v26 = vand.u32 4294901760, %v1995_v30 }
 0x29f   : > { %v4899_v8 = vsub.f32 %v1995_v30, %v2037_v26 }
 0x2a0   : > { %3666 = vmatpush3.bf16.msra.mxu0 %v3665_v27  ;;  %v2040_v27 = vand.u32 4294901760, %v1996_v31 }
 0x2a1   : > { %3667 = vmatprep.subr.bf16.mxu0 %v4188_v17 }
 0x2a2   : > { %v4889_v37 = vpack.c.bf16 %v2040_v27, %v2037_v26  ;;  %v5211_v26 = vand.u32 4294901760, %v4881_v40 }
 0x2a4   : > { %3669 = vmatpush3.bf16.msra.mxu0 %v3668_v48  ;;  %v1998_v48 = vld [vmem:[#allocation8 + $0x68] sm:$0xff] }
 0x2a5   : > { %3670 = vmatprep.subr.bf16.mxu0 %v4188_v17  ;;  %v2046_v2 = vand.u32 4294901760, %v1998_v48 }
 0x2a8   : > { %3672 = vmatpush3.bf16.msra.mxu0 %v3671_v55  ;;  %v4893_v55 = vpack.c.bf16 %v2046_v2, %v2043_v1 }
 0x2a9   : > { %3673 = vmatprep.subr.bf16.mxu0 %v4188_v17 }
 0x2ac   : > { %3675 = vmatpush3.bf16.msra.mxu0 %v3674_v53  ;;  %v4895_v53 = vsub.f32 %v1993_v56, %v2031_v29 }
 0x2ad   : > { %3676 = vmatprep.subr.bf16.mxu0 %v4188_v17 }
 0x2b0   : > { %3678 = vmatpush3.bf16.msra.mxu0 %v3677_v38  ;;  %v4901_v38 = vsub.f32 %v1996_v31, %v2040_v27  ;;  %v5212_v31 = vand.u32 4294901760, %v4879_v22 }
 0x2b1   : > { %3679 = vmatprep.subr.bf16.mxu0 %v4188_v17 }
 0x2b3   : > { %3246 = vmatmul.mubr.f32.vlgmr.msra.gmra.mrb[10].mxu0 %v4656_v34 }
 0x2b4   : > { %3681 = vmatpush3.bf16.msra.mxu0 %v4462_v23  ;;  %3280 = vmatprep.mubr.msk.f32.mxu0 %vm4187_vm0, %v4186_v0 }
 0x2b5   : > { %3682 = vmatprep.subr.bf16.mxu0 %v4188_v17 }
 0x2b8   : > { %3684 = vmatpush3.bf16.msra.mxu0 %v4473_v28 }
 0x2b9   : > { %3685 = vmatprep.subr.bf16.mxu0 %v4188_v17 }
 0x2bc   : > { %3687 = vmatpush3.bf16.msra.mxu0 %v4491_v44 }
 0x2bd   : > { %3688 = vmatprep.subr.bf16.mxu0 %v4188_v17 }
 0x2c0   : > { %3690 = vmatpush3.bf16.msra.mxu0 %v4495_v49 }
 0x2c1   : > { %3691 = vmatprep.subr.bf16.mxu0 %v4188_v17 }
 0x2c4   : > { %3693 = vmatpush3.bf16.msra.mxu0 %v4499_v54 }
 0x2c5   : > { %3694 = vmatprep.subr.bf16.mxu0 %v4188_v17 }
 0x2c8   : > { %3696 = vmatpush3.bf16.msra.mxu0 %v4503_v59 }
 0x2c9   : > { %3697 = vmatprep.subr.bf16.mxu0 %v4188_v17 }
 0x2cc   : > { %3699 = vmatpush3.bf16.msra.mxu0 %v4523_v11 }
 0x2cd   : > { %3700 = vmatprep.subr.bf16.mxu0 %v4188_v17 }
 0x2d0   : > { %3702 = vmatpush3.bf16.msra.mxu0 %v4535_v20  ;;  %v2007_v20 = vand.u32 4294901760, %v1985_v13 }
 0x2d1   : > { %3721 = vmatprep.subr.bf16.mxu0 %v4188_v17 }
 0x2d2   : > { %v4856_v63 = vsub.f32 %v1985_v13, %v2007_v20 }
 0x2d3   : > { %3281 = vmatmul.mubr.f32.vlgmr.msra.gmra.mrb[12].mxu0 %v4656_v34 }
 0x2d4   : > { %3723 = vmatpush3.bf16.msra.mxu0 %v4641_v60  ;;  %3324 = vmatprep.mubr.msk.f32.mxu0 %vm4187_vm0, %v4186_v0 }
 0x2d5   : > { %3724 = vmatprep.subr.bf16.mxu0 %v4188_v17 }
 0x2d8   : > { %3726 = vmatpush3.bf16.msra.mxu0 %v4651_v51 }
 0x2d9   : > { %3733 = vmatprep.subr.bf16.mxu0 %v4188_v17 }
 0x2db   : > { %3325 = vmatmul.mubr.f32.vlgmr.msra.gmra.mrb[14].mxu0 %v1563_v45  ;;  %v4853_v45 = vpack.c.bf16 %v2010_v21, %v2007_v20 }
 0x2dc   : > { %3735 = vmatpush3.bf16.msra.mxu0 %v4641_v60  ;;  %3346 = vmatprep.mubr.msk.f32.mxu0 %vm4187_vm0, %v4186_v0 }
 0x2dd   : > { %3736 = vmatprep.subr.bf16.mxu0 %v4188_v17  ;;  %3741 = vmatpush3.bf16.msra.mxu1 %v4853_v45 }
 0x2de   : > { %3742 = vmatprep.subr.bf16.mxu1 %v4188_v17 }
 0x2e0   : > { %3738 = vmatpush3.bf16.msra.mxu0 %v4651_v51 }
 0x2e3   : > { %3347 = vmatmul.mubr.f32.vlgmr.msra.gmra.mrb[16].mxu0 %v4664_v46  ;;  %v1987_v46 = vld [vmem:[#allocation8 + $0x10] sm:$0xff] }
 0x2e4   : > { %v2013_v16 = vand.u32 4294901760, %v1987_v46 }
 0x2e6   : > { %v4861_v14 = vpack.c.bf16 %v2016_v5, %v2013_v16  ;;  %v4863_v35 = vsub.f32 %v1987_v46, %v2013_v16 }
 0x2e8   : > { %3744 = vmatpush3.bf16.msra.mxu1 %v4861_v14  ;;  %v2114_v46 = vand.u32 4294901760, %v4863_v35 }
 0x2e9   : > { %3745 = vmatprep.subr.bf16.mxu1 %v4188_v17 }
 0x2ea   : > { %v2115_v36 = vsub.f32 %v4863_v35, %v2114_v46 }
 0x2ec   : > { %3747 = vmatpush3.bf16.msra.mxu1 %v4869_v43  ;;  %v2116_v41 = vand.u32 4294901760, %v2115_v36 }
 0x2ed   : > { %3748 = vmatprep.subr.bf16.mxu1 %v4188_v17 }
 0x2ee   : > { %v4938_v56 = vpack.c.bf16 %v2123_v42, %v2116_v41 }
 0x2f0   : > { %3750 = vmatpush3.bf16.msra.mxu1 %v4877_v61 }
 0x2f1   : > { %3751 = vmatprep.subr.bf16.mxu1 %v4188_v17 }
 0x2f4   : > { %3753 = vmatpush3.bf16.msra.mxu1 %v4885_v25 }
 0x2f5   : > { %3754 = vmatprep.subr.bf16.mxu1 %v4188_v17 }
 0x2f8   : > { %3756 = vmatpush3.bf16.msra.mxu1 %v4889_v37 }
 0x2f9   : > { %3757 = vmatprep.subr.bf16.mxu1 %v4188_v17 }
 0x2fc   : > { %3759 = vmatpush3.bf16.msra.mxu1 %v4893_v55 }
 0x2fd   : > { %3760 = vmatprep.subr.bf16.mxu1 %v4188_v17 }
 0x306   : > { %v935_v23 = vpop.f32.mrb[2].mxu0 }
 0x307   : > { %v3107_v28 = vpop.f32.mrb[3].mxu0 }
 0x308   : > { %v4906_v28 = vsub.f32 %v1998_v48, %v2046_v2  ;;  %v2150_v48 = vsub.f32 %v4881_v40, %v5211_v26 }
 0x30a   : > { %v2151_v2 = vand.u32 4294901760, %v2150_v48 }
 0x30b   : > { %v4843_v44 = vpop.f32.mrb[2].mxu1 }
 0x30c   : > { %v3293_v49 = vpop.f32.mrb[3].mxu1 }
 0x30d   : > { %v2049_v49 = vand.u32 4294901760, %v1999_v3 }
 0x30f   : > { %v4913_v19 = vsub.f32 %v1999_v3, %v2049_v49  ;;  %v5210_v3 = vand.u32 4294901760, %v4895_v53 }
 0x313   : > { %v4845_v54 = vpop.f32.mrb[4].mxu1 }
 0x314   : > { %v3304_v59 = vpop.f32.mrb[5].mxu1 }
 0x315   : > { %v2052_v59 = vand.u32 4294901760, %v2000_v4 }
 0x317   : > { %v4911_v13 = vpack.c.bf16 %v2052_v59, %v2049_v49  ;;  %v4915_v20 = vsub.f32 %v2000_v4, %v2052_v59  ;;  %v5209_v4 = vand.u32 4294901760, %v4897_v7  ;;  %v2157_v59 = vsub.f32 %v4895_v53, %v5210_v3 }
 0x319   : > { %3762 = vmatpush3.bf16.msra.mxu1 %v4911_v13 }
 0x31a   : > { %3763 = vmatprep.subr.bf16.mxu1 %v4188_v17 }
 0x31b   : > { %v4847_v9 = vpop.f32.mrb[6].mxu1 }
 0x31c   : > { %v3315_v10 = vpop.f32.mrb[7].mxu1 }
 0x31d   : > { %v2100_v10 = vand.u32 4294901760, %v4856_v63 }
 0x31f   : > { %v2101_v21 = vsub.f32 %v4856_v63, %v2100_v10 }
 0x321   : > { %v2102_v57 = vand.u32 4294901760, %v2101_v21  ;;  %v2164_v21 = vsub.f32 %v4897_v7, %v5209_v4 }
 0x323   : > { %v4849_v11 = vpop.f32.mrb[8].mxu1 }
 0x324   : > { %v3337_v12 = vpop.f32.mrb[9].mxu1 }
 0x325   : > { %v2107_v12 = vand.u32 4294901760, %v4858_v33 }
 0x326   : > { %v1086_v34 = vpop.f32.mrb[4].mxu0 }
 0x327   : > { %v4851_v51 = vadd.f32 %v1086_v34, %v935_v23  ;;  %v3142_v60 = vpop.f32.mrb[5].mxu0  ;;  %v4904_v23 = vsub.f32 %v1997_v47, %v2043_v1  ;;  %v2108_v34 = vsub.f32 %v4858_v33, %v2107_v12  ;;  %v2143_v47 = vsub.f32 %v4879_v22, %v5212_v31 }
 0x329   : > { %v2109_v39 = vand.u32 4294901760, %v2108_v34  ;;  %v2144_v1 = vand.u32 4294901760, %v2143_v47  ;;  %v2158_v34 = vand.u32 4294901760, %v2157_v59  ;;  %v5206_v6 = vand.u32 4294901760, %v4904_v23 }
 0x32a   : > { %v5205_v59 = vand.u32 4294901760, %v4915_v20 }
 0x32b   : > { %v4934_v32 = vpack.c.bf16 %v2109_v39, %v2102_v57  ;;  %v4958_v49 = vpack.c.bf16 %v2151_v2, %v2144_v1  ;;  %v5207_v57 = vand.u32 4294901760, %v4901_v38  ;;  %v5204_v2 = vand.u32 4294901760, %v4913_v19 }
 0x32d   : > { %v2178_v50 = vsub.f32 %v4901_v38, %v5207_v57 }
 0x32f   : > { %v2179_v42 = vand.u32 4294901760, %v2178_v50 }
 0x346   : > { %v1190_v60 = vpop.f32.mrb[6].mxu0 }
 0x347   : > { %v1191_v16 = vadd.f32 %v1190_v60, %v4851_v51  ;;  %v3177_v5 = vpop.f32.mrb[7].mxu0  ;;  %v5213_v51 = vand.u32 4294901760, %v4873_v18  ;;  %v2165_v60 = vand.u32 4294901760, %v2164_v21 }
 0x348   : > { %v5208_v5 = vand.u32 4294901760, %v4899_v8 }
 0x349   : > { %v2136_v29 = vsub.f32 %v4873_v18, %v5213_v51  ;;  %v4968_v39 = vpack.c.bf16 %v2165_v60, %v2158_v34  ;;  %v2199_v34 = vsub.f32 %v4913_v19, %v5204_v2  ;;  %v2206_v60 = vsub.f32 %v4915_v20, %v5205_v59 }
 0x34a   : > { %v2171_v36 = vsub.f32 %v4899_v8, %v5208_v5  ;;  %v3797_v2 = vpack.c.bf16 %v4881_v40, %v4879_v22 }
 0x34b   : > { %v2137_v30 = vand.u32 4294901760, %v2136_v29  ;;  %v5203_v29 = vand.u32 4294901760, %v4906_v28  ;;  %v2207_v50 = vand.u32 4294901760, %v2206_v60  ;;  %v3803_v60 = vpack.c.bf16 %v4901_v38, %v4899_v8 }
 0x34c   : > { %v2172_v41 = vand.u32 4294901760, %v2171_v36  ;;  %v2200_v36 = vand.u32 4294901760, %v2199_v34  ;;  %v3800_v34 = vpack.c.bf16 %v4897_v7, %v4895_v53 }
 0x34d   : > { %v4948_v27 = vpack.c.bf16 %v2137_v30, %v2130_v24  ;;  %v2185_v30 = vsub.f32 %v4904_v23, %v5206_v6  ;;  %v2192_v47 = vsub.f32 %v4906_v28, %v5203_v29 }
 0x34e   : > { %v3779_v24 = vpack.c.bf16 %v2179_v42, %v2172_v41  ;;  %v3785_v41 = vpack.c.bf16 %v2207_v50, %v2200_v36  ;;  %v3809_v36 = vpack.c.bf16 %v4915_v20, %v4913_v19 }
 0x34f   : > { %v2186_v48 = vand.u32 4294901760, %v2185_v30  ;;  %v2193_v1 = vand.u32 4294901760, %v2192_v47  ;;  %v3788_v47 = vpack.c.bf16 %v4858_v33, %v4856_v63  ;;  %v5251_v63 = vand.u32 4294901760, %v4871_v52 }
 0x350   : > { %v5252_v33 = vand.u32 4294901760, %v4873_v18 }
 0x351   : > { %v3782_v21 = vpack.c.bf16 %v2193_v1, %v2186_v48  ;;  %v3791_v48 = vpack.c.bf16 %v4865_v15, %v4863_v35  ;;  %v3794_v1 = vpack.c.bf16 %v4873_v18, %v4871_v52  ;;  %v5254_v35 = vand.u32 4294901760, %v4881_v40 }
 0x352   : > { %v5257_v52 = vand.u32 4294901760, %v4899_v8  ;;  %v5258_v18 = vand.u32 4294901760, %v4901_v38  ;;  %v5260_v40 = vand.u32 4294901760, %v4906_v28 }
 0x366   : > { %v1279_v42 = vpop.f32.mrb[8].mxu0 }
 0x367   : > { %v1280_v29 = vadd.f32 %v1279_v42, %v1191_v16  ;;  %v3212_v30 = vpop.f32.mrb[9].mxu0  ;;  %v3806_v16 = vpack.c.bf16 %v4906_v28, %v4904_v23 }
 0x386   : > { %v1398_v50 = vpop.f32.mrb[10].mxu0 }
 0x387   : > { %v1399_v42 = vadd.f32 %v1398_v50, %v1280_v29  ;;  %v3247_v30 = vpop.f32.mrb[11].mxu0  ;;  %v2791_v29 = vld [vmem:[%s5182_s6 + $0x1] ss:$0 sm:$0xff] }
 0x3a6   : > { %v1485_v59 = vpop.f32.mrb[12].mxu0 }
 0x3a7   : > { %v1486_v6 = vadd.f32 %v1485_v59, %v1399_v42  ;;  %v3282_v57 = vpop.f32.mrb[13].mxu0 }
 0x3a9   : > { %v1568_v5 = vadd.f32 %v4843_v44, %v1486_v6 }
 0x3ab   : > { %v1659_v4 = vadd.f32 %v4845_v54, %v1568_v5 }
 0x3ad   : > { %v1739_v3 = vadd.f32 %v4847_v9, %v1659_v4 }
 0x3ae   : > { %v1815_v26 = vpop.f32.mrb[14].mxu0 }
 0x3af   : > { %v1816_v31 = vadd.f32 %v1815_v26, %v1739_v3  ;;  %v3326_v51 = vpop.f32.mrb[15].mxu0 }
 0x3b1   : > { %v1899_v58 = vadd.f32 %v4849_v11, %v1816_v31  ;;  %v3836_v11 = vpack.c.bf16 %v2107_v12, %v2100_v10  ;;  %v3842_v10 = vpack.c.bf16 %v5252_v33, %v5251_v63  ;;  %v5253_v12 = vand.u32 4294901760, %v4879_v22 }
 0x3b2   : > { %v5259_v22 = vand.u32 4294901760, %v4904_v23 }
 0x3b4   : > { %v3854_v31 = vpack.c.bf16 %v5260_v40, %v5259_v22 }
 0x3b6   : > { %v1973_v62 = vpop.f32.mrb[16].mxu0 }
 0x3b7   : > { %v1974_v50 = vadd.f32 %v1973_v62, %v1899_v58  ;;  %v3348_v30 = vpop.f32.mrb[17].mxu0  ;;  %v5250_v62 = vand.u32 4294901760, %v4865_v15  ;;  %v3845_v15 = vpack.c.bf16 %v5254_v35, %v5253_v12  ;;  %v5256_v58 = vand.u32 4294901760, %v4897_v7 }
 0x3b8   : > { %v5262_v7 = vand.u32 4294901760, %v4915_v20 }
 0x3b9   : > { %v1982_v59 = vadd.f32 %v2791_v29, %v1974_v50 }
 0x3bb   : > { %v1983_v57 = vmul.f32 0.2, %v1982_v59 }
 0x3bd   : > { %v1984_v42 = vmax.f32 %v1982_v59, %v1983_v57 }
 0x3bf   : > { %v5015_v44 = vand.u32 4294901760, %v1984_v42 }
 0x3c1   : > { %v2088_v54 = vsub.f32 %v1984_v42, %v5015_v44 }
 0x3c3   : > { %v2089_v9 = vand.u32 4294901760, %v2088_v54 }
 0x3c5   : > { %v2090_v4 = vsub.f32 %v2088_v54, %v2089_v9 }
 0x3c7   : > { %v2091_v26 = vand.u32 4294901760, %v2090_v4 }
 0x3c9   : > { %3382 = vmatmul.mubr.f32.vlgmr.msra.gmra.mrb[10].mxu1 %v2091_v26 }
 0x3ca   : > { %3765 = vmatpush3.bf16.msra.mxu1 %v4934_v32  ;;  %3416 = vmatprep.mubr.msk.f32.mxu1 %vm4187_vm0, %v4186_v0  ;;  %v3839_v32 = vpack.c.bf16 %v5250_v62, %v2114_v46  ;;  %v5255_v46 = vand.u32 4294901760, %v4895_v53  ;;  %v5261_v53 = vand.u32 4294901760, %v4913_v19 }
 0x3cb   : > { %3766 = vmatprep.subr.bf16.mxu1 %v4188_v17 }
 0x3cc   : > { %v3848_v51 = vpack.c.bf16 %v5256_v58, %v5255_v46 }
 0x3ce   : > { %3768 = vmatpush3.bf16.msra.mxu1 %v4938_v56  ;;  %v3851_v56 = vpack.c.bf16 %v5258_v18, %v5257_v52 }
 0x3cf   : > { %3769 = vmatprep.subr.bf16.mxu1 %v4188_v17 }
 0x3d2   : > { %3771 = vmatpush3.bf16.msra.mxu1 %v4948_v27  ;;  %v3857_v27 = vpack.c.bf16 %v5262_v7, %v5261_v53 }
 0x3d3   : > { %3772 = vmatprep.subr.bf16.mxu1 %v4188_v17 }
 0x3d6   : > { %3774 = vmatpush3.bf16.msra.mxu1 %v4958_v49 }
 0x3d7   : > { %3775 = vmatprep.subr.bf16.mxu1 %v4188_v17 }
 0x3da   : > { %3777 = vmatpush3.bf16.msra.mxu1 %v4968_v39 }
 0x3db   : > { %3778 = vmatprep.subr.bf16.mxu1 %v4188_v17 }
 0x3de   : > { %3780 = vmatpush3.bf16.msra.mxu1 %v3779_v24 }
 0x3df   : > { %3781 = vmatprep.subr.bf16.mxu1 %v4188_v17 }
 0x3e2   : > { %3783 = vmatpush3.bf16.msra.mxu1 %v3782_v21 }
 0x3e3   : > { %3784 = vmatprep.subr.bf16.mxu1 %v4188_v17 }
 0x3e6   : > { %3786 = vmatpush3.bf16.msra.mxu1 %v3785_v41 }
 0x3e7   : > { %3787 = vmatprep.subr.bf16.mxu1 %v4188_v17 }
 0x3e9   : > { %3417 = vmatmul.mubr.f32.vlgmr.msra.gmra.mrb[10].mxu1 %v5015_v44 }
 0x3ea   : > { %3789 = vmatpush3.bf16.msra.mxu1 %v3788_v47  ;;  %3451 = vmatprep.mubr.msk.f32.mxu1 %vm4187_vm0, %v4186_v0 }
 0x3eb   : > { %3790 = vmatprep.subr.bf16.mxu1 %v4188_v17 }
 0x3ee   : > { %3792 = vmatpush3.bf16.msra.mxu1 %v3791_v48 }
 0x3ef   : > { %3793 = vmatprep.subr.bf16.mxu1 %v4188_v17 }
 0x3f2   : > { %3795 = vmatpush3.bf16.msra.mxu1 %v3794_v1 }
 0x3f3   : > { %3796 = vmatprep.subr.bf16.mxu1 %v4188_v17 }
 0x3f6   : > { %3798 = vmatpush3.bf16.msra.mxu1 %v3797_v2 }
 0x3f7   : > { %3799 = vmatprep.subr.bf16.mxu1 %v4188_v17 }
 0x3fa   : > { %3801 = vmatpush3.bf16.msra.mxu1 %v3800_v34 }
 0x3fb   : > { %3802 = vmatprep.subr.bf16.mxu1 %v4188_v17 }
 0x3fe   : > { %3804 = vmatpush3.bf16.msra.mxu1 %v3803_v60 }
 0x3ff   : > { %3805 = vmatprep.subr.bf16.mxu1 %v4188_v17 }
 0x402   : > { %3807 = vmatpush3.bf16.msra.mxu1 %v3806_v16 }
 0x403   : > { %3808 = vmatprep.subr.bf16.mxu1 %v4188_v17 }
 0x406   : > { %3810 = vmatpush3.bf16.msra.mxu1 %v3809_v36 }
 0x407   : > { %3811 = vmatprep.subr.bf16.mxu1 %v4188_v17 }
 0x409   : > { %3452 = vmatmul.mubr.f32.vlgmr.msra.gmra.mrb[10].mxu1 %v2088_v54 }
 0x40a   : > { %3813 = vmatpush3.bf16.msra.mxu1 %v4853_v45  ;;  %3486 = vmatprep.mubr.msk.f32.mxu1 %vm4187_vm0, %v4186_v0 }
 0x40b   : > { %3814 = vmatprep.subr.bf16.mxu1 %v4188_v17 }
 0x40e   : > { %3816 = vmatpush3.bf16.msra.mxu1 %v4861_v14 }
 0x40f   : > { %3817 = vmatprep.subr.bf16.mxu1 %v4188_v17 }
 0x412   : > { %3819 = vmatpush3.bf16.msra.mxu1 %v4869_v43 }
 0x413   : > { %3820 = vmatprep.subr.bf16.mxu1 %v4188_v17 }
 0x416   : > { %3822 = vmatpush3.bf16.msra.mxu1 %v4877_v61 }
 0x417   : > { %3823 = vmatprep.subr.bf16.mxu1 %v4188_v17 }
 0x41a   : > { %3825 = vmatpush3.bf16.msra.mxu1 %v4885_v25 }
 0x41b   : > { %3826 = vmatprep.subr.bf16.mxu1 %v4188_v17 }
 0x41e   : > { %3828 = vmatpush3.bf16.msra.mxu1 %v4889_v37 }
 0x41f   : > { %3829 = vmatprep.subr.bf16.mxu1 %v4188_v17 }
 0x422   : > { %3831 = vmatpush3.bf16.msra.mxu1 %v4893_v55 }
 0x423   : > { %3832 = vmatprep.subr.bf16.mxu1 %v4188_v17 }
 0x426   : > { %3834 = vmatpush3.bf16.msra.mxu1 %v4911_v13 }
 0x427   : > { %3835 = vmatprep.subr.bf16.mxu1 %v4188_v17 }
 0x429   : > { %3487 = vmatmul.mubr.f32.vlgmr.msra.gmra.mrb[10].mxu1 %v2089_v9 }
 0x42a   : > { %3837 = vmatpush3.bf16.msra.mxu1 %v3836_v11  ;;  %3521 = vmatprep.mubr.msk.f32.mxu1 %vm4187_vm0, %v4186_v0 }
 0x42b   : > { %3838 = vmatprep.subr.bf16.mxu1 %v4188_v17 }
 0x42e   : > { %3840 = vmatpush3.bf16.msra.mxu1 %v3839_v32 }
 0x42f   : > { %3841 = vmatprep.subr.bf16.mxu1 %v4188_v17 }
 0x432   : > { %3843 = vmatpush3.bf16.msra.mxu1 %v3842_v10 }
 0x433   : > { %3844 = vmatprep.subr.bf16.mxu1 %v4188_v17 }
 0x436   : > { %3846 = vmatpush3.bf16.msra.mxu1 %v3845_v15 }
 0x437   : > { %3847 = vmatprep.subr.bf16.mxu1 %v4188_v17 }
 0x43a   : > { %3849 = vmatpush3.bf16.msra.mxu1 %v3848_v51 }
 0x43b   : > { %3850 = vmatprep.subr.bf16.mxu1 %v4188_v17 }
 0x43e   : > { %3852 = vmatpush3.bf16.msra.mxu1 %v3851_v56 }
 0x43f   : > { %3853 = vmatprep.subr.bf16.mxu1 %v4188_v17 }
 0x442   : > { %3855 = vmatpush3.bf16.msra.mxu1 %v3854_v31 }
 0x443   : > { %3856 = vmatprep.subr.bf16.mxu1 %v4188_v17 }
 0x446   : > { %3858 = vmatpush3.bf16.msra.mxu1 %v3857_v27 }
 0x447   : > { %3859 = vmatprep.subr.bf16.mxu1 %v4188_v17 }
 0x449   : > { %3522 = vmatmul.mubr.f32.vlgmr.msra.gmra.mrb[10].mxu1 %v5015_v44 }
 0x44a   : > { %3861 = vmatpush3.bf16.msra.mxu1 %v4853_v45  ;;  %3556 = vmatprep.mubr.msk.f32.mxu1 %vm4187_vm0, %v4186_v0  ;;  %v2792_v0 = vld [vmem:[%s5182_s6 + $0x2] ss:$0 sm:$0xff] }
 0x44b   : > { %3862 = vmatprep.subr.bf16.mxu1 %v4188_v17 }
 0x44e   : > { %3864 = vmatpush3.bf16.msra.mxu1 %v4861_v14 }
 0x44f   : > { %3865 = vmatprep.subr.bf16.mxu1 %v4188_v17 }
 0x452   : > { %3867 = vmatpush3.bf16.msra.mxu1 %v4869_v43 }
 0x453   : > { %3868 = vmatprep.subr.bf16.mxu1 %v4188_v17 }
 0x456   : > { %3870 = vmatpush3.bf16.msra.mxu1 %v4877_v61 }
 0x457   : > { %3871 = vmatprep.subr.bf16.mxu1 %v4188_v17 }
 0x45a   : > { %3873 = vmatpush3.bf16.msra.mxu1 %v4885_v25 }
 0x45b   : > { %3874 = vmatprep.subr.bf16.mxu1 %v4188_v17 }
 0x45e   : > { %3876 = vmatpush3.bf16.msra.mxu1 %v4889_v37 }
 0x45f   : > { %3877 = vmatprep.subr.bf16.mxu1 %v4188_v17 }
 0x462   : > { %3879 = vmatpush3.bf16.msra.mxu1 %v4893_v55 }
 0x463   : > { %3880 = vmatprep.subr.bf16.mxu1 %v4188_v17 }
 0x466   : > { %3882 = vmatpush3.bf16.msra.mxu1 %v4911_v13 }
 0x469   : > { %3557 = vmatmul.mubr.f32.vlgmr.msra.gmra.mrb[10].mxu1 %v5015_v44 }
 0x53c   : > { %v2643_v45 = vpop.f32.mrb[10].mxu1 }
 0x53d   : > { %v3885_v14 = vadd.f32 %v2792_v0, %v2643_v45  ;;  %v3558_v43 = vpop.f32.mrb[11].mxu1 }
 0x53f   : > { %v2647_v61 = vmul.f32 0.2, %v3885_v14 }
 0x541   : > { %v2648_v25 = vmax.f32 %v3885_v14, %v2647_v61 }
 0x543   : > { %2649 = vst [vmem:[%s348_s14] sm:$0xff] %v2648_v25 }
 0x544   : > { %4117 = shalt.err (!%p4114_p5)
}
 0x545   : > { %s4118_s18 = scalar_lea.hbm %s5132_s30, 128  ;;  %s4122_s21 = scalar_lea.hbm %s5183_s7, 256 }
 0x546   : > { %p4119_p0 = scmp.ne.s32.totalorder %s5132_s30, %s4118_s18  ;;  %p4123_p12 = scmp.lt.u32.totalorder %s5132_s30, %s5183_s7 }
 0x547   : > { %p4124_p2 = scmp.lt.u32.totalorder %s4122_s21, %s4118_s18  ;;  %p4126_p4 = scmp.lt.u32.totalorder %s4118_s18, %s5132_s30 }
 0x548   : > { %p4120_p11 = pnand %p4119_p0, %p4368_p6 }
 0x549   : > { %p4125_p1 = por %p4124_p2, %p4123_p12 }
 0x54a   : > { %p4121_p9 = pneg %p4120_p11 }
 0x54b   : > { %p4127_p8 = por %p4126_p4, %p4125_p1 }
 0x54d   : > { %p4128_p3 = pnand %p4127_p8, %p4121_p9 }
 0x54f   : > { %4131 = shalt.err (!%p4128_p3)
}
 0x550   : > { %3918 = dma.vmem_to_hbm [thread:$0]  (%p4368_p6), %s5134_s23, 128, %s5132_s30, %s2651_s9  }
 0x551 PF: > { %s2676_s10 = sand.u32 1, %s4166_s24   ;;  %p5263_p7 = scmp.ne.s32.totalorder %s5217_s8, 0 }
 0x552   : > { %p5264_p10 = scmp.ge.s32.totalorder %s4178_s27, 2  ;;  %s2677_s12 = scalar_lea.sflag [#allocation4], %s2676_s10 }
 0x554   : > { %p3935_p13 = pnand %p5264_p10, %p5263_p7 }
 0x556   : > { %4161 = dma.done.wait (!%p3935_p13), %s2677_s12, 128  }
 0x557   : > { %4163 = vsyncadd (!%p3935_p13), %s2677_s12, 4294967168  ;;  %p22_p5 = scmp.ge.s32.totalorder %s4354_s22, 4   ;;  %s5265_s24 = smov %s4170_s25 }
 0x558   : > { %s5266_s25 = smov %s4174_s26  ;;  %s5267_s26 = smov %s4364_s19 }
 0x559   : > { %s5268_s27 = smov %s4354_s22  ;;  %24 = sbr.rel (!%p22_p5) target bundleno = 7 (0x7), region = 108 }
 0x560   :  { %2682 = vsyncpa [#allocation3], 1 }
 0x561   :  { %2684 = vsyncpa [#allocation3 + $0x1], 1 }
 0x562   :  { %2685 = vsyncpa [#allocation6], 1 }
 0x563   :  { %2686 = vsyncpa [#allocation9], 1 }
 0x564   :  { %2687 = vsyncpa [#allocation4], 1 }
 0x565   :  { %2689 = vsyncpa [#allocation4 + $0x1], 1 }

</bundles_post_ra>
